<compile_context>
chip_gen: v6e
topology: v6e:2x2x1
jax: 0.10.0
libtpu: 0.0.40
codegen_flags: <defaults>
</compile_context>

<pallas_src>
import functools

import jax
import jax.numpy as jnp
from jax.experimental import pallas as pl
from jax.experimental.pallas import tpu as pltpu

EPS = 1e-5
LANE = 128


# ----------------------------- small helpers -----------------------------

def _round_up(x, m):
    return (x + m - 1) // m * m


def _pad_to(a, shape):
    return jnp.pad(a, [(0, t - s) for s, t in zip(a.shape, shape)])


def _pick_row_tile(m, cap):
    """Largest multiple-of-8 divisor of m that is <= cap (falls back to m)."""
    cap = min(cap, m)
    cap -= cap % 8
    for t in range(cap, 0, -8):
        if m % t == 0:
            return t
    return m


def _cparams(*byte_terms):
    # Scoped-VMEM limit sized to the (double-buffered) tile footprint, raised
    # above the 16/32 MiB defaults but kept under v7x's 64 MiB physical VMEM.
    est = 2 * int(sum(byte_terms)) + (4 << 20)
    return pltpu.CompilerParams(
        dimension_semantics=("parallel",),
        vmem_limit_bytes=int(min(48 << 20, max(32 << 20, est))))


def _stats(y):
    # Single-pass BN statistics: rows are [sum, sum_of_squares] per channel.
    s = jnp.sum(y, axis=0, keepdims=True)
    q = jnp.sum(y * y, axis=0, keepdims=True)
    return jnp.concatenate([s, q], axis=0)          # (2, C)


# ------------------------------ stage kernels ------------------------------

def _conv1_kernel(x_ref, w_ref, y_ref, st_ref):
    # 1x1 conv as (TM, Cin) @ (Cin, C): bf16 operands, f32 accumulation.
    y = jnp.dot(x_ref[...].astype(jnp.bfloat16), w_ref[...],
                preferred_element_type=jnp.float32)
    y_ref[...] = y.astype(y_ref.dtype)
    st_ref[0] = _stats(y)


def _bn_relu_conv3x3_kernel(y1_ref, sc_ref, bi_ref, w2_ref, y2_ref, st_ref,
                            pad_ref):
    # One image per grid step: folded bn1 + relu, then 3x3 conv (pad=1,
    # stride=1) as a single im2col matmul with K = 9*C.
    _, H, W, C = y1_ref.shape
    a = jnp.maximum(y1_ref[0].astype(jnp.float32) * sc_ref[...] + bi_ref[...],
                    0.0)                                        # (H, W, C) f32

    # Zero only the 1-wide halo of the padded scratch, then write the interior.
    zr = jnp.zeros((1, W + 2, C), jnp.float32)
    zc = jnp.zeros((H + 2, 1, C), jnp.float32)
    pad_ref[0:1, :, :] = zr
    pad_ref[H + 1:H + 2, :, :] = zr
    pad_ref[:, 0:1, :] = zc
    pad_ref[:, W + 1:W + 2, :] = zc
    pad_ref[1:H + 1, 1:W + 1, :] = a

    yp = pad_ref[...]                                           # (H+2, W+2, C)
    taps = [yp[dh:dh + H, dw:dw + W, :] for dh in range(3) for dw in range(3)]
    pcat = jnp.concatenate(taps, axis=-1)                       # (H, W, 9*C)
    pcat = pcat.reshape(H * W, 9 * C).astype(jnp.bfloat16)
    y2 = jnp.dot(pcat, w2_ref[...], preferred_element_type=jnp.float32)
    y2_ref[0] = y2.reshape(H, W, C).astype(y2_ref.dtype)
    st_ref[0] = _stats(y2)


def _bn_relu_conv1_kernel(x_ref, sc_ref, bi_ref, w_ref, y_ref, st_ref):
    a = jnp.maximum(x_ref[...].astype(jnp.float32) * sc_ref[...] + bi_ref[...],
                    0.0)
    y = jnp.dot(a.astype(jnp.bfloat16), w_ref[...],
                preferred_element_type=jnp.float32)
    y_ref[...] = y.astype(y_ref.dtype)
    st_ref[0] = _stats(y)


def _bn_add_relu_kernel(y_ref, sc_ref, bi_ref, x_ref, o_ref):
    y = y_ref[...].astype(jnp.float32) * sc_ref[...] + bi_ref[...]
    o_ref[...] = jnp.maximum(y + x_ref[...].astype(jnp.float32), 0.0)


# ------------------------------ host-side glue ------------------------------

def _finalize_bn(partials, count, gamma, beta):
    """Fold per-tile [sum, sum_sq] into BN scale/bias (training-mode, biased var)."""
    s = jnp.sum(partials[:, 0, :], axis=0)
    q = jnp.sum(partials[:, 1, :], axis=0)
    mean = s / count
    var = jnp.maximum(q / count - mean * mean, 0.0)
    scale = gamma * jax.lax.rsqrt(var + EPS)
    bias = beta - mean * scale
    return scale.reshape(1, -1), bias.reshape(1, -1)


def bottleneck_pallas(x_nhwc, params, *, row_tile_cap=1024):
    N, H, W, Cin = x_nhwc.shape
    C = params["w1"].shape[1]
    Cin_p, C_p = _round_up(Cin, LANE), _round_up(C, LANE)
    M = N * H * W
    TM = _pick_row_tile(M, row_tile_cap)
    G = M // TM
    f32, bf16 = jnp.float32, jnp.bfloat16

    # Host-side packing: lane-dense channel padding, bf16 weights, im2col w2.
    x2d = _pad_to(x_nhwc, (N, H, W, Cin_p)).reshape(M, Cin_p).astype(f32)
    w1p = _pad_to(params["w1"], (Cin_p, C_p)).astype(bf16)
    w2p = _pad_to(params["w2"], (3, 3, C_p, C_p)).reshape(9 * C_p, C_p).astype(bf16)
    w3p = _pad_to(params["w3"], (C_p, Cin_p)).astype(bf16)
    g1 = _pad_to(params["g1"].reshape(-1), (C_p,)).astype(f32)
    b1 = _pad_to(params["b1"].reshape(-1), (C_p,)).astype(f32)
    g2 = _pad_to(params["g2"].reshape(-1), (C_p,)).astype(f32)
    b2 = _pad_to(params["b2"].reshape(-1), (C_p,)).astype(f32)
    g3 = _pad_to(params["g3"].reshape(-1), (Cin_p,)).astype(f32)
    b3 = _pad_to(params["b3"].reshape(-1), (Cin_p,)).astype(f32)

    row = lambda i: (i, 0)
    whole = lambda i: (0, 0)
    stat = lambda i: (i, 0, 0)
    img = lambda n: (n, 0, 0, 0)

    # ---- stage 1: conv1 (1x1) + BN1 partial stats ----
    y1, st1 = pl.pallas_call(
        _conv1_kernel,
        grid=(G,),
        in_specs=[pl.BlockSpec((TM, Cin_p), row),
                  pl.BlockSpec((Cin_p, C_p), whole)],
        out_specs=(pl.BlockSpec((TM, C_p), row),
                   pl.BlockSpec((1, 2, C_p), stat)),
        out_shape=(jax.ShapeDtypeStruct((M, C_p), bf16),
                   jax.ShapeDtypeStruct((G, 2, C_p), f32)),
        compiler_params=_cparams(TM * Cin_p * 4, Cin_p * C_p * 2, TM * C_p * 6),
    )(x2d, w1p)
    sc1, bi1 = _finalize_bn(st1, M, g1, b1)

    # ---- stage 2: bn1 + relu + conv2 (3x3) + BN2 partial stats ----
    y2, st2 = pl.pallas_call(
        _bn_relu_conv3x3_kernel,
        grid=(N,),
        in_specs=[pl.BlockSpec((1, H, W, C_p), img),
                  pl.BlockSpec((1, C_p), whole),
                  pl.BlockSpec((1, C_p), whole),
                  pl.BlockSpec((9 * C_p, C_p), whole)],
        out_specs=(pl.BlockSpec((1, H, W, C_p), img),
                   pl.BlockSpec((1, 2, C_p), stat)),
        out_shape=(jax.ShapeDtypeStruct((N, H, W, C_p), bf16),
                   jax.ShapeDtypeStruct((N, 2, C_p), f32)),
        scratch_shapes=[pltpu.VMEM((H + 2, W + 2, C_p), f32)],
        compiler_params=_cparams(H * W * C_p * 4, 9 * C_p * C_p * 2,
                                 (H + 2) * (W + 2) * C_p * 4,
                                 9 * H * W * C_p * 6),
    )(y1.reshape(N, H, W, C_p), sc1, bi1, w2p)
    sc2, bi2 = _finalize_bn(st2, M, g2, b2)

    # ---- stage 3: bn2 + relu + conv3 (1x1) + BN3 partial stats ----
    y3, st3 = pl.pallas_call(
        _bn_relu_conv1_kernel,
        grid=(G,),
        in_specs=[pl.BlockSpec((TM, C_p), row),
                  pl.BlockSpec((1, C_p), whole),
                  pl.BlockSpec((1, C_p), whole),
                  pl.BlockSpec((C_p, Cin_p), whole)],
        out_specs=(pl.BlockSpec((TM, Cin_p), row),
                   pl.BlockSpec((1, 2, Cin_p), stat)),
        out_shape=(jax.ShapeDtypeStruct((M, Cin_p), bf16),
                   jax.ShapeDtypeStruct((G, 2, Cin_p), f32)),
        compiler_params=_cparams(TM * C_p * 2, C_p * Cin_p * 2, TM * Cin_p * 6),
    )(y2.reshape(M, C_p), sc2, bi2, w3p)
    sc3, bi3 = _finalize_bn(st3, M, g3, b3)

    # ---- stage 4: bn3 + residual add + relu (x tile re-read here) ----
    out2d = pl.pallas_call(
        _bn_add_relu_kernel,
        grid=(G,),
        in_specs=[pl.BlockSpec((TM, Cin_p), row),
                  pl.BlockSpec((1, Cin_p), whole),
                  pl.BlockSpec((1, Cin_p), whole),
                  pl.BlockSpec((TM, Cin_p), row)],
        out_specs=pl.BlockSpec((TM, Cin_p), row),
        out_shape=jax.ShapeDtypeStruct((M, Cin_p), f32),
        compiler_params=_cparams(TM * Cin_p * 10),
    )(y3, sc3, bi3, x2d)

    return out2d[:, :Cin].reshape(N, H, W, Cin)


# ------------------------------ pure-JAX reference ------------------------------

def bottleneck_ref(x_nhwc, params):
    """f32 reference mirroring the PyTorch forward (training-mode BN)."""
    def bn(y, g, b):
        mean = jnp.mean(y, axis=(0, 1, 2), keepdims=True)
        var = jnp.mean((y - mean) ** 2, axis=(0, 1, 2), keepdims=True)
        return ((y - mean) / jnp.sqrt(var + EPS) * g.reshape(1, 1, 1, -1)
                + b.reshape(1, 1, 1, -1))

    dn = ('NHWC', 'HWIO', 'NHWC')
    y = jax.lax.conv_general_dilated(x_nhwc, params["w1"][None, None], (1, 1),
                                     'VALID', dimension_numbers=dn)
    y = jax.nn.relu(bn(y, params["g1"], params["b1"]))
    y = jax.lax.conv_general_dilated(y, params["w2"], (1, 1),
                                     ((1, 1), (1, 1)), dimension_numbers=dn)
    y = jax.nn.relu(bn(y, params["g2"], params["b2"]))
    y = jax.lax.conv_general_dilated(y, params["w3"][None, None], (1, 1),
                                     'VALID', dimension_numbers=dn)
    y = bn(y, params["g3"], params["b3"])
    return jax.nn.relu(y + x_nhwc)


if __name__ == "__main__":
    key = jax.random.PRNGKey(0)
    N, H, W = 2, 16, 16
    out_channel = 4
    expansion = 4
    # identity add with downsample=None requires in_channel == out_channel * expansion
    in_channel = out_channel * expansion   # = 16

    ks = jax.random.split(key, 10)
    # PyTorch conv weights are (Cout, Cin, kh, kw); stored here pre-transposed.
    w1 = 0.1 * jax.random.normal(ks[0], (in_channel, out_channel), jnp.float32)
    w2 = 0.1 * jax.random.normal(ks[1], (3, 3, out_channel, out_channel), jnp.float32)
    w3 = 0.1 * jax.random.normal(ks[2], (out_channel, out_channel * expansion), jnp.float32)
    g1 = 1.0 + 0.1 * jax.random.normal(ks[3], (out_channel,), jnp.float32)
    b1 = 0.1 * jax.random.normal(ks[4], (out_channel,), jnp.float32)
    g2 = 1.0 + 0.1 * jax.random.normal(ks[5], (out_channel,), jnp.float32)
    b2 = 0.1 * jax.random.normal(ks[6], (out_channel,), jnp.float32)
    g3 = 1.0 + 0.1 * jax.random.normal(ks[7], (out_channel * expansion,), jnp.float32)
    b3 = 0.1 * jax.random.normal(ks[8], (out_channel * expansion,), jnp.float32)
    params = dict(w1=w1, w2=w2, w3=w3, g1=g1, b1=b1, g2=g2, b2=b2, g3=g3, b3=b3)

    # PyTorch-style NCHW input, transposed to NHWC for the kernels.
    x_nchw = jax.random.normal(ks[9], (N, in_channel, H, W), jnp.float32)
    x_nhwc = jnp.transpose(x_nchw, (0, 2, 3, 1))

    # row_tile_cap=256 so the demo (M = 512 rows) exercises a multi-step grid.
    fwd = jax.jit(functools.partial(bottleneck_pallas, row_tile_cap=256))
    out = jax.block_until_ready(fwd(x_nhwc, params))
    ref = bottleneck_ref(x_nhwc, params)
    assert out.shape == (N, H, W, in_channel)
    # Tolerance reflects bf16 MXU operands (f32 accumulation / BN / residual).
    if not jnp.allclose(out, ref, rtol=5e-2, atol=5e-2):
        raise AssertionError(
            f"mismatch: max abs err {float(jnp.max(jnp.abs(out - ref)))}")
    print("KERNEL_OK")
</pallas_src>

<mosaic_0001>
module attributes {stable_mosaic.version = 11 : i64} {
  func.func @_conv1_kernel(%arg0: i32, %arg1: memref<256x128xf32, #tpu.memory_space<vmem>>, %arg2: memref<128x128xbf16, #tpu.memory_space<vmem>>, %arg3: memref<256x128xbf16, #tpu.memory_space<vmem>>, %arg4: memref<1x2x128xf32, #tpu.memory_space<vmem>>) attributes {dimension_semantics = [#tpu.dimension_semantics<parallel>], iteration_bounds = array<i64: 2>, scalar_prefetch = 0 : i64, scratch_operands = 0 : i64, tpu.core_type = #tpu.core_type<tc>, window_params = [{transform_indices = @transform_0, window_bounds = array<i64: 256, 128>}, {pipeline_mode = #tpu.pipeline_mode<synchronous>, transform_indices = @transform_1, window_bounds = array<i64: 128, 128>}, {transform_indices = @transform_2, window_bounds = array<i64: 256, 128>}, {transform_indices = @transform_3, window_bounds = array<i64: 1, 2, 128>}]} {
    %c0 = arith.constant 0 : index
    %c0_0 = arith.constant 0 : index
    %0 = vector.load %arg1[%c0, %c0_0] : memref<256x128xf32, #tpu.memory_space<vmem>>, vector<256x128xf32>
    %1 = arith.truncf %0 : vector<256x128xf32> to vector<256x128xbf16>
    %c0_1 = arith.constant 0 : index
    %c0_2 = arith.constant 0 : index
    %2 = vector.load %arg2[%c0_1, %c0_2] : memref<128x128xbf16, #tpu.memory_space<vmem>>, vector<128x128xbf16>
    %cst = arith.constant dense<0.000000e+00> : vector<256x128xf32>
    %3 = tpu.matmul %1, %2, %cst {dimension_numbers = #tpu.dot_dimension_numbers<[1], [0], [0], [1], [0, 0, 1, 1], [], []>} : vector<256x128xbf16>, vector<128x128xbf16>, vector<256x128xf32> -> vector<256x128xf32>
    %4 = arith.truncf %3 : vector<256x128xf32> to vector<256x128xbf16>
    %c0_3 = arith.constant 0 : index
    %c0_4 = arith.constant 0 : index
    %5 = vector.load %arg3[%c0_3, %c0_4] : memref<256x128xbf16, #tpu.memory_space<vmem>>, vector<256x128xbf16>
    tpu.vector_store %arg3[%c0_3, %c0_4], %4 {strides = array<i32>} : memref<256x128xbf16, #tpu.memory_space<vmem>>, vector<256x128xbf16>,
    %cst_5 = arith.constant dense<0.000000e+00> : vector<128xf32>
    %6 = vector.multi_reduction <add>, %3, %cst_5 [0] : vector<256x128xf32> to vector<128xf32>
    %7 = vector.shape_cast %6 : vector<128xf32> to vector<1x128xf32>
    %8 = arith.mulf %3, %3 : vector<256x128xf32>
    %cst_6 = arith.constant dense<0.000000e+00> : vector<128xf32>
    %9 = vector.multi_reduction <add>, %8, %cst_6 [0] : vector<256x128xf32> to vector<128xf32>
    %10 = vector.shape_cast %9 : vector<128xf32> to vector<1x128xf32>
    %11 = tpu.concatenate %7, %10 in 0 : vector<1x128xf32>, vector<1x128xf32> -> vector<2x128xf32>
    %c0_7 = arith.constant 0 : index
    %c0_8 = arith.constant 0 : index
    %c0_9 = arith.constant 0 : index
    %12 = vector.load %arg4[%c0_7, %c0_8, %c0_9] : memref<1x2x128xf32, #tpu.memory_space<vmem>>, vector<1x2x128xf32>
    %13 = vector.shape_cast %12 : vector<1x2x128xf32> to vector<2x128xf32>
    %14 = vector.shape_cast %11 : vector<2x128xf32> to vector<1x2x128xf32>
    tpu.vector_store %arg4[%c0_7, %c0_8, %c0_9], %14 {strides = array<i32>} : memref<1x2x128xf32, #tpu.memory_space<vmem>>, vector<1x2x128xf32>,
    return
  }
  func.func @transform_0(%arg0: i32) -> (i32, i32) {
    %c0_i32 = arith.constant 0 : i32
    %c0_i32_0 = arith.constant 0 : i32
    return %arg0, %c0_i32 : i32, i32
  }
  func.func @transform_1(%arg0: i32) -> (i32, i32) {
    %c0_i32 = arith.constant 0 : i32
    %c0_i32_0 = arith.constant 0 : i32
    %c0_i32_1 = arith.constant 0 : i32
    return %c0_i32, %c0_i32_0 : i32, i32
  }
  func.func @transform_2(%arg0: i32) -> (i32, i32) {
    %c0_i32 = arith.constant 0 : i32
    %c0_i32_0 = arith.constant 0 : i32
    return %arg0, %c0_i32 : i32, i32
  }
  func.func @transform_3(%arg0: i32) -> (i32, i32, i32) {
    %c0_i32 = arith.constant 0 : i32
    %c0_i32_0 = arith.constant 0 : i32
    %c0_i32_1 = arith.constant 0 : i32
    return %arg0, %c0_i32, %c0_i32_0 : i32, i32, i32
  }
}

module attributes {stable_mosaic.version = 11 : i64} {
  func.func @_bn_relu_conv3x3_kernel(%arg0: i32, %arg1: memref<1x16x16x128xbf16, #tpu.memory_space<vmem>>, %arg2: memref<1x128xf32, #tpu.memory_space<vmem>>, %arg3: memref<1x128xf32, #tpu.memory_space<vmem>>, %arg4: memref<1152x128xbf16, #tpu.memory_space<vmem>>, %arg5: memref<1x16x16x128xbf16, #tpu.memory_space<vmem>>, %arg6: memref<1x2x128xf32, #tpu.memory_space<vmem>>, %arg7: memref<18x18x128xf32, #tpu.memory_space<vmem>>) attributes {dimension_semantics = [#tpu.dimension_semantics<parallel>], iteration_bounds = array<i64: 2>, scalar_prefetch = 0 : i64, scratch_operands = 1 : i64, tpu.core_type = #tpu.core_type<tc>, window_params = [{transform_indices = @transform_0, window_bounds = array<i64: 1, 16, 16, 128>}, {pipeline_mode = #tpu.pipeline_mode<synchronous>, transform_indices = @transform_1, window_bounds = array<i64: 1, 128>}, {pipeline_mode = #tpu.pipeline_mode<synchronous>, transform_indices = @transform_2, window_bounds = array<i64: 1, 128>}, {pipeline_mode = #tpu.pipeline_mode<synchronous>, transform_indices = @transform_3, window_bounds = array<i64: 1152, 128>}, {transform_indices = @transform_4, window_bounds = array<i64: 1, 16, 16, 128>}, {transform_indices = @transform_5, window_bounds = array<i64: 1, 2, 128>}]} {
    %c0 = arith.constant 0 : index
    %c0_0 = arith.constant 0 : index
    %c0_1 = arith.constant 0 : index
    %c0_2 = arith.constant 0 : index
    %0 = vector.load %arg1[%c0, %c0_0, %c0_1, %c0_2] : memref<1x16x16x128xbf16, #tpu.memory_space<vmem>>, vector<1x16x16x128xbf16>
    %1 = vector.shape_cast %0 : vector<1x16x16x128xbf16> to vector<16x16x128xbf16>
    %2 = arith.extf %1 : vector<16x16x128xbf16> to vector<16x16x128xf32>
    %c0_3 = arith.constant 0 : index
    %c0_4 = arith.constant 0 : index
    %3 = vector.load %arg2[%c0_3, %c0_4] : memref<1x128xf32, #tpu.memory_space<vmem>>, vector<1x128xf32>
    %4 = vector.shape_cast %3 : vector<1x128xf32> to vector<1x1x128xf32>
    %5 = vector.broadcast %4 : vector<1x1x128xf32> to vector<16x16x128xf32>
    %6 = arith.mulf %2, %5 : vector<16x16x128xf32>
    %c0_5 = arith.constant 0 : index
    %c0_6 = arith.constant 0 : index
    %7 = vector.load %arg3[%c0_5, %c0_6] : memref<1x128xf32, #tpu.memory_space<vmem>>, vector<1x128xf32>
    %8 = vector.shape_cast %7 : vector<1x128xf32> to vector<1x1x128xf32>
    %9 = vector.broadcast %8 : vector<1x1x128xf32> to vector<16x16x128xf32>
    %10 = arith.addf %6, %9 : vector<16x16x128xf32>
    %cst = arith.constant 0.000000e+00 : f32
    %11 = vector.broadcast %cst : f32 to vector<16x16x128xf32>
    %12 = arith.maximumf %10, %11 : vector<16x16x128xf32>
    %cst_7 = arith.constant 0.000000e+00 : f32
    %13 = vector.broadcast %cst_7 : f32 to vector<1x18x128xf32>
    %cst_8 = arith.constant 0.000000e+00 : f32
    %14 = vector.broadcast %cst_8 : f32 to vector<18x1x128xf32>
    %c0_9 = arith.constant 0 : index
    %c0_10 = arith.constant 0 : index
    %c0_11 = arith.constant 0 : index
    %15 = vector.load %arg7[%c0_9, %c0_10, %c0_11] : memref<18x18x128xf32, #tpu.memory_space<vmem>>, vector<1x18x128xf32>
    tpu.vector_store %arg7[%c0_9, %c0_10, %c0_11], %13 {strides = array<i32>} : memref<18x18x128xf32, #tpu.memory_space<vmem>>, vector<1x18x128xf32>,
    %c17 = arith.constant 17 : index
    %c0_12 = arith.constant 0 : index
    %c0_13 = arith.constant 0 : index
    %16 = vector.load %arg7[%c17, %c0_12, %c0_13] : memref<18x18x128xf32, #tpu.memory_space<vmem>>, vector<1x18x128xf32>
    tpu.vector_store %arg7[%c17, %c0_12, %c0_13], %13 {strides = array<i32>} : memref<18x18x128xf32, #tpu.memory_space<vmem>>, vector<1x18x128xf32>,
    %c0_14 = arith.constant 0 : index
    %c0_15 = arith.constant 0 : index
    %c0_16 = arith.constant 0 : index
    %17 = vector.load %arg7[%c0_14, %c0_15, %c0_16] : memref<18x18x128xf32, #tpu.memory_space<vmem>>, vector<18x1x128xf32>
    tpu.vector_store %arg7[%c0_14, %c0_15, %c0_16], %14 {strides = array<i32>} : memref<18x18x128xf32, #tpu.memory_space<vmem>>, vector<18x1x128xf32>,
    %c0_17 = arith.constant 0 : index
    %c17_18 = arith.constant 17 : index
    %c0_19 = arith.constant 0 : index
    %18 = vector.load %arg7[%c0_17, %c17_18, %c0_19] : memref<18x18x128xf32, #tpu.memory_space<vmem>>, vector<18x1x128xf32>
    tpu.vector_store %arg7[%c0_17, %c17_18, %c0_19], %14 {strides = array<i32>} : memref<18x18x128xf32, #tpu.memory_space<vmem>>, vector<18x1x128xf32>,
    %c1 = arith.constant 1 : index
    %c1_20 = arith.constant 1 : index
    %c0_21 = arith.constant 0 : index
    %19 = vector.load %arg7[%c1, %c1_20, %c0_21] : memref<18x18x128xf32, #tpu.memory_space<vmem>>, vector<16x16x128xf32>
    tpu.vector_store %arg7[%c1, %c1_20, %c0_21], %12 {strides = array<i32>} : memref<18x18x128xf32, #tpu.memory_space<vmem>>, vector<16x16x128xf32>,
    %c0_22 = arith.constant 0 : index
    %c0_23 = arith.constant 0 : index
    %c0_24 = arith.constant 0 : index
    %20 = vector.load %arg7[%c0_22, %c0_23, %c0_24] : memref<18x18x128xf32, #tpu.memory_space<vmem>>, vector<18x18x128xf32>
    %21 = vector.extract_strided_slice %20 {offsets = [0, 0, 0], sizes = [16, 16, 128], strides = [1, 1, 1]} : vector<18x18x128xf32> to vector<16x16x128xf32>
    %22 = vector.extract_strided_slice %20 {offsets = [0, 1, 0], sizes = [16, 16, 128], strides = [1, 1, 1]} : vector<18x18x128xf32> to vector<16x16x128xf32>
    %23 = vector.extract_strided_slice %20 {offsets = [0, 2, 0], sizes = [16, 16, 128], strides = [1, 1, 1]} : vector<18x18x128xf32> to vector<16x16x128xf32>
    %24 = vector.extract_strided_slice %20 {offsets = [1, 0, 0], sizes = [16, 16, 128], strides = [1, 1, 1]} : vector<18x18x128xf32> to vector<16x16x128xf32>
    %25 = vector.extract_strided_slice %20 {offsets = [1, 1, 0], sizes = [16, 16, 128], strides = [1, 1, 1]} : vector<18x18x128xf32> to vector<16x16x128xf32>
    %26 = vector.extract_strided_slice %20 {offsets = [1, 2, 0], sizes = [16, 16, 128], strides = [1, 1, 1]} : vector<18x18x128xf32> to vector<16x16x128xf32>
    %27 = vector.extract_strided_slice %20 {offsets = [2, 0, 0], sizes = [16, 16, 128], strides = [1, 1, 1]} : vector<18x18x128xf32> to vector<16x16x128xf32>
    %28 = vector.extract_strided_slice %20 {offsets = [2, 1, 0], sizes = [16, 16, 128], strides = [1, 1, 1]} : vector<18x18x128xf32> to vector<16x16x128xf32>
    %29 = vector.extract_strided_slice %20 {offsets = [2, 2, 0], sizes = [16, 16, 128], strides = [1, 1, 1]} : vector<18x18x128xf32> to vector<16x16x128xf32>
    %30 = tpu.concatenate %21, %22, %23, %24, %25, %26, %27, %28, %29 in 2 : vector<16x16x128xf32>, vector<16x16x128xf32>, vector<16x16x128xf32>, vector<16x16x128xf32>, vector<16x16x128xf32>, vector<16x16x128xf32>, vector<16x16x128xf32>, vector<16x16x128xf32>, vector<16x16x128xf32> -> vector<16x16x1152xf32>
    %31 = vector.shape_cast %30 : vector<16x16x1152xf32> to vector<256x1152xf32>
    %32 = arith.truncf %31 : vector<256x1152xf32> to vector<256x1152xbf16>
    %c0_25 = arith.constant 0 : index
    %c0_26 = arith.constant 0 : index
    %33 = vector.load %arg4[%c0_25, %c0_26] : memref<1152x128xbf16, #tpu.memory_space<vmem>>, vector<1152x128xbf16>
    %cst_27 = arith.constant dense<0.000000e+00> : vector<256x128xf32>
    %34 = tpu.matmul %32, %33, %cst_27 {dimension_numbers = #tpu.dot_dimension_numbers<[1], [0], [0], [1], [0, 0, 1, 1], [], []>} : vector<256x1152xbf16>, vector<1152x128xbf16>, vector<256x128xf32> -> vector<256x128xf32>
    %35 = vector.shape_cast %34 : vector<256x128xf32> to vector<16x16x128xf32>
    %36 = arith.truncf %35 : vector<16x16x128xf32> to vector<16x16x128xbf16>
    %c0_28 = arith.constant 0 : index
    %c0_29 = arith.constant 0 : index
    %c0_30 = arith.constant 0 : index
    %c0_31 = arith.constant 0 : index
    %37 = vector.load %arg5[%c0_28, %c0_29, %c0_30, %c0_31] : memref<1x16x16x128xbf16, #tpu.memory_space<vmem>>, vector<1x16x16x128xbf16>
    %38 = vector.shape_cast %37 : vector<1x16x16x128xbf16> to vector<16x16x128xbf16>
    %39 = vector.shape_cast %36 : vector<16x16x128xbf16> to vector<1x16x16x128xbf16>
    tpu.vector_store %arg5[%c0_28, %c0_29, %c0_30, %c0_31], %39 {strides = array<i32>} : memref<1x16x16x128xbf16, #tpu.memory_space<vmem>>, vector<1x16x16x128xbf16>,
    %cst_32 = arith.constant dense<0.000000e+00> : vector<128xf32>
    %40 = vector.multi_reduction <add>, %34, %cst_32 [0] : vector<256x128xf32> to vector<128xf32>
    %41 = vector.shape_cast %40 : vector<128xf32> to vector<1x128xf32>
    %42 = arith.mulf %34, %34 : vector<256x128xf32>
    %cst_33 = arith.constant dense<0.000000e+00> : vector<128xf32>
    %43 = vector.multi_reduction <add>, %42, %cst_33 [0] : vector<256x128xf32> to vector<128xf32>
    %44 = vector.shape_cast %43 : vector<128xf32> to vector<1x128xf32>
    %45 = tpu.concatenate %41, %44 in 0 : vector<1x128xf32>, vector<1x128xf32> -> vector<2x128xf32>
    %c0_34 = arith.constant 0 : index
    %c0_35 = arith.constant 0 : index
    %c0_36 = arith.constant 0 : index
    %46 = vector.load %arg6[%c0_34, %c0_35, %c0_36] : memref<1x2x128xf32, #tpu.memory_space<vmem>>, vector<1x2x128xf32>
    %47 = vector.shape_cast %46 : vector<1x2x128xf32> to vector<2x128xf32>
    %48 = vector.shape_cast %45 : vector<2x128xf32> to vector<1x2x128xf32>
    tpu.vector_store %arg6[%c0_34, %c0_35, %c0_36], %48 {strides = array<i32>} : memref<1x2x128xf32, #tpu.memory_space<vmem>>, vector<1x2x128xf32>,
    return
  }
  func.func @transform_0(%arg0: i32) -> (i32, i32, i32, i32) {
    %c0_i32 = arith.constant 0 : i32
    %c0_i32_0 = arith.constant 0 : i32
    %c0_i32_1 = arith.constant 0 : i32
    %c0_i32_2 = arith.constant 0 : i32
    return %arg0, %c0_i32, %c0_i32_0, %c0_i32_1 : i32, i32, i32, i32
  }
  func.func @transform_1(%arg0: i32) -> (i32, i32) {
    %c0_i32 = arith.constant 0 : i32
    %c0_i32_0 = arith.constant 0 : i32
    %c0_i32_1 = arith.constant 0 : i32
    return %c0_i32, %c0_i32_0 : i32, i32
  }
  func.func @transform_2(%arg0: i32) -> (i32, i32) {
    %c0_i32 = arith.constant 0 : i32
    %c0_i32_0 = arith.constant 0 : i32
    %c0_i32_1 = arith.constant 0 : i32
    return %c0_i32, %c0_i32_0 : i32, i32
  }
  func.func @transform_3(%arg0: i32) -> (i32, i32) {
    %c0_i32 = arith.constant 0 : i32
    %c0_i32_0 = arith.constant 0 : i32
    %c0_i32_1 = arith.constant 0 : i32
    return %c0_i32, %c0_i32_0 : i32, i32
  }
  func.func @transform_4(%arg0: i32) -> (i32, i32, i32, i32) {
    %c0_i32 = arith.constant 0 : i32
    %c0_i32_0 = arith.constant 0 : i32
    %c0_i32_1 = arith.constant 0 : i32
    %c0_i32_2 = arith.constant 0 : i32
    return %arg0, %c0_i32, %c0_i32_0, %c0_i32_1 : i32, i32, i32, i32
  }
  func.func @transform_5(%arg0: i32) -> (i32, i32, i32) {
    %c0_i32 = arith.constant 0 : i32
    %c0_i32_0 = arith.constant 0 : i32
    %c0_i32_1 = arith.constant 0 : i32
    return %arg0, %c0_i32, %c0_i32_0 : i32, i32, i32
  }
}

module attributes {stable_mosaic.version = 11 : i64} {
  func.func @_bn_relu_conv1_kernel(%arg0: i32, %arg1: memref<256x128xbf16, #tpu.memory_space<vmem>>, %arg2: memref<1x128xf32, #tpu.memory_space<vmem>>, %arg3: memref<1x128xf32, #tpu.memory_space<vmem>>, %arg4: memref<128x128xbf16, #tpu.memory_space<vmem>>, %arg5: memref<256x128xbf16, #tpu.memory_space<vmem>>, %arg6: memref<1x2x128xf32, #tpu.memory_space<vmem>>) attributes {dimension_semantics = [#tpu.dimension_semantics<parallel>], iteration_bounds = array<i64: 2>, scalar_prefetch = 0 : i64, scratch_operands = 0 : i64, tpu.core_type = #tpu.core_type<tc>, window_params = [{transform_indices = @transform_0, window_bounds = array<i64: 256, 128>}, {pipeline_mode = #tpu.pipeline_mode<synchronous>, transform_indices = @transform_1, window_bounds = array<i64: 1, 128>}, {pipeline_mode = #tpu.pipeline_mode<synchronous>, transform_indices = @transform_2, window_bounds = array<i64: 1, 128>}, {pipeline_mode = #tpu.pipeline_mode<synchronous>, transform_indices = @transform_3, window_bounds = array<i64: 128, 128>}, {transform_indices = @transform_4, window_bounds = array<i64: 256, 128>}, {transform_indices = @transform_5, window_bounds = array<i64: 1, 2, 128>}]} {
    %c0 = arith.constant 0 : index
    %c0_0 = arith.constant 0 : index
    %0 = vector.load %arg1[%c0, %c0_0] : memref<256x128xbf16, #tpu.memory_space<vmem>>, vector<256x128xbf16>
    %1 = arith.extf %0 : vector<256x128xbf16> to vector<256x128xf32>
    %c0_1 = arith.constant 0 : index
    %c0_2 = arith.constant 0 : index
    %2 = vector.load %arg2[%c0_1, %c0_2] : memref<1x128xf32, #tpu.memory_space<vmem>>, vector<1x128xf32>
    %3 = vector.broadcast %2 : vector<1x128xf32> to vector<256x128xf32>
    %4 = arith.mulf %1, %3 : vector<256x128xf32>
    %c0_3 = arith.constant 0 : index
    %c0_4 = arith.constant 0 : index
    %5 = vector.load %arg3[%c0_3, %c0_4] : memref<1x128xf32, #tpu.memory_space<vmem>>, vector<1x128xf32>
    %6 = vector.broadcast %5 : vector<1x128xf32> to vector<256x128xf32>
    %7 = arith.addf %4, %6 : vector<256x128xf32>
    %cst = arith.constant 0.000000e+00 : f32
    %8 = vector.broadcast %cst : f32 to vector<256x128xf32>
    %9 = arith.maximumf %7, %8 : vector<256x128xf32>
    %10 = arith.truncf %9 : vector<256x128xf32> to vector<256x128xbf16>
    %c0_5 = arith.constant 0 : index
    %c0_6 = arith.constant 0 : index
    %11 = vector.load %arg4[%c0_5, %c0_6] : memref<128x128xbf16, #tpu.memory_space<vmem>>, vector<128x128xbf16>
    %cst_7 = arith.constant dense<0.000000e+00> : vector<256x128xf32>
    %12 = tpu.matmul %10, %11, %cst_7 {dimension_numbers = #tpu.dot_dimension_numbers<[1], [0], [0], [1], [0, 0, 1, 1], [], []>} : vector<256x128xbf16>, vector<128x128xbf16>, vector<256x128xf32> -> vector<256x128xf32>
    %13 = arith.truncf %12 : vector<256x128xf32> to vector<256x128xbf16>
    %c0_8 = arith.constant 0 : index
    %c0_9 = arith.constant 0 : index
    %14 = vector.load %arg5[%c0_8, %c0_9] : memref<256x128xbf16, #tpu.memory_space<vmem>>, vector<256x128xbf16>
    tpu.vector_store %arg5[%c0_8, %c0_9], %13 {strides = array<i32>} : memref<256x128xbf16, #tpu.memory_space<vmem>>, vector<256x128xbf16>,
    %cst_10 = arith.constant dense<0.000000e+00> : vector<128xf32>
    %15 = vector.multi_reduction <add>, %12, %cst_10 [0] : vector<256x128xf32> to vector<128xf32>
    %16 = vector.shape_cast %15 : vector<128xf32> to vector<1x128xf32>
    %17 = arith.mulf %12, %12 : vector<256x128xf32>
    %cst_11 = arith.constant dense<0.000000e+00> : vector<128xf32>
    %18 = vector.multi_reduction <add>, %17, %cst_11 [0] : vector<256x128xf32> to vector<128xf32>
    %19 = vector.shape_cast %18 : vector<128xf32> to vector<1x128xf32>
    %20 = tpu.concatenate %16, %19 in 0 : vector<1x128xf32>, vector<1x128xf32> -> vector<2x128xf32>
    %c0_12 = arith.constant 0 : index
    %c0_13 = arith.constant 0 : index
    %c0_14 = arith.constant 0 : index
    %21 = vector.load %arg6[%c0_12, %c0_13, %c0_14] : memref<1x2x128xf32, #tpu.memory_space<vmem>>, vector<1x2x128xf32>
    %22 = vector.shape_cast %21 : vector<1x2x128xf32> to vector<2x128xf32>
    %23 = vector.shape_cast %20 : vector<2x128xf32> to vector<1x2x128xf32>
    tpu.vector_store %arg6[%c0_12, %c0_13, %c0_14], %23 {strides = array<i32>} : memref<1x2x128xf32, #tpu.memory_space<vmem>>, vector<1x2x128xf32>,
    return
  }
  func.func @transform_0(%arg0: i32) -> (i32, i32) {
    %c0_i32 = arith.constant 0 : i32
    %c0_i32_0 = arith.constant 0 : i32
    return %arg0, %c0_i32 : i32, i32
  }
  func.func @transform_1(%arg0: i32) -> (i32, i32) {
    %c0_i32 = arith.constant 0 : i32
    %c0_i32_0 = arith.constant 0 : i32
    %c0_i32_1 = arith.constant 0 : i32
    return %c0_i32, %c0_i32_0 : i32, i32
  }
  func.func @transform_2(%arg0: i32) -> (i32, i32) {
    %c0_i32 = arith.constant 0 : i32
    %c0_i32_0 = arith.constant 0 : i32
    %c0_i32_1 = arith.constant 0 : i32
    return %c0_i32, %c0_i32_0 : i32, i32
  }
  func.func @transform_3(%arg0: i32) -> (i32, i32) {
    %c0_i32 = arith.constant 0 : i32
    %c0_i32_0 = arith.constant 0 : i32
    %c0_i32_1 = arith.constant 0 : i32
    return %c0_i32, %c0_i32_0 : i32, i32
  }
  func.func @transform_4(%arg0: i32) -> (i32, i32) {
    %c0_i32 = arith.constant 0 : i32
    %c0_i32_0 = arith.constant 0 : i32
    return %arg0, %c0_i32 : i32, i32
  }
  func.func @transform_5(%arg0: i32) -> (i32, i32, i32) {
    %c0_i32 = arith.constant 0 : i32
    %c0_i32_0 = arith.constant 0 : i32
    %c0_i32_1 = arith.constant 0 : i32
    return %arg0, %c0_i32, %c0_i32_0 : i32, i32, i32
  }
}

module attributes {stable_mosaic.version = 11 : i64} {
  func.func @_bn_add_relu_kernel(%arg0: i32, %arg1: memref<256x128xbf16, #tpu.memory_space<vmem>>, %arg2: memref<1x128xf32, #tpu.memory_space<vmem>>, %arg3: memref<1x128xf32, #tpu.memory_space<vmem>>, %arg4: memref<256x128xf32, #tpu.memory_space<vmem>>, %arg5: memref<256x128xf32, #tpu.memory_space<vmem>>) attributes {dimension_semantics = [#tpu.dimension_semantics<parallel>], iteration_bounds = array<i64: 2>, scalar_prefetch = 0 : i64, scratch_operands = 0 : i64, tpu.core_type = #tpu.core_type<tc>, window_params = [{transform_indices = @transform_0, window_bounds = array<i64: 256, 128>}, {pipeline_mode = #tpu.pipeline_mode<synchronous>, transform_indices = @transform_1, window_bounds = array<i64: 1, 128>}, {pipeline_mode = #tpu.pipeline_mode<synchronous>, transform_indices = @transform_2, window_bounds = array<i64: 1, 128>}, {transform_indices = @transform_3, window_bounds = array<i64: 256, 128>}, {transform_indices = @transform_4, window_bounds = array<i64: 256, 128>}]} {
    %c0 = arith.constant 0 : index
    %c0_0 = arith.constant 0 : index
    %0 = vector.load %arg1[%c0, %c0_0] : memref<256x128xbf16, #tpu.memory_space<vmem>>, vector<256x128xbf16>
    %1 = arith.extf %0 : vector<256x128xbf16> to vector<256x128xf32>
    %c0_1 = arith.constant 0 : index
    %c0_2 = arith.constant 0 : index
    %2 = vector.load %arg2[%c0_1, %c0_2] : memref<1x128xf32, #tpu.memory_space<vmem>>, vector<1x128xf32>
    %3 = vector.broadcast %2 : vector<1x128xf32> to vector<256x128xf32>
    %4 = arith.mulf %1, %3 : vector<256x128xf32>
    %c0_3 = arith.constant 0 : index
    %c0_4 = arith.constant 0 : index
    %5 = vector.load %arg3[%c0_3, %c0_4] : memref<1x128xf32, #tpu.memory_space<vmem>>, vector<1x128xf32>
    %6 = vector.broadcast %5 : vector<1x128xf32> to vector<256x128xf32>
    %7 = arith.addf %4, %6 : vector<256x128xf32>
    %c0_5 = arith.constant 0 : index
    %c0_6 = arith.constant 0 : index
    %8 = vector.load %arg4[%c0_5, %c0_6] : memref<256x128xf32, #tpu.memory_space<vmem>>, vector<256x128xf32>
    %9 = arith.addf %7, %8 : vector<256x128xf32>
    %cst = arith.constant 0.000000e+00 : f32
    %10 = vector.broadcast %cst : f32 to vector<256x128xf32>
    %11 = arith.maximumf %9, %10 : vector<256x128xf32>
    %c0_7 = arith.constant 0 : index
    %c0_8 = arith.constant 0 : index
    %12 = vector.load %arg5[%c0_7, %c0_8] : memref<256x128xf32, #tpu.memory_space<vmem>>, vector<256x128xf32>
    tpu.vector_store %arg5[%c0_7, %c0_8], %11 {strides = array<i32>} : memref<256x128xf32, #tpu.memory_space<vmem>>, vector<256x128xf32>,
    return
  }
  func.func @transform_0(%arg0: i32) -> (i32, i32) {
    %c0_i32 = arith.constant 0 : i32
    %c0_i32_0 = arith.constant 0 : i32
    return %arg0, %c0_i32 : i32, i32
  }
  func.func @transform_1(%arg0: i32) -> (i32, i32) {
    %c0_i32 = arith.constant 0 : i32
    %c0_i32_0 = arith.constant 0 : i32
    %c0_i32_1 = arith.constant 0 : i32
    return %c0_i32, %c0_i32_0 : i32, i32
  }
  func.func @transform_2(%arg0: i32) -> (i32, i32) {
    %c0_i32 = arith.constant 0 : i32
    %c0_i32_0 = arith.constant 0 : i32
    %c0_i32_1 = arith.constant 0 : i32
    return %c0_i32, %c0_i32_0 : i32, i32
  }
  func.func @transform_3(%arg0: i32) -> (i32, i32) {
    %c0_i32 = arith.constant 0 : i32
    %c0_i32_0 = arith.constant 0 : i32
    return %arg0, %c0_i32 : i32, i32
  }
  func.func @transform_4(%arg0: i32) -> (i32, i32) {
    %c0_i32 = arith.constant 0 : i32
    %c0_i32_0 = arith.constant 0 : i32
    return %arg0, %c0_i32 : i32, i32
  }
}

</mosaic_0001>

<bundles_post_ra>
// kernel: bottleneck_pallas.4
= control target key start
LH: loop header
LB: loop body
LE: loop exit
PB: predicated region body
PF: predicated region fallthrough
CT: control target
= control target key end

     0   :  { %s1126_s12 = smov 0   ;;  %s1315_s0 = inlined_call_operand.vmem [shape: f32[512,128], index: 0, kind: input, shape index: {}]   ;;  %s1316_s1 = inlined_call_operand.vmem [shape: bf16[128,128], index: 1, kind: input, shape index: {}]   ;;  %s1317_s2 = inlined_call_operand.vmem [shape: bf16[512,128], index: 2, kind: output, shape index: {0}]   ;;  %s1318_s3 = inlined_call_operand.vmem [shape: f32[2,2,128], index: 3, kind: output, shape index: {1}]  }
   0x1 LB: > { %s1132_s13 = sadd.s32 4294967295, %s1104_s12   ;;  %p819_p0 = scmp.ge.s32.totalorder %s1104_s12, 1  ;;  %s1104_s12 = sphi %s1126_s12, %s14_s12  }
   0x2   : > { %p141_p1 = scmp.lt.s32.totalorder %s1104_s12, 3 }
   0x4   : > { %p142_p2 = pnand %p819_p0, %p141_p1 }
   0x5   : > { %s820_s16 = sshll.u32 (!%p142_p2), %s1132_s13, 5  ;;  %p181_p4 = scmp.lt.s32.totalorder (!%p142_p2), %s1132_s13, 1 }
   0x6   : > { %145 = sbr.rel (%p142_p2) target bundleno = 321 (0x141), region = 28  ;;  %p170_p3 = scmp.lt.s32.totalorder (!%p142_p2), %s820_s16, 63 }
   0xb   : > { %v1090_v0 = vld [vmem:[%s1316_s1 + $0x38] sm:$0xff]   ;;  %v1091_v1 = vld [vmem:[%s1316_s1 + $0x30] sm:$0xff]   ;;  %s1320_s16 = smov (!%p170_p3, %s820_s16), 63  ;;  %v1092_v2 = vld [vmem:[%s1316_s1 + $0x28] sm:$0xff]   ;;  %s1322_s13 = smov (!%p181_p4, %s1132_s13), 1  ;;  %vm725_vm0 = vcmask 1040384  }
   0xc   : > { %1018 = vmatprep.subr.bf16.mxu0 %v1090_v0  ;;  %1066 = vmatprep.subr.bf16.mxu1 %v1090_v0  ;;  %s821_s21 = sshll.u32 %s1320_s16, 3  ;;  %v1093_v3 = vld [vmem:[%s1316_s1 + $0x20] sm:$0xff]   ;;  %v1094_v7 = vld [vmem:[%s1316_s1 + $0x18] sm:$0xff]   ;;  %v1095_v11 = vld [vmem:[%s1316_s1 + $0x10] sm:$0xff]   ;;  %s823_s8 = sshll.u32 %s1320_s16, 2 }
   0xd   : > { %1019 = vmatpush3.bf16.msra.mxu0 %v1090_v0  ;;  %1074 = vmatpush3.bf16.msra.mxu1 %v1090_v0  ;;  %s1152_s24 = scalar_lea.vmem %s1315_s0, %s821_s21  ;;  %v1096_v12 = vld [vmem:[%s1316_s1 + $0x8] sm:$0xff]   ;;  %v1097_v13 = vld [vmem:[%s1316_s1] sm:$0xff]   ;;  %s1209_s11 = scalar_lea.vmem %s1317_s2, %s823_s8 }
   0xe   : > { %1020 = vmatprep.subr.bf16.mxu0 %v1091_v1  ;;  %1067 = vmatprep.subr.bf16.mxu1 %v1091_v1  ;;  %v186_v4 = vld [vmem:[%s1152_s24] sm:$0xff]  ;;  %v187_v5 = vld [vmem:[%s1152_s24 + $0x8] sm:$0xff]  ;;  %v188_v14 = vld [vmem:[%s1152_s24 + $0x10] sm:$0xff]  ;;  %s824_s14 = sshll.u32 %s1322_s13, 1 }
   0xf   : > { %v218_v6 = vpack.c.bf16 %v187_v5, %v186_v4  ;;  %v202_v8 = vld [vmem:[%s1152_s24 + $0x80] sm:$0xff]  ;;  %v203_v9 = vld [vmem:[%s1152_s24 + $0x88] sm:$0xff]  ;;  %v189_v15 = vld [vmem:[%s1152_s24 + $0x18] sm:$0xff]  ;;  %s184_s17 = scalar_lea.vmem %s1318_s3, %s824_s14 }
  0x10   : > { %v226_v10 = vpack.c.bf16 %v203_v9, %v202_v8  ;;  %v190_v16 = vld [vmem:[%s1152_s24 + $0x20] sm:$0xff]  ;;  %v191_v17 = vld [vmem:[%s1152_s24 + $0x28] sm:$0xff]  ;;  %v204_v18 = vld [vmem:[%s1152_s24 + $0x90] sm:$0xff]  ;;  %v219_v22 = vpack.c.bf16 %v189_v15, %v188_v14 }
  0x11   : > { %1021 = vmatpush3.bf16.msra.mxu0 %v1091_v1  ;;  %1075 = vmatpush3.bf16.msra.mxu1 %v1091_v1  ;;  %v205_v19 = vld [vmem:[%s1152_s24 + $0x98] sm:$0xff]  ;;  %v206_v20 = vld [vmem:[%s1152_s24 + $0xa0] sm:$0xff]  ;;  %v207_v21 = vld [vmem:[%s1152_s24 + $0xa8] sm:$0xff]  ;;  %v220_v23 = vpack.c.bf16 %v191_v17, %v190_v16 }
  0x12   : > { %1022 = vmatprep.subr.bf16.mxu0 %v1092_v2  ;;  %1068 = vmatprep.subr.bf16.mxu1 %v1092_v2  ;;  %v227_v24 = vpack.c.bf16 %v205_v19, %v204_v18  ;;  %v228_v25 = vpack.c.bf16 %v207_v21, %v206_v20  ;;  %v192_v26 = vld [vmem:[%s1152_s24 + $0x30] sm:$0xff]  ;;  %v193_v27 = vld [vmem:[%s1152_s24 + $0x38] sm:$0xff]  ;;  %v194_v28 = vld [vmem:[%s1152_s24 + $0x40] sm:$0xff] }
  0x13   : > { %1034 = vmatprep.mubr.bf16.mxu0 %v218_v6  ;;  %1050 = vmatprep.mubr.bf16.mxu1 %v226_v10  ;;  %v195_v29 = vld [vmem:[%s1152_s24 + $0x48] sm:$0xff]  ;;  %v208_v30 = vld [vmem:[%s1152_s24 + $0xb0] sm:$0xff]  ;;  %v209_v31 = vld [vmem:[%s1152_s24 + $0xb8] sm:$0xff]  ;;  %v221_v34 = vpack.c.bf16 %v193_v27, %v192_v26 }
  0x14   : > { %v210_v32 = vld [vmem:[%s1152_s24 + $0xc0] sm:$0xff]  ;;  %v211_v33 = vld [vmem:[%s1152_s24 + $0xc8] sm:$0xff]  ;;  %v222_v35 = vpack.c.bf16 %v195_v29, %v194_v28  ;;  %v229_v36 = vpack.c.bf16 %v209_v31, %v208_v30  ;;  %v196_v38 = vld [vmem:[%s1152_s24 + $0x50] sm:$0xff] }
  0x15   : > { %1023 = vmatpush3.bf16.msra.mxu0 %v1092_v2  ;;  %1076 = vmatpush3.bf16.msra.mxu1 %v1092_v2  ;;  %v230_v37 = vpack.c.bf16 %v211_v33, %v210_v32  ;;  %v197_v39 = vld [vmem:[%s1152_s24 + $0x58] sm:$0xff]  ;;  %v198_v40 = vld [vmem:[%s1152_s24 + $0x60] sm:$0xff]  ;;  %v199_v41 = vld [vmem:[%s1152_s24 + $0x68] sm:$0xff] }
  0x16   : > { %1024 = vmatprep.subr.bf16.mxu0 %v1093_v3  ;;  %1069 = vmatprep.subr.bf16.mxu1 %v1093_v3  ;;  %v212_v42 = vld [vmem:[%s1152_s24 + $0xd0] sm:$0xff]  ;;  %v213_v43 = vld [vmem:[%s1152_s24 + $0xd8] sm:$0xff]  ;;  %v214_v44 = vld [vmem:[%s1152_s24 + $0xe0] sm:$0xff]  ;;  %v223_v46 = vpack.c.bf16 %v197_v39, %v196_v38  ;;  %v224_v47 = vpack.c.bf16 %v199_v41, %v198_v40 }
  0x17   : > { %v215_v45 = vld [vmem:[%s1152_s24 + $0xe8] sm:$0xff]  ;;  %v231_v48 = vpack.c.bf16 %v213_v43, %v212_v42  ;;  %v200_v50 = vld [vmem:[%s1152_s24 + $0x70] sm:$0xff]  ;;  %v201_v51 = vld [vmem:[%s1152_s24 + $0x78] sm:$0xff] }
  0x18   : > { %v232_v49 = vpack.c.bf16 %v215_v45, %v214_v44  ;;  %v216_v52 = vld [vmem:[%s1152_s24 + $0xf0] sm:$0xff]  ;;  %v217_v53 = vld [vmem:[%s1152_s24 + $0xf8] sm:$0xff]  ;;  %v225_v54 = vpack.c.bf16 %v201_v51, %v200_v50 }
  0x19   : > { %1025 = vmatpush3.bf16.msra.mxu0 %v1093_v3  ;;  %1077 = vmatpush3.bf16.msra.mxu1 %v1093_v3  ;;  %v233_v55 = vpack.c.bf16 %v217_v53, %v216_v52 }
  0x1a   : > { %1026 = vmatprep.subr.bf16.mxu0 %v1094_v7  ;;  %1070 = vmatprep.subr.bf16.mxu1 %v1094_v7 }
  0x1d   : > { %1027 = vmatpush3.bf16.msra.mxu0 %v1094_v7  ;;  %1078 = vmatpush3.bf16.msra.mxu1 %v1094_v7 }
  0x1e   : > { %1028 = vmatprep.subr.bf16.mxu0 %v1095_v11  ;;  %1071 = vmatprep.subr.bf16.mxu1 %v1095_v11 }
  0x21   : > { %1029 = vmatpush3.bf16.msra.mxu0 %v1095_v11  ;;  %1079 = vmatpush3.bf16.msra.mxu1 %v1095_v11 }
  0x22   : > { %1030 = vmatprep.subr.bf16.mxu0 %v1096_v12  ;;  %1072 = vmatprep.subr.bf16.mxu1 %v1096_v12 }
  0x25   : > { %1031 = vmatpush3.bf16.msra.mxu0 %v1096_v12  ;;  %1080 = vmatpush3.bf16.msra.mxu1 %v1096_v12 }
  0x26   : > { %1032 = vmatprep.subr.bf16.mxu0 %v1097_v13  ;;  %1073 = vmatprep.subr.bf16.mxu1 %v1097_v13 }
  0x29   : > { %1033 = vmatpush3.bf16.msra.mxu0 %v1097_v13  ;;  %1081 = vmatpush3.bf16.msra.mxu1 %v1097_v13 }
  0x2c   : > { %1035 = vmatmul.mubr.bf16.vlgmr.msra.gmra.mxu0 %v219_v22  ;;  %1051 = vmatmul.mubr.bf16.vlgmr.msra.gmra.mxu1 %v227_v24 }
  0x2d   : > { %1038 = vmatprep.mubr.bf16.mxu0 %v220_v23  ;;  %1054 = vmatprep.mubr.bf16.mxu1 %v228_v25 }
  0x34   : > { %1039 = vmatmul.mubr.bf16.gmra.mxu0 %v221_v34  ;;  %1055 = vmatmul.mubr.bf16.gmra.mxu1 %v229_v36 }
  0x35   : > { %1042 = vmatprep.mubr.bf16.mxu0 %v222_v35  ;;  %1058 = vmatprep.mubr.bf16.mxu1 %v230_v37 }
  0x3c   : > { %1043 = vmatmul.mubr.bf16.gmra.mxu0 %v223_v46  ;;  %1059 = vmatmul.mubr.bf16.gmra.mxu1 %v231_v48 }
  0x3d   : > { %1046 = vmatprep.mubr.bf16.mxu0 %v224_v47  ;;  %1062 = vmatprep.mubr.bf16.mxu1 %v232_v49 }
  0x44   : > { %1047 = vmatmul.mubr.bf16.gmra.mxu0 %v225_v54  ;;  %1063 = vmatmul.mubr.bf16.gmra.mxu1 %v233_v55 }
  0xec   : > { %v1036_v56 = vpop.f32.mrf.mxu0  ;;  %v1202_v57 = vpop.f32.mrf.mxu1 }
  0xed   : > { %v658_v8 = vmul.f32 %v1036_v56, %v1036_v56 }
  0xee   : > { %v332_v58 = vpop.f32.mrf.mxu0  ;;  %v1204_v59 = vpop.f32.mrf.mxu1 }
  0xef   : > { %v656_v1 = vmul.f32 %v332_v58, %v332_v58 }
  0xf0   : > { %v1037_v60 = vpop.f32.mrf.mxu0  ;;  %v1211_v62 = vpop.f32.mrf.mxu1 }
  0xf1   : > { %v907_v61 = vpack.c.bf16 %v1037_v60, %v1036_v56  ;;  %v947_v0 = vpack.c.bf16 %v1211_v62, %v1202_v57  ;;  %v659_v13 = vmul.f32 %v1037_v60, %v1037_v60 }
  0xf2   : > { %v335_v63 = vpop.f32.mrf.mxu0  ;;  %v1216_v5 = vpop.f32.mrf.mxu1 }
  0xf3   : > { %979 = vst [vmem:[%s1209_s11 + $0x8] sm:$0xff] %v907_v61   ;;  %v902_v2 = vpack.c.bf16 %v335_v63, %v332_v58  ;;  %v619_v3 = vadd.f32 %v335_v63, %v332_v58  ;;  %v657_v4 = vmul.f32 %v335_v63, %v335_v63  ;;  %987 = vst [vmem:[%s1209_s11 + $0x48] sm:$0xff] %v947_v0  }
  0xf4   : > { %v1040_v6 = vpop.f32.mrf.mxu0  ;;  %v942_v7 = vpack.c.bf16 %v1216_v5, %v1204_v59  ;;  %v1222_v11 = vpop.f32.mrf.mxu1 }
  0xf5   : > { %903 = vst [vmem:[%s1209_s11] sm:$0xff] %v902_v2   ;;  %v620_v9 = vadd.f32 %v1036_v56, %v619_v3  ;;  %v688_v10 = vadd.f32 %v657_v4, %v656_v1  ;;  %v662_v32 = vmul.f32 %v1040_v6, %v1040_v6 }
  0xf6   : > { %v348_v12 = vpop.f32.mrf.mxu0  ;;  %986 = vst [vmem:[%s1209_s11 + $0x40] sm:$0xff] %v942_v7   ;;  %v1225_v16 = vpop.f32.mrf.mxu1 }
  0xf7   : > { %v689_v14 = vadd.f32 %v688_v10, %v658_v8  ;;  %v621_v15 = vadd.f32 %v1037_v60, %v620_v9  ;;  %v660_v19 = vmul.f32 %v348_v12, %v348_v12 }
  0xf8   : > { %v1041_v17 = vpop.f32.mrf.mxu0  ;;  %v1227_v22 = vpop.f32.mrf.mxu1 }
  0xf9   : > { %v622_v18 = vadd.f32 %v621_v15, %v348_v12  ;;  %v690_v20 = vadd.f32 %v689_v14, %v659_v13  ;;  %v917_v21 = vpack.c.bf16 %v1041_v17, %v1040_v6  ;;  %v957_v24 = vpack.c.bf16 %v1227_v22, %v1222_v11 }
  0xfa   : > { %v351_v23 = vpop.f32.mrf.mxu0  ;;  %v1232_v29 = vpop.f32.mrf.mxu1  ;;  %v663_v37 = vmul.f32 %v1041_v17, %v1041_v17 }
  0xfb   : > { %v691_v25 = vadd.f32 %v690_v20, %v660_v19  ;;  %981 = vst [vmem:[%s1209_s11 + $0x18] sm:$0xff] %v917_v21   ;;  %v912_v26 = vpack.c.bf16 %v351_v23, %v348_v12  ;;  %v623_v27 = vadd.f32 %v622_v18, %v351_v23  ;;  %v661_v28 = vmul.f32 %v351_v23, %v351_v23 }
  0xfc   : > { %v1044_v30 = vpop.f32.mrf.mxu0  ;;  %989 = vst [vmem:[%s1209_s11 + $0x58] sm:$0xff] %v957_v24   ;;  %v952_v31 = vpack.c.bf16 %v1232_v29, %v1225_v16  ;;  %v1238_v35 = vpop.f32.mrf.mxu1 }
  0xfd   : > { %980 = vst [vmem:[%s1209_s11 + $0x10] sm:$0xff] %v912_v26   ;;  %v624_v33 = vadd.f32 %v1040_v6, %v623_v27  ;;  %v692_v34 = vadd.f32 %v691_v25, %v661_v28  ;;  %v666_v56 = vmul.f32 %v1044_v30, %v1044_v30  ;;  %v672_v28 = vmul.f32 %v1204_v59, %v1204_v59 }
  0xfe   : > { %v364_v36 = vpop.f32.mrf.mxu0  ;;  %988 = vst [vmem:[%s1209_s11 + $0x50] sm:$0xff] %v952_v31   ;;  %v1241_v40 = vpop.f32.mrf.mxu1 }
  0xff   : > { %v693_v38 = vadd.f32 %v692_v34, %v662_v32  ;;  %v625_v39 = vadd.f32 %v1041_v17, %v624_v33  ;;  %v664_v43 = vmul.f32 %v364_v36, %v364_v36  ;;  %v673_v33 = vmul.f32 %v1216_v5, %v1216_v5 }
 0x100   : > { %v1045_v41 = vpop.f32.mrf.mxu0  ;;  %v1243_v46 = vpop.f32.mrf.mxu1 }
 0x101   : > { %v626_v42 = vadd.f32 %v625_v39, %v364_v36  ;;  %v694_v44 = vadd.f32 %v693_v38, %v663_v37  ;;  %v927_v45 = vpack.c.bf16 %v1045_v41, %v1044_v30  ;;  %v967_v48 = vpack.c.bf16 %v1243_v46, %v1238_v35 }
 0x102   : > { %v367_v47 = vpop.f32.mrf.mxu0  ;;  %v1248_v53 = vpop.f32.mrf.mxu1  ;;  %v667_v0 = vmul.f32 %v1045_v41, %v1045_v41  ;;  %v675_v39 = vmul.f32 %v1211_v62, %v1211_v62 }
 0x103   : > { %v695_v49 = vadd.f32 %v694_v44, %v664_v43  ;;  %983 = vst [vmem:[%s1209_s11 + $0x28] sm:$0xff] %v927_v45   ;;  %v922_v50 = vpack.c.bf16 %v367_v47, %v364_v36  ;;  %v627_v51 = vadd.f32 %v626_v42, %v367_v47  ;;  %v665_v52 = vmul.f32 %v367_v47, %v367_v47 }
 0x104   : > { %v1048_v54 = vpop.f32.mrf.mxu0  ;;  %991 = vst [vmem:[%s1209_s11 + $0x68] sm:$0xff] %v967_v48   ;;  %v962_v55 = vpack.c.bf16 %v1248_v53, %v1241_v40  ;;  %v1254_v61 = vpop.f32.mrf.mxu1  ;;  %v674_v36 = vmul.f32 %v1202_v57, %v1202_v57  ;;  %v676_v43 = vmul.f32 %v1225_v16, %v1225_v16  ;;  %v677_v47 = vmul.f32 %v1232_v29, %v1232_v29 }
 0x105   : > { %982 = vst [vmem:[%s1209_s11 + $0x20] sm:$0xff] %v922_v50   ;;  %v628_v58 = vadd.f32 %v1044_v30, %v627_v51  ;;  %v696_v60 = vadd.f32 %v695_v49, %v665_v52  ;;  %v670_v21 = vmul.f32 %v1048_v54, %v1048_v54  ;;  %v680_v52 = vmul.f32 %v1241_v40, %v1241_v40 }
 0x106   : > { %v380_v63 = vpop.f32.mrf.mxu0  ;;  %990 = vst [vmem:[%s1209_s11 + $0x60] sm:$0xff] %v962_v55   ;;  %v444_v3 = vpop.f32.mrf.mxu1 }
 0x107   : > { %v697_v1 = vadd.f32 %v696_v60, %v666_v56  ;;  %v629_v2 = vadd.f32 %v1045_v41, %v628_v58  ;;  %v668_v7 = vmul.f32 %v380_v63, %v380_v63  ;;  %v681_v56 = vmul.f32 %v1248_v53, %v1248_v53 }
 0x108   : > { %v1049_v4 = vpop.f32.mrf.mxu0  ;;  %v1257_v10 = vpop.f32.mrf.mxu1 }
 0x109   : > { %v630_v6 = vadd.f32 %v629_v2, %v380_v63  ;;  %v698_v8 = vadd.f32 %v697_v1, %v667_v0  ;;  %v937_v9 = vpack.c.bf16 %v1049_v4, %v1048_v54  ;;  %v977_v13 = vpack.c.bf16 %v1257_v10, %v1254_v61 }
 0x10a   : > { %v383_v12 = vpop.f32.mrf.mxu0  ;;  %v447_v19 = vpop.f32.mrf.mxu1  ;;  %v671_v25 = vmul.f32 %v1049_v4, %v1049_v4  ;;  %v684_v1 = vmul.f32 %v444_v3, %v444_v3 }
 0x10b   : > { %v699_v14 = vadd.f32 %v698_v8, %v668_v7  ;;  %985 = vst [vmem:[%s1209_s11 + $0x38] sm:$0xff] %v937_v9   ;;  %v932_v15 = vpack.c.bf16 %v383_v12, %v380_v63  ;;  %v631_v17 = vadd.f32 %v630_v6, %v383_v12  ;;  %v669_v18 = vmul.f32 %v383_v12, %v383_v12 }
 0x10c   : > { %993 = vst [vmem:[%s1209_s11 + $0x78] sm:$0xff] %v977_v13   ;;  %v972_v20 = vpack.c.bf16 %v447_v19, %v444_v3  ;;  %v686_v7 = vmul.f32 %v1254_v61, %v1254_v61  ;;  %v687_v9 = vmul.f32 %v1257_v10, %v1257_v10 }
 0x10d   : > { %984 = vst [vmem:[%s1209_s11 + $0x30] sm:$0xff] %v932_v15   ;;  %v632_v23 = vadd.f32 %v1048_v54, %v631_v17  ;;  %v700_v24 = vadd.f32 %v699_v14, %v669_v18 }
 0x10e   : > { %992 = vst [vmem:[%s1209_s11 + $0x70] sm:$0xff] %v972_v20  }
 0x10f   : > { %v633_v26 = vadd.f32 %v1049_v4, %v632_v23  ;;  %v701_v27 = vadd.f32 %v700_v24, %v670_v21 }
 0x111   : > { %v702_v30 = vadd.f32 %v701_v27, %v671_v25  ;;  %v634_v31 = vadd.f32 %v633_v26, %v1204_v59 }
 0x113   : > { %v635_v32 = vadd.f32 %v634_v31, %v1216_v5  ;;  %v703_v34 = vadd.f32 %v702_v30, %v672_v28 }
 0x115   : > { %v636_v37 = vadd.f32 %v1202_v57, %v635_v32  ;;  %v704_v38 = vadd.f32 %v703_v34, %v673_v33  ;;  %v678_v57 = vmul.f32 %v1222_v11, %v1222_v11 }
 0x117   : > { %v705_v41 = vadd.f32 %v704_v38, %v674_v36  ;;  %v637_v42 = vadd.f32 %v1211_v62, %v636_v37  ;;  %v679_v62 = vmul.f32 %v1227_v22, %v1227_v22 }
 0x119   : > { %v638_v59 = vadd.f32 %v637_v42, %v1225_v16  ;;  %v706_v44 = vadd.f32 %v705_v41, %v675_v39 }
 0x11b   : > { %v707_v5 = vadd.f32 %v706_v44, %v676_v43  ;;  %v639_v45 = vadd.f32 %v638_v59, %v1232_v29 }
 0x11d   : > { %v640_v48 = vadd.f32 %v1222_v11, %v639_v45  ;;  %v708_v49 = vadd.f32 %v707_v5, %v677_v47  ;;  %v682_v11 = vmul.f32 %v1238_v35, %v1238_v35 }
 0x11f   : > { %v709_v50 = vadd.f32 %v708_v49, %v678_v57  ;;  %v641_v51 = vadd.f32 %v1227_v22, %v640_v48  ;;  %v683_v22 = vmul.f32 %v1243_v46, %v1243_v46 }
 0x121   : > { %v642_v16 = vadd.f32 %v641_v51, %v1241_v40  ;;  %v710_v54 = vadd.f32 %v709_v50, %v679_v62 }
 0x123   : > { %v711_v55 = vadd.f32 %v710_v54, %v680_v52  ;;  %v643_v29 = vadd.f32 %v642_v16, %v1248_v53  ;;  %v685_v53 = vmul.f32 %v447_v19, %v447_v19 }
 0x125   : > { %v644_v58 = vadd.f32 %v1238_v35, %v643_v29  ;;  %v712_v60 = vadd.f32 %v711_v55, %v681_v56 }
 0x127   : > { %v713_v63 = vadd.f32 %v712_v60, %v682_v11  ;;  %v645_v40 = vadd.f32 %v1243_v46, %v644_v58 }
 0x129   : > { %v646_v0 = vadd.f32 %v645_v40, %v444_v3  ;;  %v714_v2 = vadd.f32 %v713_v63, %v683_v22 }
 0x12b   : > { %v715_v4 = vadd.f32 %v714_v2, %v684_v1  ;;  %v647_v6 = vadd.f32 %v646_v0, %v447_v19 }
 0x12d   : > { %v648_v35 = vadd.f32 %v1254_v61, %v647_v6  ;;  %v716_v8 = vadd.f32 %v715_v4, %v685_v53 }
 0x12f   : > { %v649_v12 = vadd.f32 %v1257_v10, %v648_v35  ;;  %v717_v13 = vadd.f32 %v716_v8, %v686_v7 }
 0x131   : > { %v650_v46 = vrot.slane %v649_v12, 4  ;;  %v718_v14 = vadd.f32 %v717_v13, %v687_v9 }
 0x133   : > { %v651_v3 = vadd.f32 %v650_v46, %v649_v12  ;;  %v719_v15 = vrot.slane %v718_v14, 4 }
 0x135   : > { %v652_v17 = vrot.slane %v651_v3, 2  ;;  %v720_v18 = vadd.f32 %v719_v15, %v718_v14 }
 0x137   : > { %v653_v19 = vadd.f32 %v652_v17, %v651_v3  ;;  %v721_v20 = vrot.slane %v720_v18, 2 }
 0x139   : > { %v654_v21 = vrot.slane %v653_v19, 1  ;;  %v722_v23 = vadd.f32 %v721_v20, %v720_v18 }
 0x13b   : > { %v723_v61 = vrot.slane %v722_v23, 1  ;;  %v655_v10 = vadd.f32 %v654_v21, %v653_v19 }
 0x13d   : > { %v724_v24 = vadd.f32 %v723_v61, %v722_v23 }
 0x13f   : > { %v726_v25 = vsel %vm725_vm0, %v655_v10, %v724_v24 }
 0x140   : > { %727 = vst [vmem:[%s184_s17] sm:$0x3] %v726_v25 }
 0x141 PF: > { %s14_s12 = sadd.s32 1, %s1104_s12  }
 0x142   : > { %p11_p5 = scmp.ge.s32.totalorder %s14_s12, 4  }
 0x144   :  { %13 = sbr.rel (!%p11_p5) target bundleno = 1 (0x1), region = 70 }

// kernel: bottleneck_pallas.6
= control target key start
LH: loop header
LB: loop body
LE: loop exit
PB: predicated region body
PF: predicated region fallthrough
CT: control target
= control target key end

     0   :  { %s1413_s18 = smov 0   ;;  %s1687_s0 = inlined_call_operand.vmem [shape: bf16[512,128], index: 0, kind: input, shape index: {}]   ;;  %s1688_s1 = inlined_call_operand.vmem [shape: f32[1,128], index: 1, kind: input, shape index: {}]   ;;  %s1689_s2 = inlined_call_operand.vmem [shape: f32[1,128], index: 2, kind: input, shape index: {}]   ;;  %s1690_s3 = inlined_call_operand.vmem [shape: bf16[128,128], index: 3, kind: input, shape index: {}]   ;;  %s1691_s4 = inlined_call_operand.vmem [shape: bf16[512,128], index: 4, kind: output, shape index: {0}]   ;;  %s1692_s5 = inlined_call_operand.vmem [shape: f32[2,2,128], index: 5, kind: output, shape index: {1}]  }
   0x1 LB: > { %s1419_s19 = sadd.s32 4294967295, %s1381_s18   ;;  %p1015_p0 = scmp.ge.s32.totalorder %s1381_s18, 1  ;;  %s1381_s18 = sphi %s1413_s18, %s16_s18  }
   0x2   : > { %p191_p1 = scmp.lt.s32.totalorder %s1381_s18, 3 }
   0x4   : > { %p192_p2 = pnand %p1015_p0, %p191_p1 }
   0x5   : > { %s1016_s22 = sshll.u32 (!%p192_p2), %s1419_s19, 5  ;;  %p235_p4 = scmp.lt.s32.totalorder (!%p192_p2), %s1419_s19, 1 }
   0x6   : > { %195 = sbr.rel (%p192_p2) target bundleno = 321 (0x141), region = 36  ;;  %p224_p3 = scmp.lt.s32.totalorder (!%p192_p2), %s1016_s22, 63 }
   0xb   : > { %v1367_v0 = vld [vmem:[%s1690_s3 + $0x38] sm:$0xff]   ;;  %v1368_v1 = vld [vmem:[%s1690_s3 + $0x30] sm:$0xff]   ;;  %s1694_s22 = smov (!%p224_p3, %s1016_s22), 63  ;;  %v1369_v2 = vld [vmem:[%s1690_s3 + $0x28] sm:$0xff]   ;;  %s1696_s19 = smov (!%p235_p4, %s1419_s19), 1  ;;  %vm921_vm0 = vcmask 1040384  }
   0xc   : > { %1295 = vmatprep.subr.bf16.mxu0 %v1367_v0  ;;  %1343 = vmatprep.subr.bf16.mxu1 %v1367_v0  ;;  %s1017_s27 = sshll.u32 %s1694_s22, 2  ;;  %v1370_v3 = vld [vmem:[%s1690_s3 + $0x20] sm:$0xff]   ;;  %v1371_v21 = vld [vmem:[%s1690_s3 + $0x18] sm:$0xff]   ;;  %v1372_v35 = vld [vmem:[%s1690_s3 + $0x10] sm:$0xff]   ;;  %s1020_s22 = sshll.u32 %s1696_s19, 1 }
   0xd   : > { %1296 = vmatpush3.bf16.msra.mxu0 %v1367_v0  ;;  %1351 = vmatpush3.bf16.msra.mxu1 %v1367_v0  ;;  %s1441_s30 = scalar_lea.vmem %s1687_s0, %s1017_s27  ;;  %v1450_v5 = vld [vmem:[%s1688_s1] ss:$0 sm:$0xff]  ;;  %v1373_v50 = vld [vmem:[%s1690_s3 + $0x8] sm:$0xff]   ;;  %s1591_s25 = scalar_lea.vmem %s1691_s4, %s1017_s27 }
   0xe   : > { %1297 = vmatprep.subr.bf16.mxu0 %v1368_v1  ;;  %1344 = vmatprep.subr.bf16.mxu1 %v1368_v1  ;;  %v1098_v4 = vld [vmem:[%s1441_s30] sm:$0xff]   ;;  %v1241_v8 = vld [vmem:[%s1441_s30 + $0x8] sm:$0xff]   ;;  %v1242_v9 = vld [vmem:[%s1441_s30 + $0x10] sm:$0xff]   ;;  %s238_s28 = scalar_lea.vmem %s1692_s5, %s1020_s22 }
   0xf   : > { %v1099_v6 = vunpack.c.l.bf16 %v1098_v4  ;;  %v1100_v7 = vunpack.c.h.bf16 %v1098_v4  ;;  %v1243_v10 = vld [vmem:[%s1441_s30 + $0x18] sm:$0xff]   ;;  %v1458_v11 = vld [vmem:[%s1689_s2] ss:$0 sm:$0xff]  ;;  %v1103_v12 = vunpack.c.l.bf16 %v1241_v8  ;;  %v1104_v13 = vunpack.c.h.bf16 %v1241_v8  ;;  %v1245_v34 = vld [vmem:[%s1441_s30 + $0x28] sm:$0xff]  }
  0x10   : > { %v1107_v14 = vunpack.c.l.bf16 %v1242_v9  ;;  %v1108_v15 = vunpack.c.h.bf16 %v1242_v9  ;;  %v1111_v18 = vunpack.c.l.bf16 %v1243_v10  ;;  %v1112_v19 = vunpack.c.h.bf16 %v1243_v10  ;;  %v1244_v20 = vld [vmem:[%s1441_s30 + $0x20] sm:$0xff]   ;;  %v1246_v39 = vld [vmem:[%s1441_s30 + $0x30] sm:$0xff]   ;;  %v1495_v59 = vld [vmem:[%s1441_s30 + $0x38] sm:$0xff]  }
  0x11   : > { %1298 = vmatpush3.bf16.msra.mxu0 %v1368_v1  ;;  %1352 = vmatpush3.bf16.msra.mxu1 %v1368_v1  ;;  %v311_v16 = vmul.f32 %v1099_v6, %v1450_v5  ;;  %v312_v17 = vmul.f32 %v1100_v7, %v1450_v5  ;;  %v313_v22 = vmul.f32 %v1103_v12, %v1450_v5  ;;  %v1115_v30 = vunpack.c.l.bf16 %v1244_v20  ;;  %v1248_v60 = vld [vmem:[%s1441_s30 + $0x40] sm:$0xff]   ;;  %v1249_v6 = vld [vmem:[%s1441_s30 + $0x48] sm:$0xff]  }
  0x12   : > { %1299 = vmatprep.subr.bf16.mxu0 %v1369_v2  ;;  %1345 = vmatprep.subr.bf16.mxu1 %v1369_v2  ;;  %v314_v23 = vmul.f32 %v1104_v13, %v1450_v5  ;;  %v315_v24 = vmul.f32 %v1107_v14, %v1450_v5  ;;  %v316_v27 = vmul.f32 %v1108_v15, %v1450_v5  ;;  %v1116_v43 = vunpack.c.h.bf16 %v1244_v20  ;;  %v1374_v0 = vld [vmem:[%s1690_s3] sm:$0xff]  }
  0x13   : > { %v350_v25 = vadd.f32 %v1458_v11, %v311_v16  ;;  %v351_v26 = vadd.f32 %v1458_v11, %v312_v17  ;;  %v317_v28 = vmul.f32 %v1111_v18, %v1450_v5  ;;  %v318_v29 = vmul.f32 %v1112_v19, %v1450_v5  ;;  %v1250_v16 = vld [vmem:[%s1441_s30 + $0x50] sm:$0xff]  }
  0x14   : > { %v352_v33 = vadd.f32 %v1458_v11, %v313_v22  ;;  %v353_v36 = vadd.f32 %v1458_v11, %v314_v23  ;;  %v354_v37 = vadd.f32 %v1458_v11, %v315_v24  ;;  %v355_v38 = vadd.f32 %v1458_v11, %v316_v27 }
  0x15   : > { %1300 = vmatpush3.bf16.msra.mxu0 %v1369_v2  ;;  %1353 = vmatpush3.bf16.msra.mxu1 %v1369_v2  ;;  %v382_v31 = vmax.f32 %v350_v25, 0.0  ;;  %v383_v32 = vmax.f32 %v351_v26, 0.0  ;;  %v356_v41 = vadd.f32 %v1458_v11, %v317_v28  ;;  %v357_v42 = vadd.f32 %v1458_v11, %v318_v29 }
  0x16   : > { %1301 = vmatprep.subr.bf16.mxu0 %v1370_v3  ;;  %1346 = vmatprep.subr.bf16.mxu1 %v1370_v3  ;;  %v319_v44 = vmul.f32 %v1115_v30, %v1450_v5  ;;  %v1119_v45 = vunpack.c.l.bf16 %v1245_v34  ;;  %v384_v46 = vmax.f32 %v352_v33, 0.0  ;;  %v320_v47 = vmul.f32 %v1116_v43, %v1450_v5  ;;  %v1252_v30 = vld [vmem:[%s1441_s30 + $0x60] sm:$0xff]  }
  0x17   : > { %v414_v40 = vpack.c.bf16 %v383_v32, %v382_v31  ;;  %v1120_v48 = vunpack.c.h.bf16 %v1245_v34  ;;  %v1123_v49 = vunpack.c.l.bf16 %v1246_v39  ;;  %v385_v51 = vmax.f32 %v353_v36, 0.0 }
  0x18   : > { %v386_v52 = vmax.f32 %v354_v37, 0.0  ;;  %v387_v53 = vmax.f32 %v355_v38, 0.0  ;;  %v321_v54 = vmul.f32 %v1119_v45, %v1450_v5  ;;  %v388_v55 = vmax.f32 %v356_v41, 0.0 }
  0x19   : > { %1302 = vmatpush3.bf16.msra.mxu0 %v1370_v3  ;;  %1354 = vmatpush3.bf16.msra.mxu1 %v1370_v3  ;;  %v389_v56 = vmax.f32 %v357_v42, 0.0  ;;  %v1492_v57 = vadd.f32 %v1458_v11, %v319_v44  ;;  %v1124_v58 = vunpack.c.h.bf16 %v1246_v39  ;;  %v1499_v61 = vadd.f32 %v1458_v11, %v320_v47  ;;  %v1253_v47 = vld [vmem:[%s1441_s30 + $0x68] sm:$0xff]  }
  0x1a   : > { %1303 = vmatprep.subr.bf16.mxu0 %v1371_v21  ;;  %1347 = vmatprep.subr.bf16.mxu1 %v1371_v21  ;;  %v322_v62 = vmul.f32 %v1120_v48, %v1450_v5  ;;  %v323_v63 = vmul.f32 %v1123_v49, %v1450_v5  ;;  %v415_v1 = vpack.c.bf16 %v385_v51, %v384_v46  ;;  %v1127_v3 = vunpack.c.l.bf16 %v1495_v59 }
  0x1b   : > { %1311 = vmatprep.mubr.bf16.mxu0 %v414_v40  ;;  %v1507_v2 = vadd.f32 %v1458_v11, %v321_v54  ;;  %v1131_v4 = vunpack.c.l.bf16 %v1248_v60  ;;  %v416_v7 = vpack.c.bf16 %v387_v53, %v386_v52  ;;  %v1511_v8 = vpack.c.bf16 %v389_v56, %v388_v55  ;;  %v1254_v52 = vld [vmem:[%s1441_s30 + $0x70] sm:$0xff]  }
  0x1c   : > { %v390_v9 = vmax.f32 %v1492_v57, 0.0  ;;  %v324_v10 = vmul.f32 %v1124_v58, %v1450_v5  ;;  %v391_v12 = vmax.f32 %v1499_v61, 0.0  ;;  %v1128_v13 = vunpack.c.h.bf16 %v1495_v59 }
  0x1d   : > { %1304 = vmatpush3.bf16.msra.mxu0 %v1371_v21  ;;  %1355 = vmatpush3.bf16.msra.mxu1 %v1371_v21  ;;  %v1132_v14 = vunpack.c.h.bf16 %v1248_v60  ;;  %v327_v15 = vmul.f32 %v1131_v4, %v1450_v5  ;;  %v1520_v17 = vadd.f32 %v1458_v11, %v322_v62  ;;  %v1523_v18 = vadd.f32 %v1458_v11, %v323_v63  ;;  %v1251_v21 = vld [vmem:[%s1441_s30 + $0x58] sm:$0xff]  }
  0x1e   : > { %1305 = vmatprep.subr.bf16.mxu0 %v1372_v35  ;;  %1348 = vmatprep.subr.bf16.mxu1 %v1372_v35  ;;  %v1135_v19 = vunpack.c.l.bf16 %v1249_v6  ;;  %v1136_v20 = vunpack.c.h.bf16 %v1249_v6  ;;  %v392_v22 = vmax.f32 %v1507_v2, 0.0  ;;  %v1528_v23 = vmul.f32 %v1127_v3, %v1450_v5  ;;  %v1255_v6 = vld [vmem:[%s1441_s30 + $0x78] sm:$0xff]  }
  0x1f   : > { %v328_v24 = vmul.f32 %v1132_v14, %v1450_v5  ;;  %v366_v25 = vadd.f32 %v1458_v11, %v327_v15  ;;  %v1139_v28 = vunpack.c.l.bf16 %v1250_v16  ;;  %v1140_v29 = vunpack.c.h.bf16 %v1250_v16 }
  0x20   : > { %v329_v26 = vmul.f32 %v1135_v19, %v1450_v5  ;;  %v330_v27 = vmul.f32 %v1136_v20, %v1450_v5  ;;  %v1536_v31 = vadd.f32 %v1458_v11, %v324_v10  ;;  %v1143_v34 = vunpack.c.l.bf16 %v1251_v21 }
  0x21   : > { %1306 = vmatpush3.bf16.msra.mxu0 %v1372_v35  ;;  %1356 = vmatpush3.bf16.msra.mxu1 %v1372_v35  ;;  %v367_v32 = vadd.f32 %v1458_v11, %v328_v24  ;;  %v398_v33 = vmax.f32 %v366_v25, 0.0  ;;  %v331_v37 = vmul.f32 %v1139_v28, %v1450_v5  ;;  %v332_v38 = vmul.f32 %v1140_v29, %v1450_v5 }
  0x22   : > { %1307 = vmatprep.subr.bf16.mxu0 %v1373_v50  ;;  %1349 = vmatprep.subr.bf16.mxu1 %v1373_v50  ;;  %v368_v35 = vadd.f32 %v1458_v11, %v329_v26  ;;  %v369_v36 = vadd.f32 %v1458_v11, %v330_v27  ;;  %v1144_v40 = vunpack.c.h.bf16 %v1251_v21  ;;  %v333_v41 = vmul.f32 %v1143_v34, %v1450_v5 }
  0x23   : > { %v399_v39 = vmax.f32 %v367_v32, 0.0  ;;  %v1147_v42 = vunpack.c.l.bf16 %v1252_v30  ;;  %v370_v45 = vadd.f32 %v1458_v11, %v331_v37  ;;  %v371_v46 = vadd.f32 %v1458_v11, %v332_v38 }
  0x24   : > { %v400_v43 = vmax.f32 %v368_v35, 0.0  ;;  %v401_v44 = vmax.f32 %v369_v36, 0.0  ;;  %v334_v49 = vmul.f32 %v1144_v40, %v1450_v5  ;;  %v1148_v51 = vunpack.c.h.bf16 %v1252_v30 }
  0x25   : > { %1308 = vmatpush3.bf16.msra.mxu0 %v1373_v50  ;;  %1357 = vmatpush3.bf16.msra.mxu1 %v1373_v50  ;;  %v422_v48 = vpack.c.bf16 %v399_v39, %v398_v33  ;;  %v372_v50 = vadd.f32 %v1458_v11, %v333_v41  ;;  %v402_v54 = vmax.f32 %v370_v45, 0.0  ;;  %v403_v55 = vmax.f32 %v371_v46, 0.0 }
  0x26   : > { %1309 = vmatprep.subr.bf16.mxu0 %v1374_v0  ;;  %1350 = vmatprep.subr.bf16.mxu1 %v1374_v0  ;;  %v423_v53 = vpack.c.bf16 %v401_v44, %v400_v43  ;;  %v335_v56 = vmul.f32 %v1147_v42, %v1450_v5  ;;  %v373_v58 = vadd.f32 %v1458_v11, %v334_v49  ;;  %v1151_v63 = vunpack.c.l.bf16 %v1253_v47 }
  0x27   : > { %1327 = vmatprep.mubr.bf16.mxu1 %v422_v48  ;;  %v404_v60 = vmax.f32 %v372_v50, 0.0  ;;  %v336_v62 = vmul.f32 %v1148_v51, %v1450_v5  ;;  %v1152_v3 = vunpack.c.h.bf16 %v1253_v47  ;;  %v1155_v4 = vunpack.c.l.bf16 %v1254_v52 }
  0x28   : > { %v337_v14 = vmul.f32 %v1151_v63, %v1450_v5  ;;  %v1156_v15 = vunpack.c.h.bf16 %v1254_v52  ;;  %v418_v16 = vpack.c.bf16 %v391_v12, %v390_v9  ;;  %v326_v24 = vmul.f32 %v1128_v13, %v1450_v5 }
  0x29   : > { %1310 = vmatpush3.bf16.msra.mxu0 %v1374_v0  ;;  %1358 = vmatpush3.bf16.msra.mxu1 %v1374_v0  ;;  %v424_v0 = vpack.c.bf16 %v403_v55, %v402_v54  ;;  %v375_v10 = vadd.f32 %v1458_v11, %v336_v62  ;;  %v338_v20 = vmul.f32 %v1152_v3, %v1450_v5  ;;  %v1159_v27 = vunpack.c.l.bf16 %v1255_v6 }
  0x2a   : > { %v339_v21 = vmul.f32 %v1155_v4, %v1450_v5  ;;  %v340_v26 = vmul.f32 %v1156_v15, %v1450_v5  ;;  %v376_v57 = vadd.f32 %v1458_v11, %v337_v14  ;;  %v1160_v9 = vunpack.c.h.bf16 %v1255_v6 }
  0x2b   : > { %v407_v25 = vmax.f32 %v375_v10, 0.0  ;;  %v377_v61 = vadd.f32 %v1458_v11, %v338_v20  ;;  %v393_v12 = vmax.f32 %v1520_v17, 0.0  ;;  %v394_v13 = vmax.f32 %v1523_v18, 0.0 }
  0x2c   : > { %1312 = vmatmul.mubr.bf16.vlgmr.msra.gmra.mxu0 %v415_v1  ;;  %1328 = vmatmul.mubr.bf16.vlgmr.msra.gmra.mxu1 %v423_v53  ;;  %v374_v1 = vadd.f32 %v1458_v11, %v335_v56  ;;  %v378_v30 = vadd.f32 %v1458_v11, %v339_v21  ;;  %v379_v59 = vadd.f32 %v1458_v11, %v340_v26  ;;  %v395_v32 = vmax.f32 %v1536_v31, 0.0 }
  0x2d   : > { %1315 = vmatprep.mubr.bf16.mxu0 %v416_v7  ;;  %v405_v7 = vmax.f32 %v373_v58, 0.0  ;;  %1331 = vmatprep.mubr.bf16.mxu1 %v424_v0  ;;  %v364_v33 = vadd.f32 %v1458_v11, %v1528_v23  ;;  %v408_v34 = vmax.f32 %v376_v57, 0.0  ;;  %v409_v35 = vmax.f32 %v377_v61, 0.0 }
  0x2e   : > { %v406_v19 = vmax.f32 %v374_v1, 0.0  ;;  %v342_v17 = vmul.f32 %v1160_v9, %v1450_v5  ;;  %v419_v36 = vpack.c.bf16 %v393_v12, %v392_v22  ;;  %v365_v37 = vadd.f32 %v1458_v11, %v326_v24 }
  0x2f   : > { %v425_v28 = vpack.c.bf16 %v405_v7, %v404_v60  ;;  %v410_v38 = vmax.f32 %v378_v30, 0.0  ;;  %v411_v18 = vmax.f32 %v379_v59, 0.0  ;;  %v420_v39 = vpack.c.bf16 %v395_v32, %v394_v13 }
  0x30   : > { %v426_v29 = vpack.c.bf16 %v407_v25, %v406_v19  ;;  %v427_v31 = vpack.c.bf16 %v409_v35, %v408_v34  ;;  %v381_v23 = vadd.f32 %v1458_v11, %v342_v17  ;;  %v396_v41 = vmax.f32 %v364_v33, 0.0 }
  0x31   : > { %v397_v42 = vmax.f32 %v365_v37, 0.0  ;;  %v428_v43 = vpack.c.bf16 %v411_v18, %v410_v38 }
  0x32   : > { %v413_v2 = vmax.f32 %v381_v23, 0.0 }
  0x33   : > { %v421_v22 = vpack.c.bf16 %v397_v42, %v396_v41 }
  0x34   : > { %1316 = vmatmul.mubr.bf16.gmra.mxu0 %v1511_v8  ;;  %1332 = vmatmul.mubr.bf16.gmra.mxu1 %v425_v28  ;;  %v341_v8 = vmul.f32 %v1159_v27, %v1450_v5 }
  0x35   : > { %1319 = vmatprep.mubr.bf16.mxu0 %v418_v16  ;;  %1335 = vmatprep.mubr.bf16.mxu1 %v426_v29 }
  0x36   : > { %v380_v40 = vadd.f32 %v1458_v11, %v341_v8 }
  0x38   : > { %v412_v5 = vmax.f32 %v380_v40, 0.0 }
  0x3a   : > { %v429_v44 = vpack.c.bf16 %v413_v2, %v412_v5 }
  0x3c   : > { %1320 = vmatmul.mubr.bf16.gmra.mxu0 %v419_v36  ;;  %1336 = vmatmul.mubr.bf16.gmra.mxu1 %v427_v31 }
  0x3d   : > { %1323 = vmatprep.mubr.bf16.mxu0 %v420_v39  ;;  %1339 = vmatprep.mubr.bf16.mxu1 %v428_v43 }
  0x44   : > { %1324 = vmatmul.mubr.bf16.gmra.mxu0 %v421_v22  ;;  %1340 = vmatmul.mubr.bf16.gmra.mxu1 %v429_v44 }
  0xec   : > { %v1313_v45 = vpop.f32.mrf.mxu0  ;;  %v1584_v47 = vpop.f32.mrf.mxu1 }
  0xed   : > { %v854_v60 = vmul.f32 %v1313_v45, %v1313_v45 }
  0xee   : > { %v528_v46 = vpop.f32.mrf.mxu0  ;;  %v1593_v49 = vpop.f32.mrf.mxu1 }
  0xef   : > { %v852_v51 = vmul.f32 %v528_v46, %v528_v46 }
  0xf0   : > { %v1314_v11 = vpop.f32.mrf.mxu0  ;;  %v1596_v55 = vpop.f32.mrf.mxu1 }
  0xf1   : > { %v1169_v48 = vpack.c.bf16 %v1314_v11, %v1313_v45  ;;  %v1209_v58 = vpack.c.bf16 %v1596_v55, %v1584_v47  ;;  %v855_v4 = vmul.f32 %v1314_v11, %v1314_v11 }
  0xf2   : > { %v531_v50 = vpop.f32.mrf.mxu0  ;;  %v1601_v0 = vpop.f32.mrf.mxu1 }
  0xf3   : > { %1256 = vst [vmem:[%s1591_s25 + $0x8] sm:$0xff] %v1169_v48   ;;  %v1164_v52 = vpack.c.bf16 %v531_v50, %v528_v46  ;;  %v815_v53 = vadd.f32 %v531_v50, %v528_v46  ;;  %v853_v54 = vmul.f32 %v531_v50, %v531_v50  ;;  %1264 = vst [vmem:[%s1591_s25 + $0x48] sm:$0xff] %v1209_v58  }
  0xf4   : > { %v1317_v56 = vpop.f32.mrf.mxu0  ;;  %v1204_v3 = vpack.c.bf16 %v1601_v0, %v1593_v49  ;;  %v1606_v10 = vpop.f32.mrf.mxu1 }
  0xf5   : > { %1165 = vst [vmem:[%s1591_s25] sm:$0xff] %v1164_v52   ;;  %v816_v62 = vadd.f32 %v1313_v45, %v815_v53  ;;  %v884_v63 = vadd.f32 %v853_v54, %v852_v51  ;;  %v858_v12 = vmul.f32 %v1317_v56, %v1317_v56 }
  0xf6   : > { %v544_v1 = vpop.f32.mrf.mxu0  ;;  %1263 = vst [vmem:[%s1591_s25 + $0x40] sm:$0xff] %v1204_v3   ;;  %v1609_v21 = vpop.f32.mrf.mxu1 }
  0xf7   : > { %v885_v6 = vadd.f32 %v884_v63, %v854_v60  ;;  %v817_v7 = vadd.f32 %v1314_v11, %v816_v62  ;;  %v856_v16 = vmul.f32 %v544_v1, %v544_v1 }
  0xf8   : > { %v1318_v14 = vpop.f32.mrf.mxu0  ;;  %v1612_v57 = vpop.f32.mrf.mxu1 }
  0xf9   : > { %v818_v15 = vadd.f32 %v817_v7, %v544_v1  ;;  %v886_v19 = vadd.f32 %v885_v6, %v855_v4  ;;  %v1179_v20 = vpack.c.bf16 %v1318_v14, %v1317_v56  ;;  %v1219_v9 = vpack.c.bf16 %v1612_v57, %v1606_v10 }
  0xfa   : > { %v547_v24 = vpop.f32.mrf.mxu0  ;;  %v1617_v59 = vpop.f32.mrf.mxu1  ;;  %v859_v33 = vmul.f32 %v1318_v14, %v1318_v14 }
  0xfb   : > { %v887_v25 = vadd.f32 %v886_v19, %v856_v16  ;;  %1258 = vst [vmem:[%s1591_s25 + $0x18] sm:$0xff] %v1179_v20   ;;  %v1174_v26 = vpack.c.bf16 %v547_v24, %v544_v1  ;;  %v819_v27 = vadd.f32 %v818_v15, %v547_v24  ;;  %v857_v28 = vmul.f32 %v547_v24, %v547_v24 }
  0xfc   : > { %v1321_v61 = vpop.f32.mrf.mxu0  ;;  %1266 = vst [vmem:[%s1591_s25 + $0x58] sm:$0xff] %v1219_v9   ;;  %v1214_v32 = vpack.c.bf16 %v1617_v59, %v1609_v21  ;;  %v1622_v8 = vpop.f32.mrf.mxu1 }
  0xfd   : > { %1257 = vst [vmem:[%s1591_s25 + $0x10] sm:$0xff] %v1174_v26   ;;  %v820_v29 = vadd.f32 %v1317_v56, %v819_v27  ;;  %v888_v30 = vadd.f32 %v887_v25, %v857_v28  ;;  %v862_v22 = vmul.f32 %v1321_v61, %v1321_v61 }
  0xfe   : > { %v560_v13 = vpop.f32.mrf.mxu0  ;;  %1265 = vst [vmem:[%s1591_s25 + $0x50] sm:$0xff] %v1214_v32   ;;  %v1625_v39 = vpop.f32.mrf.mxu1  ;;  %v870_v32 = vmul.f32 %v1584_v47, %v1584_v47 }
  0xff   : > { %v889_v34 = vadd.f32 %v888_v30, %v858_v12  ;;  %v821_v35 = vadd.f32 %v1318_v14, %v820_v29  ;;  %v860_v37 = vmul.f32 %v560_v13, %v560_v13  ;;  %v869_v30 = vmul.f32 %v1601_v0, %v1601_v0 }
 0x100   : > { %v1322_v17 = vpop.f32.mrf.mxu0  ;;  %v1628_v43 = vpop.f32.mrf.mxu1 }
 0x101   : > { %v822_v36 = vadd.f32 %v821_v35, %v560_v13  ;;  %v890_v38 = vadd.f32 %v889_v34, %v859_v33  ;;  %v1189_v18 = vpack.c.bf16 %v1322_v17, %v1321_v61  ;;  %v1229_v2 = vpack.c.bf16 %v1628_v43, %v1622_v8 }
 0x102   : > { %v563_v31 = vpop.f32.mrf.mxu0  ;;  %v627_v46 = vpop.f32.mrf.mxu1  ;;  %v863_v50 = vmul.f32 %v1322_v17, %v1322_v17  ;;  %v871_v35 = vmul.f32 %v1596_v55, %v1596_v55 }
 0x103   : > { %v891_v40 = vadd.f32 %v890_v38, %v860_v37  ;;  %1260 = vst [vmem:[%s1591_s25 + $0x28] sm:$0xff] %v1189_v18   ;;  %v1184_v23 = vpack.c.bf16 %v563_v31, %v560_v13  ;;  %v823_v41 = vadd.f32 %v822_v36, %v563_v31  ;;  %v861_v42 = vmul.f32 %v563_v31, %v563_v31 }
 0x104   : > { %v1325_v5 = vpop.f32.mrf.mxu0  ;;  %1268 = vst [vmem:[%s1591_s25 + $0x68] sm:$0xff] %v1229_v2   ;;  %v1224_v48 = vpack.c.bf16 %v627_v46, %v1625_v39  ;;  %v1635_v53 = vpop.f32.mrf.mxu1  ;;  %v872_v37 = vmul.f32 %v1609_v21, %v1609_v21  ;;  %v873_v31 = vmul.f32 %v1617_v59, %v1617_v59 }
 0x105   : > { %1259 = vst [vmem:[%s1591_s25 + $0x20] sm:$0xff] %v1184_v23   ;;  %v824_v44 = vadd.f32 %v1321_v61, %v823_v41  ;;  %v892_v45 = vadd.f32 %v891_v40, %v861_v42  ;;  %v866_v16 = vmul.f32 %v1325_v5, %v1325_v5  ;;  %v868_v61 = vmul.f32 %v1593_v49, %v1593_v49 }
 0x106   : > { %v576_v11 = vpop.f32.mrf.mxu0  ;;  %1267 = vst [vmem:[%s1591_s25 + $0x60] sm:$0xff] %v1224_v48   ;;  %v640_v63 = vpop.f32.mrf.mxu1  ;;  %v879_v48 = vmul.f32 %v1628_v43, %v1628_v43 }
 0x107   : > { %v893_v51 = vadd.f32 %v892_v45, %v862_v22  ;;  %v825_v52 = vadd.f32 %v1322_v17, %v824_v44  ;;  %v864_v58 = vmul.f32 %v576_v11, %v576_v11  ;;  %v877_v44 = vmul.f32 %v627_v46, %v627_v46 }
 0x108   : > { %v1326_v54 = vpop.f32.mrf.mxu0  ;;  %v1342_v14 = vpop.f32.mrf.mxu1  ;;  %v878_v45 = vmul.f32 %v1622_v8, %v1622_v8 }
 0x109   : > { %v826_v56 = vadd.f32 %v825_v52, %v576_v11  ;;  %v894_v60 = vadd.f32 %v893_v51, %v863_v50  ;;  %v1199_v62 = vpack.c.bf16 %v1326_v54, %v1325_v5  ;;  %v1239_v15 = vpack.c.bf16 %v1342_v14, %v1635_v53 }
 0x10a   : > { %v579_v1 = vpop.f32.mrf.mxu0  ;;  %v643_v24 = vpop.f32.mrf.mxu1  ;;  %v867_v26 = vmul.f32 %v1326_v54, %v1326_v54  ;;  %v880_v52 = vmul.f32 %v640_v63, %v640_v63 }
 0x10b   : > { %v895_v3 = vadd.f32 %v894_v60, %v864_v58  ;;  %1262 = vst [vmem:[%s1591_s25 + $0x38] sm:$0xff] %v1199_v62   ;;  %v1194_v4 = vpack.c.bf16 %v579_v1, %v576_v11  ;;  %v827_v6 = vadd.f32 %v826_v56, %v579_v1  ;;  %v865_v7 = vmul.f32 %v579_v1, %v579_v1 }
 0x10c   : > { %1270 = vst [vmem:[%s1591_s25 + $0x78] sm:$0xff] %v1239_v15   ;;  %v1234_v25 = vpack.c.bf16 %v643_v24, %v640_v63  ;;  %v882_v58 = vmul.f32 %v1635_v53, %v1635_v53  ;;  %v883_v62 = vmul.f32 %v1342_v14, %v1342_v14 }
 0x10d   : > { %1261 = vst [vmem:[%s1591_s25 + $0x30] sm:$0xff] %v1194_v4   ;;  %v828_v19 = vadd.f32 %v1325_v5, %v827_v6  ;;  %v896_v20 = vadd.f32 %v895_v3, %v865_v7  ;;  %v876_v5 = vmul.f32 %v1625_v39, %v1625_v39 }
 0x10e   : > { %1269 = vst [vmem:[%s1591_s25 + $0x70] sm:$0xff] %v1234_v25  }
 0x10f   : > { %v829_v27 = vadd.f32 %v1326_v54, %v828_v19  ;;  %v897_v28 = vadd.f32 %v896_v20, %v866_v16 }
 0x111   : > { %v898_v9 = vadd.f32 %v897_v28, %v867_v26  ;;  %v830_v12 = vadd.f32 %v829_v27, %v1593_v49 }
 0x113   : > { %v831_v29 = vadd.f32 %v830_v12, %v1601_v0  ;;  %v899_v13 = vadd.f32 %v898_v9, %v868_v61 }
 0x115   : > { %v832_v33 = vadd.f32 %v1584_v47, %v831_v29  ;;  %v900_v34 = vadd.f32 %v899_v13, %v869_v30  ;;  %v874_v47 = vmul.f32 %v1606_v10, %v1606_v10 }
 0x117   : > { %v901_v17 = vadd.f32 %v900_v34, %v870_v32  ;;  %v833_v36 = vadd.f32 %v1596_v55, %v832_v33  ;;  %v875_v55 = vmul.f32 %v1612_v57, %v1612_v57 }
 0x119   : > { %v834_v49 = vadd.f32 %v833_v36, %v1609_v21  ;;  %v902_v38 = vadd.f32 %v901_v17, %v871_v35 }
 0x11b   : > { %v903_v0 = vadd.f32 %v902_v38, %v872_v37  ;;  %v835_v18 = vadd.f32 %v834_v49, %v1617_v59 }
 0x11d   : > { %v836_v40 = vadd.f32 %v1606_v10, %v835_v18  ;;  %v904_v23 = vadd.f32 %v903_v0, %v873_v31 }
 0x11f   : > { %v905_v41 = vadd.f32 %v904_v23, %v874_v47  ;;  %v837_v42 = vadd.f32 %v1612_v57, %v836_v40 }
 0x121   : > { %v838_v21 = vadd.f32 %v837_v42, %v1625_v39  ;;  %v906_v2 = vadd.f32 %v905_v41, %v875_v55 }
 0x123   : > { %v907_v22 = vadd.f32 %v906_v2, %v876_v5  ;;  %v839_v59 = vadd.f32 %v838_v21, %v627_v46  ;;  %v881_v46 = vmul.f32 %v643_v24, %v643_v24 }
 0x125   : > { %v840_v10 = vadd.f32 %v1622_v8, %v839_v59  ;;  %v908_v11 = vadd.f32 %v907_v22, %v877_v44 }
 0x127   : > { %v909_v50 = vadd.f32 %v908_v11, %v878_v45  ;;  %v841_v57 = vadd.f32 %v1628_v43, %v840_v10 }
 0x129   : > { %v842_v51 = vadd.f32 %v841_v57, %v640_v63  ;;  %v910_v39 = vadd.f32 %v909_v50, %v879_v48 }
 0x12b   : > { %v911_v54 = vadd.f32 %v910_v39, %v880_v52  ;;  %v843_v56 = vadd.f32 %v842_v51, %v643_v24 }
 0x12d   : > { %v844_v8 = vadd.f32 %v1635_v53, %v843_v56  ;;  %v912_v60 = vadd.f32 %v911_v54, %v881_v46 }
 0x12f   : > { %v845_v1 = vadd.f32 %v1342_v14, %v844_v8  ;;  %v913_v3 = vadd.f32 %v912_v60, %v882_v58 }
 0x131   : > { %v846_v4 = vrot.slane %v845_v1, 4  ;;  %v914_v6 = vadd.f32 %v913_v3, %v883_v62 }
 0x133   : > { %v847_v43 = vadd.f32 %v846_v4, %v845_v1  ;;  %v915_v7 = vrot.slane %v914_v6, 4 }
 0x135   : > { %v848_v63 = vrot.slane %v847_v43, 2  ;;  %v916_v15 = vadd.f32 %v915_v7, %v914_v6 }
 0x137   : > { %v849_v16 = vadd.f32 %v848_v63, %v847_v43  ;;  %v917_v19 = vrot.slane %v916_v15, 2 }
 0x139   : > { %v850_v20 = vrot.slane %v849_v16, 1  ;;  %v918_v24 = vadd.f32 %v917_v19, %v916_v15 }
 0x13b   : > { %v919_v25 = vrot.slane %v918_v24, 1  ;;  %v851_v53 = vadd.f32 %v850_v20, %v849_v16 }
 0x13d   : > { %v920_v14 = vadd.f32 %v919_v25, %v918_v24 }
 0x13f   : > { %v922_v26 = vsel %vm921_vm0, %v851_v53, %v920_v14 }
 0x140   : > { %923 = vst [vmem:[%s238_s28] sm:$0x3] %v922_v26 }
 0x141 PF: > { %s16_s18 = sadd.s32 1, %s1381_s18  }
 0x142   : > { %p13_p5 = scmp.ge.s32.totalorder %s16_s18, 4  }
 0x144   :  { %15 = sbr.rel (!%p13_p5) target bundleno = 1 (0x1), region = 78 }

// kernel: bottleneck_pallas.7
= control target key start
LH: loop header
LB: loop body
LE: loop exit
PB: predicated region body
PF: predicated region fallthrough
CT: control target
= control target key end

     0   :  { %9 = vsyncpa [#allocation3], 0  ;;  %s1078_s0 = inlined_call_operand.vmem [shape: bf16[512,128], index: 0, kind: input, shape index: {}]   ;;  %s1079_s1 = inlined_call_operand.vmem [shape: f32[1,128], index: 1, kind: input, shape index: {}]   ;;  %s1080_s2 = inlined_call_operand.vmem [shape: f32[1,128], index: 2, kind: input, shape index: {}]   ;;  %s1081_s3 = inlined_call_operand.vmem [shape: f32[512,128], index: 3, kind: input, shape index: {}]   ;;  %s1082_s4 = inlined_call_operand.hbm [shape: f32[512,128], index: 4, kind: output, shape index: {}]  }
   0x1   :  { %11 = vsyncpa [#allocation3 + $0x1], 0  ;;  %s806_s15 = smov 0   ;;  %s808_s16 = smov 0  }
   0x2   :  { %s810_s17 = smov 0   ;;  %s812_s18 = smov 0  }
   0x3 LB: > { %s827_s19 = sadd.s32 4294967295, %s776_s18   ;;  %s579_s20 = sadd.s32 4294967294, %s776_s18   ;;  %s776_s18 = sphi %s812_s18, %s1088_s18   ;;  %s772_s17 = sphi %s810_s17, %s1087_s17   ;;  %s768_s16 = sphi %s808_s16, %s1086_s16   ;;  %s764_s15 = sphi %s806_s15, %s1085_s15  }
   0x4   : > { %s831_s21 = sadd.s32 1, %s776_s18   ;;  %s118_s22 = sadd.s32 1, %s772_s17 }
   0x5   : > { %s115_s23 = ssub.s32 %s776_s18, %s831_s21  ;;  %p128_p0 = scmp.ne.s32.totalorder %s772_s17, %s768_s16 }
   0x6   : > { %p116_p1 = scmp.eq.s32.totalorder %s115_s23, 0  ;;  %p129_p2 = scmp.eq.s32.totalorder %s827_s19, 1 }
   0x7   : > { %p134_p3 = scmp.ne.s32.totalorder %s768_s16, %s764_s15  ;;  %p135_p4 = scmp.eq.s32.totalorder %s579_s20, 1 }
   0x8   : > { %s842_s24 = scalar_select %p116_p1, %s772_s17, %s118_s22  }
   0x9   : > { %p844_p5 = por %p129_p2, %p128_p0  ;;  %p848_p6 = por %p135_p4, %p134_p3 }
   0xa   : > { %p582_p7 = scmp.ge.s32.totalorder %s776_s18, 1  ;;  %p177_p8 = scmp.lt.s32.totalorder %s776_s18, 3 }
   0xc   : > { %p178_p9 = pnand %p582_p7, %p177_p8 }
   0xd   : > { %s584_s27 = sshll.u32 (!%p178_p9), %s827_s19, 5  ;;  %s205_s12 = sand.u32 (!%p178_p9), 1, %s768_s16  }
   0xe   : > { %181 = sbr.rel (%p178_p9) target bundleno = 79 (0x4f), region = 36  ;;  %p209_p10 = scmp.lt.s32.totalorder (!%p178_p9), %s584_s27, 63 }
   0xf   : > { %s888_s20 = sshll.u32 (!%p178_p9), %s205_s12, 8  ;;  %s595_s23 = sshll.u32 (!%p178_p9), %s827_s19, 12 }
  0x10   : > { %s912_s22 = scalar_lea.vmem (!%p178_p9), [#allocation2], %s888_s20  ;;  %s1038_s30 = scalar_lea.sflag (!%p178_p9), [#allocation3], %s205_s12 }
  0x13   : > { %s1090_s27 = smov (!%p209_p10, %s584_s27), 63  ;;  %v864_v1 = vld [vmem:[%s1079_s1] ss:$0 sm:$0xff] }
  0x14   : > { %s585_s28 = sshll.u32 %s1090_s27, 2  ;;  %s587_s29 = sshll.u32 %s1090_s27, 3  ;;  %v876_v5 = vld [vmem:[%s1080_s2] ss:$0 sm:$0xff] }
  0x15   : > { %s858_s6 = scalar_lea.vmem %s1078_s0, %s585_s28  ;;  %s869_s11 = scalar_lea.vmem %s1081_s3, %s587_s29 }
  0x16   : > { %v597_v0 = vld [vmem:[%s858_s6] sm:$0xff]   ;;  %v660_v4 = vld [vmem:[%s858_s6 + $0x8] sm:$0xff]   ;;  %v661_v8 = vld [vmem:[%s858_s6 + $0x10] sm:$0xff]   ;;  %s505_s27 = sshll.u32 %s912_s22, 4  ;;  %s1026_s29 = scalar_lea.hbm %s1082_s4, %s595_s23  ;;  %s1028_s27 = int_to_ptr.vmem [resolvable:$true] %s505_s27 }
  0x17   : > { %v598_v2 = vunpack.c.l.bf16 %v597_v0  ;;  %v599_v3 = vunpack.c.h.bf16 %v597_v0  ;;  %v602_v6 = vunpack.c.l.bf16 %v660_v4  ;;  %v603_v7 = vunpack.c.h.bf16 %v660_v4  ;;  %v662_v13 = vld [vmem:[%s858_s6 + $0x18] sm:$0xff]   ;;  %v363_v14 = vld [vmem:[%s869_s11] sm:$0xff]  ;;  %v364_v15 = vld [vmem:[%s869_s11 + $0x8] sm:$0xff]  ;;  %s716_s5 = scalar_lea.vmem %s1028_s27, 4096 }
  0x18   : > { %v606_v11 = vunpack.c.l.bf16 %v661_v8  ;;  %v607_v12 = vunpack.c.h.bf16 %v661_v8  ;;  %v610_v18 = vunpack.c.l.bf16 %v662_v13  ;;  %v611_v19 = vunpack.c.h.bf16 %v662_v13  ;;  %v365_v22 = vld [vmem:[%s869_s11 + $0x10] sm:$0xff]  ;;  %v366_v23 = vld [vmem:[%s869_s11 + $0x18] sm:$0xff]  ;;  %v367_v28 = vld [vmem:[%s869_s11 + $0x20] sm:$0xff]  ;;  %p717_p11 = scmp.ne.s32.totalorder %s1028_s27, %s716_s5 }
  0x19   : > { %v292_v9 = vmul.f32 %v598_v2, %v864_v1  ;;  %v293_v10 = vmul.f32 %v599_v3, %v864_v1  ;;  %v294_v16 = vmul.f32 %v602_v6, %v864_v1  ;;  %v295_v17 = vmul.f32 %v603_v7, %v864_v1  ;;  %v368_v29 = vld [vmem:[%s869_s11 + $0x28] sm:$0xff]  ;;  %v369_v36 = vld [vmem:[%s869_s11 + $0x30] sm:$0xff]  ;;  %v370_v37 = vld [vmem:[%s869_s11 + $0x38] sm:$0xff] }
  0x1a   : > { %v296_v24 = vmul.f32 %v606_v11, %v864_v1  ;;  %v297_v25 = vmul.f32 %v607_v12, %v864_v1  ;;  %v298_v30 = vmul.f32 %v610_v18, %v864_v1  ;;  %v299_v31 = vmul.f32 %v611_v19, %v864_v1  ;;  %v663_v42 = vld [vmem:[%s858_s6 + $0x20] sm:$0xff]   ;;  %v664_v47 = vld [vmem:[%s858_s6 + $0x28] sm:$0xff]   ;;  %v665_v52 = vld [vmem:[%s858_s6 + $0x30] sm:$0xff]   ;;  %p718_p12 = pnand %p717_p11, %p844_p5 }
  0x1b   : > { %v331_v20 = vadd.f32 %v876_v5, %v292_v9  ;;  %v332_v21 = vadd.f32 %v876_v5, %v293_v10  ;;  %v333_v26 = vadd.f32 %v876_v5, %v294_v16  ;;  %v334_v27 = vadd.f32 %v876_v5, %v295_v17  ;;  %v666_v57 = vld [vmem:[%s858_s6 + $0x38] sm:$0xff]   ;;  %v371_v3 = vld [vmem:[%s869_s11 + $0x40] sm:$0xff]  ;;  %v372_v4 = vld [vmem:[%s869_s11 + $0x48] sm:$0xff] }
  0x1c   : > { %v335_v34 = vadd.f32 %v876_v5, %v296_v24  ;;  %v336_v35 = vadd.f32 %v876_v5, %v297_v25  ;;  %v337_v40 = vadd.f32 %v876_v5, %v298_v30  ;;  %v338_v41 = vadd.f32 %v876_v5, %v299_v31  ;;  %v373_v12 = vld [vmem:[%s869_s11 + $0x50] sm:$0xff]  ;;  %v374_v13 = vld [vmem:[%s869_s11 + $0x58] sm:$0xff]  ;;  %v375_v18 = vld [vmem:[%s869_s11 + $0x60] sm:$0xff]  ;;  %p719_p13 = pneg %p718_p12 }
  0x1d   : > { %v395_v32 = vadd.f32 %v363_v14, %v331_v20  ;;  %v396_v33 = vadd.f32 %v364_v15, %v332_v21  ;;  %v397_v38 = vadd.f32 %v365_v22, %v333_v26  ;;  %v398_v39 = vadd.f32 %v366_v23, %v334_v27  ;;  %v376_v19 = vld [vmem:[%s869_s11 + $0x68] sm:$0xff]  ;;  %v377_v26 = vld [vmem:[%s869_s11 + $0x70] sm:$0xff]  ;;  %v378_v27 = vld [vmem:[%s869_s11 + $0x78] sm:$0xff] }
  0x1e   : > { %v399_v45 = vadd.f32 %v367_v28, %v335_v34  ;;  %v400_v46 = vadd.f32 %v368_v29, %v336_v35  ;;  %v401_v50 = vadd.f32 %v369_v36, %v337_v40  ;;  %v402_v51 = vadd.f32 %v370_v37, %v338_v41  ;;  %v668_v37 = vld [vmem:[%s858_s6 + $0x48] sm:$0xff]  }
  0x1f   : > { %v427_v43 = vmax.f32 %v395_v32, 0.0  ;;  %v428_v44 = vmax.f32 %v396_v33, 0.0  ;;  %v429_v48 = vmax.f32 %v397_v38, 0.0  ;;  %v430_v49 = vmax.f32 %v398_v39, 0.0  ;;  %v667_v32 = vld [vmem:[%s858_s6 + $0x40] sm:$0xff]  }
  0x20   : > { %v431_v53 = vmax.f32 %v399_v45, 0.0  ;;  %v432_v54 = vmax.f32 %v400_v46, 0.0  ;;  %v614_v55 = vunpack.c.l.bf16 %v663_v42  ;;  %v615_v56 = vunpack.c.h.bf16 %v663_v42  ;;  %v669_v42 = vld [vmem:[%s858_s6 + $0x50] sm:$0xff]  }
  0x21   : > { %459 = vst [vmem:[%s912_s22] sm:$0xff] %v427_v43  ;;  %460 = vst [vmem:[%s912_s22 + $0x8] sm:$0xff] %v428_v44  ;;  %v433_v58 = vmax.f32 %v401_v50, 0.0  ;;  %v434_v59 = vmax.f32 %v402_v51, 0.0  ;;  %v618_v60 = vunpack.c.l.bf16 %v664_v47  ;;  %v619_v61 = vunpack.c.h.bf16 %v664_v47  ;;  %v670_v47 = vld [vmem:[%s858_s6 + $0x58] sm:$0xff]  }
  0x22   : > { %461 = vst [vmem:[%s912_s22 + $0x10] sm:$0xff] %v429_v48  ;;  %462 = vst [vmem:[%s912_s22 + $0x18] sm:$0xff] %v430_v49  ;;  %v300_v62 = vmul.f32 %v614_v55, %v864_v1  ;;  %v301_v63 = vmul.f32 %v615_v56, %v864_v1  ;;  %v622_v0 = vunpack.c.l.bf16 %v665_v52  ;;  %v623_v2 = vunpack.c.h.bf16 %v665_v52  ;;  %v379_v56 = vld [vmem:[%s869_s11 + $0x80] sm:$0xff] }
  0x23   : > { %463 = vst [vmem:[%s912_s22 + $0x20] sm:$0xff] %v431_v53  ;;  %464 = vst [vmem:[%s912_s22 + $0x28] sm:$0xff] %v432_v54  ;;  %v302_v6 = vmul.f32 %v618_v60, %v864_v1  ;;  %v303_v7 = vmul.f32 %v619_v61, %v864_v1  ;;  %v626_v8 = vunpack.c.l.bf16 %v666_v57  ;;  %v627_v9 = vunpack.c.h.bf16 %v666_v57  ;;  %v380_v57 = vld [vmem:[%s869_s11 + $0x88] sm:$0xff] }
  0x24   : > { %465 = vst [vmem:[%s912_s22 + $0x30] sm:$0xff] %v433_v58  ;;  %466 = vst [vmem:[%s912_s22 + $0x38] sm:$0xff] %v434_v59  ;;  %v339_v10 = vadd.f32 %v876_v5, %v300_v62  ;;  %v340_v11 = vadd.f32 %v876_v5, %v301_v63  ;;  %v304_v14 = vmul.f32 %v622_v0, %v864_v1  ;;  %v630_v45 = vunpack.c.l.bf16 %v667_v32  ;;  %v381_v0 = vld [vmem:[%s869_s11 + $0x90] sm:$0xff] }
  0x25   : > { %v305_v15 = vmul.f32 %v623_v2, %v864_v1  ;;  %v341_v16 = vadd.f32 %v876_v5, %v302_v6  ;;  %v342_v17 = vadd.f32 %v876_v5, %v303_v7  ;;  %v306_v20 = vmul.f32 %v626_v8, %v864_v1  ;;  %v382_v2 = vld [vmem:[%s869_s11 + $0x98] sm:$0xff]  ;;  %v383_v8 = vld [vmem:[%s869_s11 + $0xa0] sm:$0xff] }
  0x26   : > { %v307_v21 = vmul.f32 %v627_v9, %v864_v1  ;;  %v403_v22 = vadd.f32 %v371_v3, %v339_v10  ;;  %v404_v23 = vadd.f32 %v372_v4, %v340_v11  ;;  %v343_v24 = vadd.f32 %v876_v5, %v304_v14  ;;  %v384_v9 = vld [vmem:[%s869_s11 + $0xa8] sm:$0xff] }
  0x27   : > { %v344_v25 = vadd.f32 %v876_v5, %v305_v15  ;;  %v405_v28 = vadd.f32 %v373_v12, %v341_v16  ;;  %v406_v29 = vadd.f32 %v374_v13, %v342_v17  ;;  %v345_v30 = vadd.f32 %v876_v5, %v306_v20  ;;  %v385_v16 = vld [vmem:[%s869_s11 + $0xb0] sm:$0xff]  ;;  %v386_v17 = vld [vmem:[%s869_s11 + $0xb8] sm:$0xff] }
  0x28   : > { %v346_v31 = vadd.f32 %v876_v5, %v307_v21  ;;  %v435_v33 = vmax.f32 %v403_v22, 0.0  ;;  %v436_v34 = vmax.f32 %v404_v23, 0.0  ;;  %v407_v35 = vadd.f32 %v375_v18, %v343_v24  ;;  %v671_v22 = vld [vmem:[%s858_s6 + $0x60] sm:$0xff]  }
  0x29   : > { %v408_v36 = vadd.f32 %v376_v19, %v344_v25  ;;  %v437_v38 = vmax.f32 %v405_v28, 0.0  ;;  %v438_v39 = vmax.f32 %v406_v29, 0.0  ;;  %v409_v40 = vadd.f32 %v377_v26, %v345_v30 }
  0x2a   : > { %v410_v41 = vadd.f32 %v378_v27, %v346_v31  ;;  %467 = vst [vmem:[%s912_s22 + $0x40] sm:$0xff] %v435_v33  ;;  %468 = vst [vmem:[%s912_s22 + $0x48] sm:$0xff] %v436_v34  ;;  %v439_v43 = vmax.f32 %v407_v35, 0.0  ;;  %v631_v46 = vunpack.c.h.bf16 %v667_v32  ;;  %v634_v50 = vunpack.c.l.bf16 %v668_v37  ;;  %v672_v27 = vld [vmem:[%s858_s6 + $0x68] sm:$0xff]   ;;  %v673_v32 = vld [vmem:[%s858_s6 + $0x70] sm:$0xff]  }
  0x2b   : > { %v440_v44 = vmax.f32 %v408_v36, 0.0  ;;  %469 = vst [vmem:[%s912_s22 + $0x50] sm:$0xff] %v437_v38  ;;  %470 = vst [vmem:[%s912_s22 + $0x58] sm:$0xff] %v438_v39  ;;  %v441_v48 = vmax.f32 %v409_v40, 0.0  ;;  %v635_v51 = vunpack.c.h.bf16 %v668_v37  ;;  %v308_v52 = vmul.f32 %v630_v45, %v864_v1  ;;  %v674_v37 = vld [vmem:[%s858_s6 + $0x78] sm:$0xff]   ;;  %s778_s6 = smov [#allocation2]  }
  0x2c   : > { %v442_v49 = vmax.f32 %v410_v41, 0.0  ;;  %471 = vst [vmem:[%s912_s22 + $0x60] sm:$0xff] %v439_v43  ;;  %v309_v53 = vmul.f32 %v631_v46, %v864_v1  ;;  %v638_v54 = vunpack.c.l.bf16 %v669_v42  ;;  %v639_v55 = vunpack.c.h.bf16 %v669_v42  ;;  %v387_v46 = vld [vmem:[%s869_s11 + $0xc0] sm:$0xff]  ;;  %s720_s7 = sshll.u32 %s778_s6, 4  ;;  %s721_s7 = int_to_ptr.vmem [resolvable:$false] %s720_s7 }
  0x2d   : > { %472 = vst [vmem:[%s912_s22 + $0x68] sm:$0xff] %v440_v44  ;;  %473 = vst [vmem:[%s912_s22 + $0x70] sm:$0xff] %v441_v48  ;;  %v310_v58 = vmul.f32 %v634_v50, %v864_v1  ;;  %v311_v59 = vmul.f32 %v635_v51, %v864_v1  ;;  %v642_v60 = vunpack.c.l.bf16 %v670_v47  ;;  %v643_v61 = vunpack.c.h.bf16 %v670_v47  ;;  %v388_v47 = vld [vmem:[%s869_s11 + $0xc8] sm:$0xff]  ;;  %s722_s8 = scalar_lea.vmem %s721_s7, 8192  ;;  %p723_p0 = scmp.lt.s32.totalorder %s1028_s27, %s721_s7 }
  0x2e   : > { %474 = vst [vmem:[%s912_s22 + $0x78] sm:$0xff] %v442_v49  ;;  %v347_v62 = vadd.f32 %v876_v5, %v308_v52  ;;  %v348_v63 = vadd.f32 %v876_v5, %v309_v53  ;;  %v312_v3 = vmul.f32 %v638_v54, %v864_v1  ;;  %v313_v4 = vmul.f32 %v639_v55, %v864_v1  ;;  %v389_v54 = vld [vmem:[%s869_s11 + $0xd0] sm:$0xff]  ;;  %v390_v55 = vld [vmem:[%s869_s11 + $0xd8] sm:$0xff]  ;;  %p724_p1 = scmp.lt.s32.totalorder %s722_s8, %s716_s5 }
  0x2f   : > { %v349_v6 = vadd.f32 %v876_v5, %v310_v58  ;;  %v350_v7 = vadd.f32 %v876_v5, %v311_v59  ;;  %v314_v10 = vmul.f32 %v642_v60, %v864_v1  ;;  %v315_v11 = vmul.f32 %v643_v61, %v864_v1  ;;  %v391_v60 = vld [vmem:[%s869_s11 + $0xe0] sm:$0xff]  ;;  %v392_v61 = vld [vmem:[%s869_s11 + $0xe8] sm:$0xff] }
  0x30   : > { %v411_v12 = vadd.f32 %v379_v56, %v347_v62  ;;  %v412_v13 = vadd.f32 %v380_v57, %v348_v63  ;;  %v351_v14 = vadd.f32 %v876_v5, %v312_v3  ;;  %v352_v15 = vadd.f32 %v876_v5, %v313_v4  ;;  %p725_p2 = por %p724_p1, %p723_p0 }
  0x31   : > { %v413_v18 = vadd.f32 %v381_v0, %v349_v6  ;;  %v414_v19 = vadd.f32 %v382_v2, %v350_v7  ;;  %v353_v20 = vadd.f32 %v876_v5, %v314_v10  ;;  %v354_v21 = vadd.f32 %v876_v5, %v315_v11  ;;  %v393_v6 = vld [vmem:[%s869_s11 + $0xf0] sm:$0xff]  ;;  %v394_v7 = vld [vmem:[%s869_s11 + $0xf8] sm:$0xff] }
  0x32   : > { %v443_v23 = vmax.f32 %v411_v12, 0.0  ;;  %v444_v24 = vmax.f32 %v412_v13, 0.0  ;;  %v415_v25 = vadd.f32 %v383_v8, %v351_v14  ;;  %v416_v26 = vadd.f32 %v384_v9, %v352_v15  ;;  %p726_p3 = pnand %p725_p2, %p719_p13 }
  0x33   : > { %v445_v28 = vmax.f32 %v413_v18, 0.0  ;;  %v446_v29 = vmax.f32 %v414_v19, 0.0  ;;  %v417_v30 = vadd.f32 %v385_v16, %v353_v20  ;;  %v418_v31 = vadd.f32 %v386_v17, %v354_v21 }
  0x34   : > { %475 = vst [vmem:[%s912_s22 + $0x80] sm:$0xff] %v443_v23  ;;  %476 = vst [vmem:[%s912_s22 + $0x88] sm:$0xff] %v444_v24  ;;  %v447_v33 = vmax.f32 %v415_v25, 0.0  ;;  %v448_v34 = vmax.f32 %v416_v26, 0.0  ;;  %v646_v35 = vunpack.c.l.bf16 %v671_v22  ;;  %v647_v36 = vunpack.c.h.bf16 %v671_v22 }
  0x35   : > { %477 = vst [vmem:[%s912_s22 + $0x90] sm:$0xff] %v445_v28  ;;  %478 = vst [vmem:[%s912_s22 + $0x98] sm:$0xff] %v446_v29  ;;  %v449_v38 = vmax.f32 %v417_v30, 0.0  ;;  %v450_v39 = vmax.f32 %v418_v31, 0.0  ;;  %v650_v40 = vunpack.c.l.bf16 %v672_v27  ;;  %v651_v41 = vunpack.c.h.bf16 %v672_v27 }
  0x36   : > { %479 = vst [vmem:[%s912_s22 + $0xa0] sm:$0xff] %v447_v33  ;;  %480 = vst [vmem:[%s912_s22 + $0xa8] sm:$0xff] %v448_v34  ;;  %v316_v42 = vmul.f32 %v646_v35, %v864_v1  ;;  %v317_v43 = vmul.f32 %v647_v36, %v864_v1  ;;  %v654_v44 = vunpack.c.l.bf16 %v673_v32  ;;  %v655_v45 = vunpack.c.h.bf16 %v673_v32 }
  0x37   : > { %481 = vst [vmem:[%s912_s22 + $0xb0] sm:$0xff] %v449_v38  ;;  %482 = vst [vmem:[%s912_s22 + $0xb8] sm:$0xff] %v450_v39  ;;  %v318_v48 = vmul.f32 %v650_v40, %v864_v1  ;;  %v319_v49 = vmul.f32 %v651_v41, %v864_v1  ;;  %v658_v50 = vunpack.c.l.bf16 %v674_v37  ;;  %v659_v51 = vunpack.c.h.bf16 %v674_v37 }
  0x38   : > { %v355_v52 = vadd.f32 %v876_v5, %v316_v42  ;;  %v356_v53 = vadd.f32 %v876_v5, %v317_v43  ;;  %v320_v56 = vmul.f32 %v654_v44, %v864_v1  ;;  %v321_v57 = vmul.f32 %v655_v45, %v864_v1 }
  0x39   : > { %v357_v58 = vadd.f32 %v876_v5, %v318_v48  ;;  %v358_v59 = vadd.f32 %v876_v5, %v319_v49  ;;  %v322_v62 = vmul.f32 %v658_v50, %v864_v1  ;;  %v323_v63 = vmul.f32 %v659_v51, %v864_v1 }
  0x3a   : > { %v419_v0 = vadd.f32 %v387_v46, %v355_v52  ;;  %v420_v2 = vadd.f32 %v388_v47, %v356_v53  ;;  %v359_v3 = vadd.f32 %v876_v5, %v320_v56  ;;  %v360_v4 = vadd.f32 %v876_v5, %v321_v57 }
  0x3b   : > { %v421_v8 = vadd.f32 %v389_v54, %v357_v58  ;;  %v422_v9 = vadd.f32 %v390_v55, %v358_v59  ;;  %v361_v10 = vadd.f32 %v876_v5, %v322_v62  ;;  %v362_v11 = vadd.f32 %v876_v5, %v323_v63 }
  0x3c   : > { %v451_v1 = vmax.f32 %v419_v0, 0.0  ;;  %v452_v12 = vmax.f32 %v420_v2, 0.0  ;;  %v423_v13 = vadd.f32 %v391_v60, %v359_v3  ;;  %v424_v14 = vadd.f32 %v392_v61, %v360_v4 }
  0x3d   : > { %v453_v15 = vmax.f32 %v421_v8, 0.0  ;;  %v454_v16 = vmax.f32 %v422_v9, 0.0  ;;  %v425_v17 = vadd.f32 %v393_v6, %v361_v10  ;;  %v426_v18 = vadd.f32 %v394_v7, %v362_v11 }
  0x3e   : > { %483 = vst [vmem:[%s912_s22 + $0xc0] sm:$0xff] %v451_v1  ;;  %484 = vst [vmem:[%s912_s22 + $0xc8] sm:$0xff] %v452_v12  ;;  %v455_v5 = vmax.f32 %v423_v13, 0.0  ;;  %v456_v19 = vmax.f32 %v424_v14, 0.0 }
  0x3f   : > { %485 = vst [vmem:[%s912_s22 + $0xd0] sm:$0xff] %v453_v15  ;;  %486 = vst [vmem:[%s912_s22 + $0xd8] sm:$0xff] %v454_v16  ;;  %v457_v20 = vmax.f32 %v425_v17, 0.0  ;;  %v458_v21 = vmax.f32 %v426_v18, 0.0 }
  0x40   : > { %487 = vst [vmem:[%s912_s22 + $0xe0] sm:$0xff] %v455_v5  ;;  %488 = vst [vmem:[%s912_s22 + $0xe8] sm:$0xff] %v456_v19 }
  0x41   : > { %489 = vst [vmem:[%s912_s22 + $0xf0] sm:$0xff] %v457_v20  ;;  %490 = vst [vmem:[%s912_s22 + $0xf8] sm:$0xff] %v458_v21 }
  0x42   : > { %729 = shalt.err (!%p726_p3)
}
  0x43   : > { %s730_s9 = scalar_lea.hbm %s1026_s29, 4096  ;;  %s734_s12 = scalar_lea.hbm %s1082_s4, 8192 }
  0x44   : > { %p731_p4 = scmp.ne.s32.totalorder %s1026_s29, %s730_s9  ;;  %p735_p9 = scmp.lt.s32.totalorder %s1026_s29, %s1082_s4 }
  0x45   : > { %p736_p10 = scmp.lt.s32.totalorder %s734_s12, %s730_s9 }
  0x46   : > { %p732_p7 = pnand %p731_p4, %p844_p5 }
  0x47   : > { %p737_p11 = por %p736_p10, %p735_p9 }
  0x48   : > { %p733_p8 = pneg %p732_p7 }
  0x4a   : > { %p738_p12 = pnand %p737_p11, %p733_p8 }
  0x4c   : > { %741 = shalt.err (!%p738_p12)
}
  0x4d   : > { %s779_s20 = smov 128   ;;  %s780_s22 = smov 8  }
  0x4e   : > { %675 = dma.vmem_to_hbm [thread:$0]  (%p844_p5), %s1028_s27, 4096, %s1026_s29, %s1038_s30, %s779_s20, %s779_s20, %s780_s22  }
  0x4f PF: > { %p681_p13 = scmp.ge.s32.totalorder %s776_s18, 2  ;;  %s520_s23 = sand.u32 1, %s764_s15  }
  0x50   : > { %s521_s19 = scalar_lea.sflag [#allocation3], %s520_s23 }
  0x51   : > { %p678_p0 = pnand %p681_p13, %p848_p6 }
  0x53   : > { %p679_p1 = pneg %p678_p0 }
  0x55   : > { %759 = dma.done.wait (%p679_p1), %s521_s19, 4096  }
  0x56   : > { %761 = vsyncadd (%p679_p1), %s521_s19, 4294963200  ;;  %p14_p2 = scmp.ge.s32.totalorder %s831_s21, 4   ;;  %s1085_s15 = smov %s768_s16 }
  0x57   : > { %s1086_s16 = smov %s772_s17  ;;  %s1087_s17 = smov %s842_s24 }
  0x58   : > { %s1088_s18 = smov %s831_s21  ;;  %16 = sbr.rel (!%p14_p2) target bundleno = 3 (0x3), region = 74 }
  0x5d   :  { %526 = vsyncpa [#allocation3], 1 }
  0x5e   :  { %528 = vsyncpa [#allocation3 + $0x1], 1 }

// kernel: bottleneck_pallas.5
= control target key start
LH: loop header
LB: loop body
LE: loop exit
PB: predicated region body
PF: predicated region fallthrough
CT: control target
= control target key end

     0   :  { %s3624_s18 = smov 0   ;;  %s5009_s0 = inlined_call_operand.vmem [shape: bf16[2,16,16,128], index: 0, kind: input, shape index: {}]   ;;  %s5010_s1 = inlined_call_operand.vmem [shape: f32[1,128], index: 1, kind: input, shape index: {}]   ;;  %s5011_s2 = inlined_call_operand.vmem [shape: f32[1,128], index: 2, kind: input, shape index: {}]   ;;  %s5012_s3 = inlined_call_operand.vmem [shape: bf16[1152,128], index: 3, kind: input, shape index: {}]   ;;  %s5013_s4 = inlined_call_operand.vmem [shape: bf16[2,16,16,128], index: 4, kind: output, shape index: {0}]   ;;  %s5014_s5 = inlined_call_operand.vmem [shape: f32[2,2,128], index: 5, kind: output, shape index: {1}]  }
   0x1 LB: > { %s2639_s19 = sadd.s32 4294967295, %s3591_s18   ;;  %p2643_p0 = scmp.ge.s32.totalorder %s3591_s18, 1  ;;  %s3591_s18 = sphi %s3624_s18, %s16_s18  }
   0x2   : > { %p190_p1 = scmp.lt.s32.totalorder %s3591_s18, 3 }
   0x4   : > { %p191_p2 = pnand %p2643_p0, %p190_p1 }
   0x6   : > { %194 = sbr.rel (%p191_p2) target bundleno = 550 (0x226), region = 36 }
   0xb   : > { %v3510_v0 = vld [vmem:[%s5012_s3 + $0x78] sm:$0xff]   ;;  %v3593_v2 = vmov 0.0   ;;  %v3512_v3 = vld [vmem:[%s5012_s3 + $0x70] sm:$0xff]   ;;  %v3514_v5 = vld [vmem:[%s5012_s3 + $0x68] sm:$0xff]   ;;  %p222_p3 = scmp.lt.s32.totalorder %s2639_s19, 1  ;;  %vm589_vm0 = vcmask 1046528  }
   0xc   : > { %v3511_v1 = vld [vmem:[%s5012_s3 + $0x38] sm:$0xff]   ;;  %411 = vst [vmem:[#allocation2] sm:$0xff] %v3593_v2  ;;  %412 = vst [vmem:[#allocation2 + $0x8] sm:$0xff] %v3593_v2  ;;  %2965 = vmatprep.subr.bf16.mxu0 %v3510_v0  ;;  %3485 = vmatprep.subr.bf16.mxu1 %v3510_v0  ;;  %v3513_v4 = vld [vmem:[%s5012_s3 + $0x30] sm:$0xff]   ;;  %v591_v12 = vrot.slane %v3593_v2, 1  ;;  %vm702_vm1 = vcmask 1045504  }
   0xd   : > { %413 = vst [vmem:[#allocation2 + $0x10] sm:$0x3] %v3593_v2  ;;  %415 = vst [vmem:[#allocation2 + $0x198] sm:$0xff] %v3593_v2  ;;  %2966 = vmatpush3.bf16.msra.mxu0 %v3511_v1  ;;  %3493 = vmatpush3.bf16.msra.mxu1 %v3511_v1  ;;  %v3515_v6 = vld [vmem:[%s5012_s3 + $0x28] sm:$0xff]   ;;  %s5084_s19 = smov (!%p222_p3, %s2639_s19), 1  ;;  %v3516_v7 = vld [vmem:[%s5012_s3 + $0x60] sm:$0xff]  }
   0xe   : > { %417 = vst [vmem:[#allocation2 + $0x1a8] sm:$0x3] %v3593_v2  ;;  %419 = vst [vmem:[#allocation2 + $0x18] sm:$0x1] %v3593_v2  ;;  %2967 = vmatprep.subr.bf16.mxu0 %v3512_v3  ;;  %3486 = vmatprep.subr.bf16.mxu1 %v3512_v3  ;;  %s2757_s9 = sshll.u32 %s5084_s19, 7  ;;  %v3517_v8 = vld [vmem:[%s5012_s3 + $0x20] sm:$0xff]  }
   0xf   : > { %420 = vst [vmem:[#allocation2 + $0x30] sm:$0x1] %v3593_v2  ;;  %421 = vst [vmem:[#allocation2 + $0x48] sm:$0x1] %v3593_v2  ;;  %v3518_v9 = vld [vmem:[%s5012_s3 + $0x58] sm:$0xff]   ;;  %s3712_s16 = scalar_lea.vmem %s5009_s0, %s2757_s9  ;;  %v3520_v11 = vld [vmem:[%s5012_s3 + $0x50] sm:$0xff]   ;;  %s4904_s28 = scalar_lea.vmem %s5013_s4, %s2757_s9 }
  0x10   : > { %422 = vst [vmem:[#allocation2 + $0x60] sm:$0x1] %v3593_v2  ;;  %423 = vst [vmem:[#allocation2 + $0x78] sm:$0x1] %v3593_v2  ;;  %v3519_v10 = vld [vmem:[%s5012_s3 + $0x18] sm:$0xff]   ;;  %v3521_v19 = vld [vmem:[%s5012_s3 + $0x10] sm:$0xff]  }
  0x11   : > { %424 = vst [vmem:[#allocation2 + $0x90] sm:$0x1] %v3593_v2  ;;  %425 = vst [vmem:[#allocation2 + $0xa8] sm:$0x1] %v3593_v2  ;;  %2968 = vmatpush3.bf16.msra.mxu0 %v3513_v4  ;;  %3494 = vmatpush3.bf16.msra.mxu1 %v3513_v4  ;;  %v2945_v15 = vld [vmem:[%s3712_s16 + $0x58] sm:$0xff]   ;;  %v3522_v25 = vld [vmem:[%s5012_s3 + $0x48] sm:$0xff]  }
  0x12   : > { %426 = vst [vmem:[#allocation2 + $0xc0] sm:$0x1] %v3593_v2  ;;  %427 = vst [vmem:[#allocation2 + $0xd8] sm:$0x1] %v3593_v2  ;;  %2969 = vmatprep.subr.bf16.mxu0 %v3514_v5  ;;  %3487 = vmatprep.subr.bf16.mxu1 %v3514_v5  ;;  %v3731_v18 = vld [vmem:[%s5010_s1] ss:$0 sm:$0xff]  ;;  %v2837_v20 = vunpack.c.l.bf16 %v2945_v15  ;;  %v2838_v21 = vunpack.c.h.bf16 %v2945_v15 }
  0x13   : > { %428 = vst [vmem:[#allocation2 + $0xf0] sm:$0x1] %v3593_v2  ;;  %429 = vst [vmem:[#allocation2 + $0x108] sm:$0x1] %v3593_v2  ;;  %v3741_v24 = vld [vmem:[%s5011_s2] ss:$0 sm:$0xff] }
  0x14   : > { %430 = vst [vmem:[#allocation2 + $0x120] sm:$0x1] %v3593_v2  ;;  %431 = vst [vmem:[#allocation2 + $0x138] sm:$0x1] %v3593_v2  ;;  %v330_v27 = vmul.f32 %v2837_v20, %v3731_v18  ;;  %v331_v28 = vmul.f32 %v2838_v21, %v3731_v18  ;;  %v3523_v31 = vld [vmem:[%s5012_s3 + $0x8] sm:$0xff]   ;;  %v3524_v32 = vld [vmem:[%s5012_s3 + $0x40] sm:$0xff]  }
  0x15   : > { %432 = vst [vmem:[#allocation2 + $0x150] sm:$0x1] %v3593_v2  ;;  %433 = vst [vmem:[#allocation2 + $0x168] sm:$0x1] %v3593_v2  ;;  %2970 = vmatpush3.bf16.msra.mxu0 %v3515_v6  ;;  %3495 = vmatpush3.bf16.msra.mxu1 %v3515_v6  ;;  %v2792_v35 = vld [vmem:[%s3712_s16] sm:$0xff]   ;;  %v3526_v42 = vld [vmem:[%s5012_s3 + $0xf8] sm:$0xff]  }
  0x16   : > { %434 = vst [vmem:[#allocation2 + $0x180] sm:$0x1] %v3593_v2  ;;  %437 = vst [vmem:[#allocation2 + $0x29] sm:$0x1] %v3593_v2  ;;  %2971 = vmatprep.subr.bf16.mxu0 %v3516_v7  ;;  %3488 = vmatprep.subr.bf16.mxu1 %v3516_v7  ;;  %v369_v29 = vadd.f32 %v3741_v24, %v330_v27  ;;  %v370_v30 = vadd.f32 %v3741_v24, %v331_v28  ;;  %v2946_v36 = vld [vmem:[%s3712_s16 + $0x60] sm:$0xff]   ;;  %v2793_v37 = vunpack.c.l.bf16 %v2792_v35  ;;  %v3527_v46 = vld [vmem:[%s5012_s3 + $0x178] sm:$0xff]  }
  0x17   : > { %438 = vst [vmem:[#allocation2 + $0x41] sm:$0x1] %v3593_v2  ;;  %439 = vst [vmem:[#allocation2 + $0x59] sm:$0x1] %v3593_v2  ;;  %v2794_v38 = vunpack.c.h.bf16 %v2792_v35  ;;  %v2841_v39 = vunpack.c.l.bf16 %v2946_v36  ;;  %v2842_v40 = vunpack.c.h.bf16 %v2946_v36  ;;  %v3525_v41 = vld [vmem:[%s5012_s3] sm:$0xff]   ;;  %v3529_v53 = vld [vmem:[%s5012_s3 + $0x138] sm:$0xff]  }
  0x18   : > { %440 = vst [vmem:[#allocation2 + $0x71] sm:$0x1] %v3593_v2  ;;  %441 = vst [vmem:[#allocation2 + $0x89] sm:$0x1] %v3593_v2  ;;  %v401_v33 = vmax.f32 %v369_v29, 0.0  ;;  %v402_v34 = vmax.f32 %v370_v30, 0.0  ;;  %v308_v43 = vmul.f32 %v2793_v37, %v3731_v18 }
  0x19   : > { %442 = vst [vmem:[#allocation2 + $0xa1] sm:$0x1] %v3593_v2  ;;  %443 = vst [vmem:[#allocation2 + $0xb9] sm:$0x1] %v3593_v2  ;;  %2972 = vmatpush3.bf16.msra.mxu0 %v3517_v8  ;;  %3496 = vmatpush3.bf16.msra.mxu1 %v3517_v8  ;;  %v309_v44 = vmul.f32 %v2794_v38, %v3731_v18  ;;  %v332_v45 = vmul.f32 %v2841_v39, %v3731_v18  ;;  %v2935_v57 = vld [vmem:[%s3712_s16 + $0x8] sm:$0xff]   ;;  %v3535_v60 = vld [vmem:[%s5012_s3 + $0x170] sm:$0xff]  }
  0x1a   : > { %444 = vst [vmem:[#allocation2 + $0xd1] sm:$0x1] %v3593_v2  ;;  %445 = vst [vmem:[#allocation2 + $0xe9] sm:$0x1] %v3593_v2  ;;  %2973 = vmatprep.subr.bf16.mxu0 %v3518_v9  ;;  %3489 = vmatprep.subr.bf16.mxu1 %v3518_v9  ;;  %v333_v47 = vmul.f32 %v2842_v40, %v3731_v18  ;;  %v347_v48 = vadd.f32 %v3741_v24, %v308_v43  ;;  %v2947_v58 = vld [vmem:[%s3712_s16 + $0x68] sm:$0xff]   ;;  %v2797_v61 = vunpack.c.l.bf16 %v2935_v57  ;;  %v3537_v8 = vld [vmem:[%s5012_s3 + $0x130] sm:$0xff]  }
  0x1b   : > { %446 = vst [vmem:[#allocation2 + $0x101] sm:$0x1] %v3593_v2  ;;  %447 = vst [vmem:[#allocation2 + $0x119] sm:$0x1] %v3593_v2  ;;  %v348_v49 = vadd.f32 %v3741_v24, %v309_v44  ;;  %v371_v50 = vadd.f32 %v3741_v24, %v332_v45  ;;  %v2798_v62 = vunpack.c.h.bf16 %v2935_v57  ;;  %v2845_v63 = vunpack.c.l.bf16 %v2947_v58  ;;  %v3530_v27 = vld [vmem:[%s5012_s3 + $0xf0] sm:$0xff]   ;;  %v3543_v36 = vld [vmem:[%s5012_s3 + $0x168] sm:$0xff]  }
  0x1c   : > { %448 = vst [vmem:[#allocation2 + $0x131] sm:$0x1] %v3593_v2  ;;  %449 = vst [vmem:[#allocation2 + $0x149] sm:$0x1] %v3593_v2  ;;  %v372_v52 = vadd.f32 %v3741_v24, %v333_v47  ;;  %v379_v54 = vmax.f32 %v347_v48, 0.0  ;;  %v2846_v4 = vunpack.c.h.bf16 %v2947_v58  ;;  %v310_v9 = vmul.f32 %v2797_v61, %v3731_v18  ;;  %s2648_s9 = sshll.u32 %s5084_s19, 1 }
  0x1d   : > { %450 = vst [vmem:[#allocation2 + $0x161] sm:$0x1] %v3593_v2  ;;  %451 = vst [vmem:[#allocation2 + $0x179] sm:$0x1] %v3593_v2  ;;  %2974 = vmatpush3.bf16.msra.mxu0 %v3519_v10  ;;  %3497 = vmatpush3.bf16.msra.mxu1 %v3519_v10  ;;  %v380_v55 = vmax.f32 %v348_v49, 0.0  ;;  %v403_v56 = vmax.f32 %v371_v50, 0.0  ;;  %v311_v10 = vmul.f32 %v2798_v62, %v3731_v18  ;;  %s235_s6 = scalar_lea.vmem %s5014_s5, %s2648_s9 }
  0x1e   : > { %452 = vst [vmem:[#allocation2 + $0x191] sm:$0x1] %v3593_v2  ;;  %418 = vst [vmem:[#allocation2] sm:$0x1] %v3593_v2  ;;  %2975 = vmatprep.subr.bf16.mxu0 %v3520_v11  ;;  %3490 = vmatprep.subr.bf16.mxu1 %v3520_v11  ;;  %v404_v59 = vmax.f32 %v372_v52, 0.0  ;;  %v334_v11 = vmul.f32 %v2845_v63, %v3731_v18  ;;  %v349_v21 = vadd.f32 %v3741_v24, %v310_v9  ;;  %v3532_v49 = vld [vmem:[%s5012_s3 + $0xe8] sm:$0xff]  }
  0x1f   : > { %436 = vst [vmem:[#allocation2 + $0x11] sm:$0x1] %v3593_v2  ;;  %435 = vst [vmem:[#allocation2 + $0x198] sm:$0x1] %v3593_v2  ;;  %vm2550_vm2 = vcmask 1040384  }
  0x20   : > { %453 = vst [vmem:[#allocation2 + $0x1a9] sm:$0x1] %v3593_v2  ;;  %477 = vst [vmem:[#allocation2 + $0x121] sm:$0xff] %v401_v33  ;;  %v381_v33 = vmax.f32 %v349_v21, 0.0 }
  0x21   : > { %2976 = vmatpush3.bf16.msra.mxu0 %v3521_v19  ;;  %3498 = vmatpush3.bf16.msra.mxu1 %v3521_v19  ;;  %478 = vst [vmem:[#allocation2 + $0x129] sm:$0xff] %v402_v34  ;;  %455 = vst [vmem:[#allocation2 + $0x19] sm:$0xff] %v379_v54  ;;  %v3528_v19 = vld [vmem:[%s5012_s3 + $0xb8] sm:$0xff]  }
  0x22   : > { %2977 = vmatprep.subr.bf16.mxu0 %v3522_v25  ;;  %3491 = vmatprep.subr.bf16.mxu1 %v3522_v25  ;;  %456 = vst [vmem:[#allocation2 + $0x21] sm:$0xff] %v380_v55  ;;  %479 = vst [vmem:[#allocation2 + $0x139] sm:$0xff] %v403_v56  ;;  %v2936_v25 = vld [vmem:[%s3712_s16 + $0x10] sm:$0xff]  }
  0x23   : > { %480 = vst [vmem:[#allocation2 + $0x141] sm:$0xff] %v404_v59  ;;  %v2801_v29 = vunpack.c.l.bf16 %v2936_v25  ;;  %v2802_v30 = vunpack.c.h.bf16 %v2936_v25  ;;  %457 = vst [vmem:[#allocation2 + $0x31] sm:$0xff] %v381_v33  ;;  %v3538_v33 = vld [vmem:[%s5012_s3 + $0xd8] sm:$0xff]  }
  0x25   : > { %v3721_v13 = vld [vmem:[#allocation2] sm:$0xff]  ;;  %2978 = vmatpush3.bf16.msra.mxu0 %v3523_v31  ;;  %3499 = vmatpush3.bf16.msra.mxu1 %v3523_v31 }
  0x26   : > { %v3723_v14 = vld [vmem:[#allocation2 + $0x10] sm:$0x3]  ;;  %v590_v16 = vrot.slane %v3721_v13, 1  ;;  %2979 = vmatprep.subr.bf16.mxu0 %v3524_v32  ;;  %3492 = vmatprep.subr.bf16.mxu1 %v3524_v32  ;;  %v849_v51 = vpack.c.bf16 %v3593_v2, %v3721_v13 }
  0x27   : > { %v593_v17 = vrot.slane %v3723_v14, 1  ;;  %v3785_v0 = vld [vmem:[#allocation2 + $0x120] sm:$0xff]  ;;  %v3531_v32 = vld [vmem:[%s5012_s3 + $0xb0] sm:$0xff]  }
  0x28   : > { %v592_v22 = vsel %vm589_vm0, %v590_v16, %v591_v12  ;;  %v3787_v1 = vld [vmem:[#allocation2 + $0x128] sm:$0xff]  ;;  %v3789_v3 = vld [vmem:[#allocation2 + $0x130] sm:$0x3]  ;;  %v650_v5 = vrot.slane %v3785_v0, 1  ;;  %v3829_v37 = vld [vmem:[#allocation2 + $0x18] sm:$0xff] }
  0x29   : > { %v594_v23 = vsel %vm589_vm0, %v591_v12, %v593_v17  ;;  %2980 = vmatpush3.bf16.msra.mxu0 %v3525_v41  ;;  %3500 = vmatpush3.bf16.msra.mxu1 %v3525_v41  ;;  %v651_v6 = vrot.slane %v3787_v1, 1  ;;  %v653_v7 = vrot.slane %v3789_v3, 1  ;;  %v335_v12 = vmul.f32 %v2846_v4, %v3731_v18  ;;  %v3831_v38 = vld [vmem:[#allocation2 + $0x20] sm:$0xff]  ;;  %v3833_v39 = vld [vmem:[#allocation2 + $0x28] sm:$0x3]  ;;  %v3840_v47 = vld [vmem:[#allocation2 + $0x138] sm:$0xff] }
  0x2a   : > { %v850_v26 = vpack.c.bf16 %v594_v23, %v592_v22  ;;  %3077 = vmatprep.subr.bf16.mxu1 %v3526_v42  ;;  %3189 = vmatprep.subr.bf16.mxu0 %v3527_v46  ;;  %v3805_v17 = vpack.c.bf16 %v3787_v1, %v3785_v0  ;;  %v350_v22 = vadd.f32 %v3741_v24, %v311_v10  ;;  %v595_v44 = vrot.slane %v3829_v37, 1  ;;  %v3842_v48 = vld [vmem:[#allocation2 + $0x140] sm:$0xff] }
  0x2b   : > { %v652_v15 = vsel %vm589_vm0, %v650_v5, %v651_v6  ;;  %v654_v16 = vsel %vm589_vm0, %v651_v6, %v653_v7  ;;  %v373_v23 = vadd.f32 %v3741_v24, %v334_v11  ;;  %v374_v28 = vadd.f32 %v3741_v24, %v335_v12  ;;  %v3533_v7 = vld [vmem:[%s5012_s3 + $0xa8] sm:$0xff]   ;;  %v2937_v12 = vld [vmem:[%s3712_s16 + $0x18] sm:$0xff]  }
  0x2c   : > { %1511 = vmatprep.mubr.bf16.mxu0 %v850_v26  ;;  %v3810_v20 = vpack.c.bf16 %v654_v16, %v652_v15  ;;  %v2948_v26 = vld [vmem:[%s3712_s16 + $0x70] sm:$0xff]   ;;  %v382_v34 = vmax.f32 %v350_v22, 0.0  ;;  %v312_v41 = vmul.f32 %v2801_v29, %v3731_v18  ;;  %v313_v42 = vmul.f32 %v2802_v30, %v3731_v18  ;;  %v3534_v15 = vld [vmem:[%s5012_s3 + $0xe0] sm:$0xff]  }
  0x2d   : > { %1512 = vmatmul.mubr.bf16.vlgmr.msra.gmra.mxu0 %v849_v51  ;;  %v2849_v31 = vunpack.c.l.bf16 %v2948_v26  ;;  %v405_v35 = vmax.f32 %v373_v23, 0.0  ;;  %v406_v40 = vmax.f32 %v374_v28, 0.0  ;;  %v2850_v43 = vunpack.c.h.bf16 %v2948_v26  ;;  %v3848_v51 = vld [vmem:[#allocation2 + $0x148] sm:$0x3]  ;;  %v3536_v22 = vld [vmem:[%s5012_s3 + $0xa0] sm:$0xff]   ;;  %v3890_v23 = vld [vmem:[#allocation2 + $0x30] sm:$0xff] }
  0x2e   : > { %3190 = vmatpush3.bf16.msra.mxu0 %v3529_v53  ;;  %5038 = vst [vmem:[#allocation3_spill] sm:$0xff] %v3810_v20  ;;  %1607 = vmatprep.mubr.bf16.mxu1 %v3810_v20  ;;  %v596_v45 = vrot.slane %v3831_v38, 1  ;;  %v598_v46 = vrot.slane %v3833_v39, 1  ;;  %458 = vst [vmem:[#allocation2 + $0x39] sm:$0xff] %v382_v34  ;;  %v655_v52 = vrot.slane %v3840_v47, 1  ;;  %v656_v53 = vrot.slane %v3842_v48, 1 }
  0x2f   : > { %3191 = vmatprep.subr.bf16.mxu0 %v3535_v60  ;;  %1608 = vmatmul.mubr.bf16.vlgmr.msra.gmra.mxu1 %v3805_v17  ;;  %481 = vst [vmem:[#allocation2 + $0x151] sm:$0xff] %v405_v35  ;;  %v336_v50 = vmul.f32 %v2849_v31, %v3731_v18  ;;  %v3854_v54 = vpack.c.bf16 %v3831_v38, %v3829_v37  ;;  %482 = vst [vmem:[#allocation2 + $0x159] sm:$0xff] %v406_v40  ;;  %v658_v58 = vrot.slane %v3848_v51, 1  ;;  %v3545_v60 = vld [vmem:[%s5012_s3 + $0x128] sm:$0xff]  }
  0x30   : > { %3078 = vmatpush3.bf16.msra.mxu1 %v3528_v19  ;;  %v351_v55 = vadd.f32 %v3741_v24, %v312_v41  ;;  %v597_v56 = vsel %vm589_vm0, %v595_v44, %v596_v45  ;;  %v599_v57 = vsel %vm589_vm0, %v596_v45, %v598_v46  ;;  %v352_v59 = vadd.f32 %v3741_v24, %v313_v42  ;;  %v3550_v46 = vld [vmem:[%s5012_s3 + $0x160] sm:$0xff]   ;;  %v2943_v20 = vld [vmem:[%s3712_s16 + $0x48] sm:$0xff]  }
  0x31   : > { %3079 = vmatprep.subr.bf16.mxu1 %v3530_v27  ;;  %v3864_v61 = vpack.c.bf16 %v599_v57, %v597_v56  ;;  %v657_v62 = vsel %vm589_vm0, %v655_v52, %v656_v53  ;;  %v337_v4 = vmul.f32 %v2850_v43, %v3731_v18  ;;  %v659_v5 = vsel %vm589_vm0, %v656_v53, %v658_v58  ;;  %v3539_v52 = vld [vmem:[%s5012_s3 + $0x98] sm:$0xff]  }
  0x32   : > { %3192 = vmatpush3.bf16.msra.mxu0 %v3537_v8  ;;  %v383_v63 = vmax.f32 %v351_v55, 0.0  ;;  %v3871_v6 = vpack.c.bf16 %v3842_v48, %v3840_v47  ;;  %v384_v8 = vmax.f32 %v352_v59, 0.0  ;;  %v375_v9 = vadd.f32 %v3741_v24, %v336_v50  ;;  %v3551_v55 = vld [vmem:[%s5012_s3 + $0x120] sm:$0xff]  }
  0x33   : > { %3193 = vmatprep.subr.bf16.mxu0 %v3543_v36  ;;  %1519 = vmatprep.mubr.bf16.mxu0 %v3864_v61  ;;  %v3878_v10 = vpack.c.bf16 %v659_v5, %v657_v62  ;;  %v376_v11 = vadd.f32 %v3741_v24, %v337_v4  ;;  %v2805_v19 = vunpack.c.l.bf16 %v2937_v12  ;;  %v2806_v21 = vunpack.c.h.bf16 %v2937_v12  ;;  %v2938_v62 = vld [vmem:[%s3712_s16 + $0x20] sm:$0xff]   ;;  %v3540_v12 = vld [vmem:[%s5012_s3 + $0xd0] sm:$0xff]  }
  0x34   : > { %3080 = vmatpush3.bf16.msra.mxu1 %v3531_v32  ;;  %5039 = vst [vmem:[#allocation4_spill] sm:$0xff] %v3871_v6  ;;  %459 = vst [vmem:[#allocation2 + $0x49] sm:$0xff] %v383_v63  ;;  %v407_v16 = vmax.f32 %v375_v9, 0.0  ;;  %v600_v28 = vrot.slane %v3890_v23, 1  ;;  %v3934_v56 = vrot.slane %v3593_v2, 2  ;;  %v2939_v63 = vld [vmem:[%s3712_s16 + $0x28] sm:$0xff]   ;;  %v2809_v9 = vunpack.c.l.bf16 %v2938_v62 }
  0x35   : > { %5040 = vst [vmem:[#allocation5_spill] sm:$0xff] %v3878_v10  ;;  %3081 = vmatprep.subr.bf16.mxu1 %v3532_v49  ;;  %1520 = vmatmul.mubr.bf16.gmra.mxu0 %v3854_v54  ;;  %460 = vst [vmem:[#allocation2 + $0x51] sm:$0xff] %v384_v8  ;;  %v3892_v25 = vld [vmem:[#allocation2 + $0x38] sm:$0xff]  ;;  %v3894_v26 = vld [vmem:[#allocation2 + $0x40] sm:$0x3]  ;;  %v408_v27 = vmax.f32 %v376_v11, 0.0  ;;  %v314_v41 = vmul.f32 %v2805_v19, %v3731_v18  ;;  %v315_v45 = vmul.f32 %v2806_v21, %v3731_v18 }
  0x36   : > { %3194 = vmatpush3.bf16.msra.mxu0 %v3545_v60  ;;  %1615 = vmatprep.mubr.bf16.mxu1 %v3878_v10  ;;  %v601_v29 = vrot.slane %v3892_v25, 1  ;;  %v603_v30 = vrot.slane %v3894_v26, 1  ;;  %v3900_v31 = vld [vmem:[#allocation2 + $0x150] sm:$0xff]  ;;  %v3902_v32 = vld [vmem:[#allocation2 + $0x158] sm:$0xff]  ;;  %483 = vst [vmem:[#allocation2 + $0x169] sm:$0xff] %v407_v16  ;;  %v3913_v40 = vpack.c.bf16 %v3892_v25, %v3890_v23  ;;  %v706_v21 = vrot.slane %v3723_v14, 2 }
  0x37   : > { %1616 = vmatmul.mubr.bf16.gmra.mxu1 %v3871_v6  ;;  %v3907_v34 = vld [vmem:[#allocation2 + $0x160] sm:$0x3]  ;;  %v660_v35 = vrot.slane %v3900_v31, 1  ;;  %v661_v36 = vrot.slane %v3902_v32, 1  ;;  %484 = vst [vmem:[#allocation2 + $0x171] sm:$0xff] %v408_v27  ;;  %v353_v53 = vadd.f32 %v3741_v24, %v314_v41  ;;  %v3939_v58 = vpack.c.bf16 %v3902_v32, %v3900_v31  ;;  %3195 = vmatprep.subr.bf16.mxu0 %v3550_v46  ;;  %v3552_v11 = vld [vmem:[%s5012_s3 + $0x158] sm:$0xff]  }
  0x38   : > { %3082 = vmatpush3.bf16.msra.mxu1 %v3533_v7  ;;  %5041 = vst [vmem:[#allocation6_spill] sm:$0xff] %v3913_v40  ;;  %v602_v42 = vsel %vm589_vm0, %v600_v28, %v601_v29  ;;  %v604_v43 = vsel %vm589_vm0, %v601_v29, %v603_v30  ;;  %v663_v44 = vrot.slane %v3907_v34, 1  ;;  %v354_v60 = vadd.f32 %v3741_v24, %v315_v45  ;;  %v3542_v46 = vld [vmem:[%s5012_s3 + $0xc8] sm:$0xff]  }
  0x39   : > { %3083 = vmatprep.subr.bf16.mxu1 %v3534_v15  ;;  %v3923_v49 = vpack.c.bf16 %v604_v43, %v602_v42  ;;  %v662_v50 = vsel %vm589_vm0, %v660_v35, %v661_v36  ;;  %5042 = vst [vmem:[#allocation7_spill] sm:$0xff] %v3939_v58  ;;  %v385_v8 = vmax.f32 %v353_v53, 0.0  ;;  %v2810_v28 = vunpack.c.h.bf16 %v2938_v62 }
  0x3a   : > { %v664_v57 = vsel %vm589_vm0, %v661_v36, %v663_v44  ;;  %v386_v19 = vmax.f32 %v354_v60, 0.0  ;;  %3196 = vmatpush3.bf16.msra.mxu0 %v3551_v55  ;;  %v316_v29 = vmul.f32 %v2809_v9, %v3731_v18  ;;  %v2813_v30 = vunpack.c.l.bf16 %v2939_v63  ;;  %v2940_v9 = vld [vmem:[%s3712_s16 + $0x30] sm:$0xff]  }
  0x3b   : > { %v3941_v59 = vld [vmem:[#allocation2 + $0x48] sm:$0xff]  ;;  %1527 = vmatprep.mubr.bf16.mxu0 %v3923_v49  ;;  %v3947_v4 = vpack.c.bf16 %v664_v57, %v662_v50  ;;  %461 = vst [vmem:[#allocation2 + $0x61] sm:$0xff] %v385_v8  ;;  %3197 = vmatprep.subr.bf16.mxu0 %v3552_v11  ;;  %v317_v50 = vmul.f32 %v2810_v28, %v3731_v18  ;;  %v2814_v53 = vunpack.c.h.bf16 %v2939_v63  ;;  %v3554_v57 = vld [vmem:[%s5012_s3 + $0x118] sm:$0xff]   ;;  %v703_v60 = vrot.slane %v3721_v13, 2 }
  0x3c   : > { %3084 = vmatpush3.bf16.msra.mxu1 %v3536_v22  ;;  %v3949_v2 = vld [vmem:[#allocation2 + $0x50] sm:$0xff]  ;;  %v3951_v5 = vld [vmem:[#allocation2 + $0x58] sm:$0x3]  ;;  %v605_v7 = vrot.slane %v3941_v59, 1  ;;  %462 = vst [vmem:[#allocation2 + $0x69] sm:$0xff] %v386_v19  ;;  %v318_v55 = vmul.f32 %v2813_v30, %v3731_v18  ;;  %v3544_v63 = vld [vmem:[%s5012_s3 + $0x88] sm:$0xff]  }
  0x3d   : > { %5043 = vst [vmem:[#allocation8_spill] sm:$0xff] %v3947_v4  ;;  %1528 = vmatmul.mubr.bf16.gmra.mxu0 %v3913_v40  ;;  %3085 = vmatprep.subr.bf16.mxu1 %v3538_v33  ;;  %v606_v15 = vrot.slane %v3949_v2, 1  ;;  %v608_v16 = vrot.slane %v3951_v5, 1  ;;  %v3541_v22 = vld [vmem:[%s5012_s3 + $0x90] sm:$0xff]   ;;  %v3968_v27 = vld [vmem:[#allocation2 + $0x168] sm:$0xff]  ;;  %v3985_v45 = vpack.c.bf16 %v3949_v2, %v3941_v59  ;;  %v3546_v19 = vld [vmem:[%s5012_s3 + $0xc0] sm:$0xff]  }
  0x3e   : > { %1623 = vmatprep.mubr.bf16.mxu1 %v3947_v4  ;;  %v3974_v35 = vld [vmem:[#allocation2 + $0x170] sm:$0xff]  ;;  %v3976_v36 = vld [vmem:[#allocation2 + $0x178] sm:$0x3]  ;;  %v665_v41 = vrot.slane %v3968_v27, 1  ;;  %3198 = vmatpush3.bf16.msra.mxu0 %v3554_v57  ;;  %v357_v28 = vadd.f32 %v3741_v24, %v318_v55 }
  0x3f   : > { %1624 = vmatmul.mubr.bf16.gmra.mxu1 %v3939_v58  ;;  %v607_v33 = vsel %vm589_vm0, %v605_v7, %v606_v15  ;;  %v609_v14 = vsel %vm589_vm0, %v606_v15, %v608_v16  ;;  %v666_v43 = vrot.slane %v3974_v35, 1  ;;  %v668_v44 = vrot.slane %v3976_v36, 1  ;;  %5044 = vst [vmem:[#allocation9_spill] sm:$0xff] %v3985_v45  ;;  %v3556_v16 = vld [vmem:[%s5012_s3 + $0x150] sm:$0xff]  }
  0x40   : > { %3086 = vmatpush3.bf16.msra.mxu1 %v3539_v52  ;;  %v3979_v42 = vpack.c.bf16 %v609_v14, %v607_v33  ;;  %v355_v52 = vadd.f32 %v3741_v24, %v316_v29  ;;  %v4002_v8 = vpack.c.bf16 %v3974_v35, %v3968_v27  ;;  %v319_v15 = vmul.f32 %v2814_v53, %v3731_v18  ;;  %v3557_v30 = vld [vmem:[%s5012_s3 + $0x110] sm:$0xff]  }
  0x41   : > { %3087 = vmatprep.subr.bf16.mxu1 %v3540_v12  ;;  %v667_v62 = vsel %vm589_vm0, %v665_v41, %v666_v43  ;;  %v669_v7 = vsel %vm589_vm0, %v666_v43, %v668_v44  ;;  %v356_v12 = vadd.f32 %v3741_v24, %v317_v50  ;;  %v2817_v29 = vunpack.c.l.bf16 %v2940_v9  ;;  %v3547_v44 = vld [vmem:[%s5012_s3 + $0x80] sm:$0xff]   ;;  %3199 = vmatprep.subr.bf16.mxu0 %v3556_v16 }
  0x42   : > { %1535 = vmatprep.mubr.bf16.mxu0 %v3979_v42  ;;  %5045 = vst [vmem:[#allocation10_spill] sm:$0xff] %v4002_v8  ;;  %v4008_v11 = vpack.c.bf16 %v669_v7, %v667_v62  ;;  %v387_v13 = vmax.f32 %v355_v52, 0.0  ;;  %v4024_v33 = vsel %vm702_vm1, %v3934_v56, %v706_v21  ;;  %v358_v41 = vadd.f32 %v3741_v24, %v319_v15  ;;  %v2941_v62 = vld [vmem:[%s3712_s16 + $0x38] sm:$0xff]   ;;  %v4059_v16 = vld [vmem:[%s3712_s16 + $0x40] sm:$0xff]  }
  0x43   : > { %v388_v14 = vmax.f32 %v356_v12, 0.0  ;;  %v2818_v43 = vunpack.c.h.bf16 %v2940_v9  ;;  %v4034_v50 = vld [vmem:[#allocation2 + $0x68] sm:$0xff]  ;;  %v4036_v21 = vld [vmem:[#allocation2 + $0x70] sm:$0x3]  ;;  %v705_v53 = vsel %vm702_vm1, %v703_v60, %v3934_v56  ;;  %v389_v55 = vmax.f32 %v357_v28, 0.0  ;;  %3200 = vmatpush3.bf16.msra.mxu0 %v3557_v30  ;;  %v3548_v60 = vld [vmem:[%s5012_s3 + $0x1f8] sm:$0xff]  }
  0x44   : > { %5046 = vst [vmem:[#allocation11_spill] sm:$0xff] %v4008_v11  ;;  %3088 = vmatpush3.bf16.msra.mxu1 %v3541_v22  ;;  %1631 = vmatprep.mubr.bf16.mxu1 %v4008_v11  ;;  %v4028_v22 = vld [vmem:[#allocation2 + $0x60] sm:$0xff]  ;;  %463 = vst [vmem:[#allocation2 + $0x79] sm:$0xff] %v387_v13  ;;  %v320_v57 = vmul.f32 %v2817_v29, %v3731_v18  ;;  %v613_v7 = vrot.slane %v4036_v21, 1  ;;  %v708_v9 = vrot.slane %v3829_v37, 2  ;;  %v390_v12 = vmax.f32 %v358_v41, 0.0 }
  0x45   : > { %1536 = vmatmul.mubr.bf16.gmra.mxu0 %v3985_v45  ;;  %3089 = vmatprep.subr.bf16.mxu1 %v3542_v46  ;;  %v610_v52 = vrot.slane %v4028_v22, 1  ;;  %v611_v46 = vrot.slane %v4034_v50, 1  ;;  %464 = vst [vmem:[#allocation2 + $0x81] sm:$0xff] %v388_v14  ;;  %v4050_v56 = vpack.c.bf16 %v4034_v50, %v4028_v22  ;;  %v709_v13 = vrot.slane %v3831_v38, 2  ;;  %465 = vst [vmem:[#allocation2 + $0x91] sm:$0xff] %v389_v55  ;;  %v3560_v30 = vld [vmem:[%s5012_s3 + $0x148] sm:$0xff]  }
  0x46   : > { %v321_v15 = vmul.f32 %v2818_v43, %v3731_v18  ;;  %v359_v37 = vadd.f32 %v3741_v24, %v320_v57  ;;  %466 = vst [vmem:[#allocation2 + $0x99] sm:$0xff] %v390_v12  ;;  %v2821_v28 = vunpack.c.l.bf16 %v2941_v62  ;;  %v2822_v29 = vunpack.c.h.bf16 %v2941_v62  ;;  %3201 = vmatprep.subr.bf16.mxu0 %v3560_v30  ;;  %v3549_v62 = vld [vmem:[%s5012_s3 + $0x1b8] sm:$0xff]  }
  0x47   : > { %1632 = vmatmul.mubr.bf16.gmra.mxu1 %v4002_v8  ;;  %5047 = vst [vmem:[#allocation12_spill] sm:$0xff] %v4050_v56  ;;  %v851_v43 = vpack.c.bf16 %v4024_v33, %v705_v53  ;;  %v3553_v33 = vld [vmem:[%s5012_s3 + $0x1f0] sm:$0xff]   ;;  %v2825_v12 = vunpack.c.l.bf16 %v4059_v16  ;;  %v718_v8 = vrot.slane %v3941_v59, 2  ;;  %v721_v58 = vrot.slane %v3951_v5, 2 }
  0x48   : > { %3090 = vmatpush3.bf16.msra.mxu1 %v3544_v63  ;;  %1672 = vmatprep.mubr.bf16.mxu1 %v3854_v54  ;;  %v612_v54 = vsel %vm589_vm0, %v610_v52, %v611_v46  ;;  %v614_v63 = vsel %vm589_vm0, %v611_v46, %v613_v7  ;;  %v360_v14 = vadd.f32 %v3741_v24, %v321_v15  ;;  %v391_v41 = vmax.f32 %v359_v37, 0.0  ;;  %v3564_v15 = vld [vmem:[%s5012_s3 + $0x140] sm:$0xff]   ;;  %v3569_v5 = vld [vmem:[%s5012_s3 + $0x1d0] sm:$0xff]  }
  0x49   : > { %3091 = vmatprep.subr.bf16.mxu1 %v3546_v19  ;;  %v4066_v38 = vpack.c.bf16 %v614_v63, %v612_v54  ;;  %v3561_v19 = vld [vmem:[%s5012_s3 + $0x108] sm:$0xff]   ;;  %v711_v52 = vrot.slane %v3833_v39, 2  ;;  %v322_v55 = vmul.f32 %v2821_v28, %v3731_v18  ;;  %v323_v57 = vmul.f32 %v2822_v29, %v3731_v18  ;;  %v3555_v28 = vld [vmem:[%s5012_s3 + $0x1b0] sm:$0xff]  }
  0x4a   : > { %v392_v53 = vmax.f32 %v360_v14, 0.0  ;;  %467 = vst [vmem:[#allocation2 + $0xa9] sm:$0xff] %v391_v41  ;;  %v710_v63 = vsel %vm702_vm1, %v708_v9, %v709_v13  ;;  %v2826_v29 = vunpack.c.h.bf16 %v4059_v16  ;;  %3202 = vmatpush3.bf16.msra.mxu0 %v3561_v19 }
  0x4b   : > { %1543 = vmatprep.mubr.bf16.mxu0 %v4066_v38  ;;  %v4080_v46 = vld [vmem:[#allocation2 + $0x78] sm:$0xff]  ;;  %v362_v7 = vadd.f32 %v3741_v24, %v323_v57  ;;  %v712_v41 = vsel %vm702_vm1, %v709_v13, %v711_v52  ;;  %v3558_v57 = vld [vmem:[%s5012_s3 + $0x1e8] sm:$0xff]   ;;  %3203 = vmatprep.subr.bf16.mxu0 %v3564_v15 }
  0x4c   : > { %3092 = vmatpush3.bf16.msra.mxu1 %v3547_v44  ;;  %v615_v39 = vrot.slane %v4080_v46, 1  ;;  %v361_v44 = vadd.f32 %v3741_v24, %v322_v55  ;;  %v4093_v37 = vld [vmem:[#allocation2 + $0x80] sm:$0xff]  ;;  %v4095_v54 = vld [vmem:[#allocation2 + $0x88] sm:$0x3]  ;;  %468 = vst [vmem:[#allocation2 + $0xb1] sm:$0xff] %v392_v53  ;;  %v4106_v55 = vld [vmem:[#allocation2 + $0x90] sm:$0xff]  ;;  %v324_v53 = vmul.f32 %v2825_v12, %v3731_v18  ;;  %v4131_v10 = vpack.c.bf16 %v712_v41, %v710_v63 }
  0x4d   : > { %1544 = vmatmul.mubr.bf16.gmra.mxu0 %v4050_v56  ;;  %3301 = vmatprep.subr.bf16.mxu1 %v3548_v60  ;;  %v616_v30 = vrot.slane %v4093_v37, 1  ;;  %v618_v14 = vrot.slane %v4095_v54, 1  ;;  %v4114_v16 = vpack.c.bf16 %v4093_v37, %v4080_v46  ;;  %v4116_v19 = vld [vmem:[#allocation2 + $0x98] sm:$0xff]  ;;  %v620_v13 = vrot.slane %v4106_v55, 1  ;;  %v3559_v63 = vld [vmem:[%s5012_s3 + $0x1a8] sm:$0xff]  }
  0x4e   : > { %v393_v9 = vmax.f32 %v361_v44, 0.0  ;;  %v394_v52 = vmax.f32 %v362_v7, 0.0  ;;  %v621_v60 = vrot.slane %v4116_v19, 1  ;;  %v325_v7 = vmul.f32 %v2826_v29, %v3731_v18 }
  0x4f   : > { %1673 = vmatmul.mubr.bf16.vlgmr.msra.gmra.mxu1 %v851_v43  ;;  %v4118_v43 = vld [vmem:[#allocation2 + $0xa0] sm:$0x3]  ;;  %v617_v44 = vsel %vm589_vm0, %v615_v39, %v616_v30  ;;  %v619_v15 = vsel %vm589_vm0, %v616_v30, %v618_v14  ;;  %v363_v12 = vadd.f32 %v3741_v24, %v324_v53  ;;  %v714_v14 = vrot.slane %v3892_v25, 2 }
  0x50   : > { %3302 = vmatpush3.bf16.msra.mxu1 %v3549_v62  ;;  %1680 = vmatprep.mubr.bf16.mxu1 %v3913_v40  ;;  %v3565_v62 = vld [vmem:[%s5012_s3 + $0x100] sm:$0xff]   ;;  %v623_v11 = vrot.slane %v4118_v43, 1  ;;  %469 = vst [vmem:[#allocation2 + $0xc1] sm:$0xff] %v393_v9  ;;  %v4129_v4 = vpack.c.bf16 %v619_v15, %v617_v44  ;;  %470 = vst [vmem:[#allocation2 + $0xc9] sm:$0xff] %v394_v52  ;;  %v622_v39 = vsel %vm589_vm0, %v620_v13, %v621_v60 }
  0x51   : > { %3303 = vmatprep.subr.bf16.mxu1 %v3553_v33  ;;  %3204 = vmatpush3.bf16.msra.mxu0 %v3565_v62  ;;  %v716_v33 = vrot.slane %v3894_v26, 2  ;;  %v4140_v9 = vld [vmem:[#allocation2 + $0xa8] sm:$0xff]  ;;  %v364_v13 = vadd.f32 %v3741_v24, %v325_v7  ;;  %v3562_v25 = vld [vmem:[%s5012_s3 + $0x1e0] sm:$0xff]   ;;  %v4156_v26 = vld [vmem:[%s5012_s3 + $0x238] sm:$0xff]   ;;  %v2830_v53 = vunpack.c.h.bf16 %v2943_v20 }
  0x52   : > { %5048 = vst [vmem:[#allocation13_spill] sm:$0xff] %v4129_v4  ;;  %v624_v30 = vsel %vm589_vm0, %v621_v60, %v623_v11  ;;  %1551 = vmatprep.mubr.bf16.mxu0 %v4129_v4  ;;  %v625_v41 = vrot.slane %v4140_v9, 1  ;;  %v395_v11 = vmax.f32 %v363_v12, 0.0  ;;  %v3563_v7 = vld [vmem:[%s5012_s3 + $0x1a0] sm:$0xff]   ;;  %3437 = vmatprep.subr.bf16.mxu0 %v4156_v26 }
  0x53   : > { %v4146_v29 = vpack.c.bf16 %v624_v30, %v622_v39  ;;  %v4159_v60 = vld [vmem:[#allocation2 + $0xb0] sm:$0xff]  ;;  %v4161_v52 = vld [vmem:[#allocation2 + $0xb8] sm:$0x3]  ;;  %v396_v15 = vmax.f32 %v364_v13, 0.0  ;;  %v717_v12 = vsel %vm702_vm1, %v714_v14, %v716_v33  ;;  %v327_v30 = vmul.f32 %v2830_v53, %v3731_v18 }
  0x54   : > { %3304 = vmatpush3.bf16.msra.mxu1 %v3555_v28  ;;  %v2829_v28 = vunpack.c.l.bf16 %v2943_v20  ;;  %v626_v62 = vrot.slane %v4159_v60, 1  ;;  %v628_v44 = vrot.slane %v4161_v52, 1  ;;  %471 = vst [vmem:[#allocation2 + $0xd9] sm:$0xff] %v395_v11  ;;  %v2944_v13 = vld [vmem:[%s3712_s16 + $0x50] sm:$0xff]  }
  0x55   : > { %5049 = vst [vmem:[#allocation14_spill] sm:$0xff] %v4146_v29  ;;  %1552 = vmatmul.mubr.bf16.gmra.mxu0 %v4114_v16  ;;  %3305 = vmatprep.subr.bf16.mxu1 %v3558_v57  ;;  %v5050_v57 = vrot.slane %v3890_v23, 2  ;;  %472 = vst [vmem:[#allocation2 + $0xe1] sm:$0xff] %v396_v15  ;;  %v2834_v4 = vunpack.c.h.bf16 %v2944_v13 }
  0x56   : > { %1559 = vmatprep.mubr.bf16.mxu0 %v4146_v29  ;;  %v326_v39 = vmul.f32 %v2829_v28, %v3731_v18  ;;  %v627_v11 = vsel %vm589_vm0, %v625_v41, %v626_v62  ;;  %v629_v40 = vsel %vm589_vm0, %v626_v62, %v628_v44  ;;  %v719_v29 = vrot.slane %v3949_v2, 2 }
  0x57   : > { %1681 = vmatmul.mubr.bf16.gmra.mxu1 %v4131_v10  ;;  %v715_v20 = vsel %vm702_vm1, %v5050_v57, %v714_v14  ;;  %v4183_v23 = vld [vmem:[#allocation2 + $0xc0] sm:$0xff]  ;;  %v3566_v14 = vld [vmem:[%s5012_s3 + $0x1d8] sm:$0xff]   ;;  %v4190_v18 = vpack.c.bf16 %v4116_v19, %v4106_v55  ;;  %v4192_v33 = vld [vmem:[#allocation2 + $0xc8] sm:$0xff]  ;;  %v366_v28 = vadd.f32 %v3741_v24, %v327_v30 }
  0x58   : > { %1688 = vmatprep.mubr.bf16.mxu1 %v3985_v45  ;;  %3306 = vmatpush3.bf16.msra.mxu1 %v3559_v63  ;;  %v4194_v41 = vld [vmem:[#allocation2 + $0xd0] sm:$0x3]  ;;  %v630_v59 = vrot.slane %v4183_v23, 1  ;;  %v365_v2 = vadd.f32 %v3741_v24, %v326_v39  ;;  %v4199_v63 = vpack.c.bf16 %v629_v40, %v627_v11  ;;  %v631_v53 = vrot.slane %v4192_v33, 1  ;;  %v3568_v24 = vld [vmem:[%s5012_s3 + $0x198] sm:$0xff]  }
  0x59   : > { %3307 = vmatprep.subr.bf16.mxu1 %v3562_v25  ;;  %v633_v62 = vrot.slane %v4194_v41, 1  ;;  %v4203_v44 = vpack.c.bf16 %v717_v12, %v715_v20  ;;  %v398_v57 = vmax.f32 %v366_v28, 0.0  ;;  %v2833_v45 = vunpack.c.l.bf16 %v2944_v13  ;;  %v4215_v25 = vld [vmem:[%s5010_s1] ss:$0 sm:$0xff]  ;;  %v3571_v13 = vld [vmem:[%s5012_s3 + $0x190] sm:$0xff]  }
  0x5a   : > { %5051 = vst [vmem:[#allocation15_spill] sm:$0xff] %v4199_v63  ;;  %v397_v15 = vmax.f32 %v365_v2, 0.0  ;;  %v723_v12 = vrot.slane %v4028_v22, 2  ;;  %v724_v39 = vrot.slane %v4034_v50, 2  ;;  %v329_v30 = vmul.f32 %v4215_v25, %v2834_v4  ;;  %v4240_v4 = vld [vmem:[%s5011_s2] ss:$0 sm:$0xff] }
  0x5b   : > { %v4210_v40 = vld [vmem:[#allocation2 + $0xd8] sm:$0xff]  ;;  %474 = vst [vmem:[#allocation2 + $0xf9] sm:$0xff] %v398_v57  ;;  %v328_v20 = vmul.f32 %v4215_v25, %v2833_v45  ;;  %v632_v45 = vsel %vm589_vm0, %v630_v59, %v631_v53  ;;  %v634_v11 = vsel %vm589_vm0, %v631_v53, %v633_v62  ;;  %v3572_v50 = vld [vmem:[%s5012_s3 + $0x1c8] sm:$0xff]   ;;  %v722_v59 = vsel %vm702_vm1, %v719_v29, %v721_v58 }
  0x5c   : > { %3308 = vmatpush3.bf16.msra.mxu1 %v3563_v7  ;;  %473 = vst [vmem:[#allocation2 + $0xf1] sm:$0xff] %v397_v15  ;;  %v720_v7 = vsel %vm702_vm1, %v718_v8, %v719_v29  ;;  %v4233_v2 = vld [vmem:[#allocation2 + $0xe0] sm:$0xff]  ;;  %v4235_v8 = vld [vmem:[#allocation2 + $0xe8] sm:$0x3]  ;;  %v368_v53 = vadd.f32 %v4240_v4, %v329_v30  ;;  %v4253_v62 = vpack.c.bf16 %v4159_v60, %v4140_v9  ;;  %v728_v58 = vrot.slane %v4080_v46, 2 }
  0x5d   : > { %1560 = vmatmul.mubr.bf16.gmra.mxu0 %v4190_v18  ;;  %3309 = vmatprep.subr.bf16.mxu1 %v3566_v14  ;;  %v726_v14 = vrot.slane %v4036_v21, 2  ;;  %v367_v22 = vadd.f32 %v4240_v4, %v328_v20  ;;  %v635_v21 = vrot.slane %v4210_v40, 1  ;;  %v636_v28 = vrot.slane %v4233_v2, 1  ;;  %v3574_v46 = vld [vmem:[%s5012_s3 + $0x188] sm:$0xff]  }
  0x5e   : > { %1567 = vmatprep.mubr.bf16.mxu0 %v4199_v63  ;;  %v638_v15 = vrot.slane %v4235_v8, 1  ;;  %v4256_v20 = vpack.c.bf16 %v634_v11, %v632_v45  ;;  %v4258_v63 = vpack.c.bf16 %v722_v59, %v720_v7  ;;  %v729_v29 = vrot.slane %v4093_v37, 2  ;;  %v2949_v7 = vld [vmem:[%s3712_s16 + $0x78] sm:$0xff]  }
  0x5f   : > { %1689 = vmatmul.mubr.bf16.gmra.mxu1 %v4203_v44  ;;  %v399_v57 = vmax.f32 %v367_v22, 0.0  ;;  %v725_v30 = vsel %vm702_vm1, %v723_v12, %v724_v39  ;;  %v727_v6 = vsel %vm702_vm1, %v724_v39, %v726_v14  ;;  %v764_v45 = vrot.slane %v3787_v1, 2  ;;  %v3577_v1 = vld [vmem:[%s5012_s3 + $0x180] sm:$0xff]  }
  0x60   : > { %1696 = vmatprep.mubr.bf16.mxu1 %v4050_v56  ;;  %3310 = vmatpush3.bf16.msra.mxu1 %v3568_v24  ;;  %v400_v56 = vmax.f32 %v368_v53, 0.0  ;;  %v731_v24 = vrot.slane %v4095_v54, 2  ;;  %v637_v37 = vsel %vm589_vm0, %v635_v21, %v636_v28  ;;  %v639_v54 = vsel %vm589_vm0, %v636_v28, %v638_v15 }
  0x61   : > { %3311 = vmatprep.subr.bf16.mxu1 %v3569_v5  ;;  %475 = vst [vmem:[#allocation2 + $0x109] sm:$0xff] %v399_v57  ;;  %v763_v5 = vrot.slane %v3785_v0, 2  ;;  %v4284_v12 = vpack.c.bf16 %v727_v6, %v725_v30  ;;  %v730_v39 = vsel %vm702_vm1, %v728_v58, %v729_v29  ;;  %v4293_v14 = vpack.c.bf16 %v4192_v33, %v4183_v23 }
  0x62   : > { %476 = vst [vmem:[#allocation2 + $0x111] sm:$0xff] %v400_v56  ;;  %v3575_v56 = vld [vmem:[%s5012_s3 + $0x1c0] sm:$0xff]   ;;  %v4295_v22 = vpack.c.bf16 %v639_v54, %v637_v37  ;;  %v766_v6 = vrot.slane %v3789_v3, 2  ;;  %v768_v21 = vrot.slane %v3840_v47, 2  ;;  %v769_v28 = vrot.slane %v3842_v48, 2 }
  0x63   : > { %v4278_v0 = vld [vmem:[#allocation2 + $0xf0] sm:$0xff]  ;;  %v4288_v11 = vld [vmem:[#allocation2 + $0x100] sm:$0x3]  ;;  %v765_v59 = vsel %vm702_vm1, %v763_v5, %v764_v45  ;;  %v771_v53 = vrot.slane %v3848_v51, 2  ;;  %v2853_v15 = vunpack.c.l.bf16 %v2949_v7  ;;  %v2854_v48 = vunpack.c.h.bf16 %v2949_v7 }
  0x64   : > { %3312 = vmatpush3.bf16.msra.mxu1 %v3571_v13  ;;  %v732_v13 = vsel %vm702_vm1, %v729_v29, %v731_v24  ;;  %v640_v57 = vrot.slane %v4278_v0, 1  ;;  %v767_v58 = vsel %vm702_vm1, %v764_v45, %v766_v6  ;;  %v773_v29 = vrot.slane %v3900_v31, 2 }
  0x65   : > { %1568 = vmatmul.mubr.bf16.gmra.mxu0 %v4253_v62  ;;  %3313 = vmatprep.subr.bf16.mxu1 %v3572_v50  ;;  %v4297_v50 = vld [vmem:[#allocation2 + $0xf8] sm:$0xff]  ;;  %v774_v24 = vrot.slane %v3902_v32, 2  ;;  %v643_v3 = vrot.slane %v4288_v11, 1  ;;  %v4310_v5 = vpack.c.bf16 %v767_v58, %v765_v59  ;;  %v770_v47 = vsel %vm702_vm1, %v768_v21, %v769_v28 }
  0x66   : > { %1575 = vmatprep.mubr.bf16.mxu0 %v4256_v20  ;;  %v641_v30 = vrot.slane %v4297_v50, 1  ;;  %v772_v51 = vsel %vm702_vm1, %v769_v28, %v771_v53  ;;  %v776_v31 = vrot.slane %v3907_v34, 2  ;;  %v4318_v32 = vpack.c.bf16 %v732_v13, %v730_v39 }
  0x67   : > { %1697 = vmatmul.mubr.bf16.gmra.mxu1 %v4258_v63  ;;  %v775_v45 = vsel %vm702_vm1, %v773_v29, %v774_v24  ;;  %v338_v34 = vmul.f32 %v4215_v25, %v2853_v15  ;;  %v733_v39 = vrot.slane %v4106_v55, 2  ;;  %v339_v6 = vmul.f32 %v4215_v25, %v2854_v48 }
  0x68   : > { %1704 = vmatprep.mubr.bf16.mxu1 %v4114_v16  ;;  %3314 = vmatpush3.bf16.msra.mxu1 %v3574_v46  ;;  %v4320_v46 = vpack.c.bf16 %v772_v51, %v770_v47  ;;  %v642_v37 = vsel %vm589_vm0, %v640_v57, %v641_v30  ;;  %v644_v54 = vsel %vm589_vm0, %v641_v30, %v643_v3  ;;  %v778_v21 = vrot.slane %v3968_v27, 2 }
  0x69   : > { %3315 = vmatprep.subr.bf16.mxu1 %v3575_v56  ;;  %v4325_v56 = vld [vmem:[#allocation2 + $0x108] sm:$0xff]  ;;  %v4327_v7 = vld [vmem:[#allocation2 + $0x110] sm:$0xff]  ;;  %v4333_v13 = vld [vmem:[#allocation2 + $0x118] sm:$0x3]  ;;  %v4341_v28 = vpack.c.bf16 %v4233_v2, %v4210_v40  ;;  %v377_v53 = vadd.f32 %v4240_v4, %v338_v34  ;;  %v779_v15 = vrot.slane %v3974_v35, 2  ;;  %v781_v57 = vrot.slane %v3976_v36, 2 }
  0x6a   : > { %v4346_v58 = vpack.c.bf16 %v644_v54, %v642_v37  ;;  %v645_v55 = vrot.slane %v4325_v56, 1  ;;  %v646_v29 = vrot.slane %v4327_v7, 1  ;;  %v378_v25 = vadd.f32 %v4240_v4, %v339_v6 }
  0x6b   : > { %v648_v27 = vrot.slane %v4333_v13, 1  ;;  %v780_v30 = vsel %vm702_vm1, %v778_v21, %v779_v15  ;;  %v782_v3 = vsel %vm702_vm1, %v779_v15, %v781_v57  ;;  %v734_v47 = vrot.slane %v4116_v19, 2 }
  0x6c   : > { %3316 = vmatpush3.bf16.msra.mxu1 %v3577_v1  ;;  %v777_v1 = vsel %vm702_vm1, %v774_v24, %v776_v31  ;;  %v409_v24 = vmax.f32 %v377_v53, 0.0  ;;  %v736_v35 = vrot.slane %v4118_v43, 2  ;;  %v410_v36 = vmax.f32 %v378_v25, 0.0 }
  0x6d   : > { %1576 = vmatmul.mubr.bf16.gmra.mxu0 %v4293_v14  ;;  %v4335_v59 = vpack.c.bf16 %v777_v1, %v775_v45  ;;  %v4356_v48 = vpack.c.bf16 %v782_v3, %v780_v30  ;;  %v647_v4 = vsel %vm589_vm0, %v645_v55, %v646_v29  ;;  %v649_v51 = vsel %vm589_vm0, %v646_v29, %v648_v27 }
  0x6e   : > { %1583 = vmatprep.mubr.bf16.mxu0 %v4295_v22  ;;  %485 = vst [vmem:[#allocation2 + $0x181] sm:$0xff] %v409_v24  ;;  %486 = vst [vmem:[#allocation2 + $0x189] sm:$0xff] %v410_v36  ;;  %v735_v19 = vsel %vm702_vm1, %v733_v39, %v734_v47  ;;  %v737_v43 = vsel %vm702_vm1, %v734_v47, %v736_v35  ;;  %v4368_v45 = vpack.c.bf16 %v4297_v50, %v4278_v0 }
  0x6f   : > { %1705 = vmatmul.mubr.bf16.gmra.mxu1 %v4284_v12  ;;  %v4370_v31 = vpack.c.bf16 %v649_v51, %v647_v4  ;;  %v4372_v37 = vpack.c.bf16 %v737_v43, %v735_v19  ;;  %v738_v54 = vrot.slane %v4140_v9, 2  ;;  %v739_v1 = vrot.slane %v4159_v60, 2  ;;  %v3573_v4 = vld [vmem:[%s5012_s3 + $0x228] sm:$0xff]   ;;  %v3578_v43 = vld [vmem:[%s5012_s3 + $0x218] sm:$0xff]  }
  0x70   : > { %1712 = vmatprep.mubr.bf16.mxu1 %v4190_v18  ;;  %v741_v34 = vrot.slane %v4161_v52, 2  ;;  %v4393_v15 = vpack.c.bf16 %v4327_v7, %v4325_v56  ;;  %v743_v29 = vrot.slane %v4183_v23, 2  ;;  %v744_v25 = vrot.slane %v4192_v33, 2 }
  0x71   : > { %v740_v21 = vsel %vm702_vm1, %v738_v54, %v739_v1  ;;  %v746_v27 = vrot.slane %v4194_v41, 2  ;;  %v3570_v41 = vld [vmem:[%s5012_s3 + $0x230] sm:$0xff]   ;;  %v748_v35 = vrot.slane %v4210_v40, 2  ;;  %v749_v36 = vrot.slane %v4233_v2, 2 }
  0x72   : > { %v742_v9 = vsel %vm702_vm1, %v739_v1, %v741_v34  ;;  %v745_v23 = vsel %vm702_vm1, %v743_v29, %v744_v25  ;;  %v754_v51 = vrot.slane %v4297_v50, 2  ;;  %v756_v19 = vrot.slane %v4288_v11, 2  ;;  %v3579_v54 = vld [vmem:[%s5012_s3 + $0x210] sm:$0xff]  }
  0x73   : > { %v4396_v55 = vpack.c.bf16 %v742_v9, %v740_v21  ;;  %v747_v33 = vsel %vm702_vm1, %v744_v25, %v746_v27  ;;  %v750_v40 = vsel %vm702_vm1, %v748_v35, %v749_v36  ;;  %v758_v1 = vrot.slane %v4325_v56, 2  ;;  %v3580_v9 = vld [vmem:[%s5012_s3 + $0x208] sm:$0xff]   ;;  %v5054_v29 = vld [vmem:[#allocation7_spill] sm:$0xff] }
  0x74   : > { %v4411_v47 = vpack.c.bf16 %v747_v33, %v745_v23  ;;  %v757_v50 = vsel %vm702_vm1, %v754_v51, %v756_v19  ;;  %v759_v34 = vrot.slane %v4327_v7, 2  ;;  %v761_v21 = vrot.slane %v4333_v13, 2  ;;  %v5055_v25 = vld [vmem:[#allocation14_spill] sm:$0xff]  ;;  %v5059_v33 = vld [vmem:[#allocation9_spill] sm:$0xff] }
  0x75   : > { %1584 = vmatmul.mubr.bf16.gmra.mxu0 %v4341_v28  ;;  %v4380_v39 = vld [vmem:[#allocation2 + $0x180] sm:$0xff]  ;;  %v4382_v6 = vld [vmem:[#allocation2 + $0x188] sm:$0xff]  ;;  %v4389_v53 = vld [vmem:[#allocation2 + $0x190] sm:$0x3] }
  0x76   : > { %1591 = vmatprep.mubr.bf16.mxu0 %v4346_v58  ;;  %v818_v60 = vrot.slane %v4380_v39, 1  ;;  %v819_v52 = vrot.slane %v4382_v6, 1  ;;  %v821_v57 = vrot.slane %v4389_v53, 1  ;;  %v760_v56 = vsel %vm702_vm1, %v758_v1, %v759_v34  ;;  %v5056_v27 = vld [vmem:[#allocation10_spill] sm:$0xff]  ;;  %v5063_v1 = vld [vmem:[#allocation8_spill] sm:$0xff] }
  0x77   : > { %1713 = vmatmul.mubr.bf16.gmra.mxu1 %v4318_v32  ;;  %v762_v7 = vsel %vm702_vm1, %v759_v34, %v761_v21  ;;  %v5058_v23 = vld [vmem:[#allocation6_spill] sm:$0xff]  ;;  %v826_v19 = vrot.slane %v4382_v6, 2 }
  0x78   : > { %1720 = vmatprep.mubr.bf16.mxu1 %v4253_v62  ;;  %v820_v24 = vsel %vm589_vm0, %v818_v60, %v819_v52  ;;  %v822_v30 = vsel %vm589_vm0, %v819_v52, %v821_v57  ;;  %v4463_v13 = vpack.c.bf16 %v762_v7, %v760_v56  ;;  %v3581_v60 = vld [vmem:[%s5012_s3 + $0x200] sm:$0xff]   ;;  %v5052_v52 = vld [vmem:[#allocation4_spill] sm:$0xff] }
  0x79   : > { %v4404_v3 = vpack.c.bf16 %v822_v30, %v820_v24  ;;  %v5053_v57 = vld [vmem:[#allocation13_spill] sm:$0xff]  ;;  %v4482_v24 = vpack.c.bf16 %v4382_v6, %v4380_v39  ;;  %v5057_v30 = vld [vmem:[#allocation15_spill] sm:$0xff] }
  0x7d   : > { %1592 = vmatmul.mubr.bf16.gmra.mxu0 %v4368_v45 }
  0x7e   : > { %1599 = vmatprep.mubr.bf16.mxu0 %v4370_v31 }
  0x7f   : > { %1721 = vmatmul.mubr.bf16.gmra.mxu1 %v4372_v37 }
  0x80   : > { %1728 = vmatprep.mubr.bf16.mxu1 %v4293_v14 }
  0x85   : > { %1600 = vmatmul.mubr.bf16.gmra.mxu0 %v4393_v15 }
  0x86   : > { %1833 = vmatprep.mubr.bf16.mxu0 %v4131_v10  ;;  %v751_v10 = vrot.slane %v4235_v8, 2 }
  0x87   : > { %1729 = vmatmul.mubr.bf16.gmra.mxu1 %v4396_v55 }
  0x88   : > { %1736 = vmatprep.mubr.bf16.mxu1 %v4341_v28  ;;  %v752_v2 = vsel %vm702_vm1, %v749_v36, %v751_v10  ;;  %v5062_v10 = vld [vmem:[#allocation5_spill] sm:$0xff] }
  0x89   : > { %v4429_v8 = vpack.c.bf16 %v752_v2, %v750_v40 }
  0x8d   : > { %1834 = vmatmul.mubr.bf16.vlgmr.msra.gmra.mxu0 %v3864_v61  ;;  %v3576_v61 = vld [vmem:[%s5012_s3 + $0x220] sm:$0xff]  }
  0x8e   : > { %3438 = vmatpush3.bf16.msra.mxu0 %v4156_v26  ;;  %1841 = vmatprep.mubr.bf16.mxu0 %v4203_v44  ;;  %v753_v26 = vrot.slane %v4278_v0, 2 }
  0x8f   : > { %1737 = vmatmul.mubr.bf16.gmra.mxu1 %v4411_v47  ;;  %3439 = vmatprep.subr.bf16.mxu0 %v3570_v41 }
  0x90   : > { %1744 = vmatprep.mubr.bf16.mxu1 %v4368_v45  ;;  %v755_v0 = vsel %vm702_vm1, %v753_v26, %v754_v51  ;;  %v825_v51 = vrot.slane %v4380_v39, 2 }
  0x91   : > { %v4446_v11 = vpack.c.bf16 %v757_v50, %v755_v0 }
  0x92   : > { %3440 = vmatpush3.bf16.msra.mxu0 %v3570_v41  ;;  %v5061_v41 = vld [vmem:[#allocation3_spill] sm:$0xff]  ;;  %v827_v21 = vsel %vm702_vm1, %v825_v51, %v826_v19 }
  0x93   : > { %3441 = vmatprep.subr.bf16.mxu0 %v3573_v4 }
  0x95   : > { %1842 = vmatmul.mubr.bf16.gmra.mxu0 %v3923_v49 }
  0x96   : > { %1849 = vmatprep.mubr.bf16.mxu0 %v4258_v63  ;;  %3442 = vmatpush3.bf16.msra.mxu0 %v3573_v4 }
  0x97   : > { %1745 = vmatmul.mubr.bf16.gmra.mxu1 %v4429_v8  ;;  %3443 = vmatprep.subr.bf16.mxu0 %v3576_v61 }
  0x98   : > { %1752 = vmatprep.mubr.bf16.mxu1 %v4393_v15 }
  0x9a   : > { %3444 = vmatpush3.bf16.msra.mxu0 %v3576_v61 }
  0x9b   : > { %3445 = vmatprep.subr.bf16.mxu0 %v3578_v43 }
  0x9d   : > { %1850 = vmatmul.mubr.bf16.gmra.mxu0 %v3979_v42 }
  0x9e   : > { %1857 = vmatprep.mubr.bf16.mxu0 %v4284_v12  ;;  %3446 = vmatpush3.bf16.msra.mxu0 %v3578_v43  ;;  %v828_v43 = vrot.slane %v4389_v53, 2 }
  0x9f   : > { %1753 = vmatmul.mubr.bf16.gmra.mxu1 %v4446_v11  ;;  %3447 = vmatprep.subr.bf16.mxu0 %v3579_v54 }
  0xa0   : > { %1760 = vmatprep.mubr.bf16.mxu1 %v3805_v17  ;;  %v829_v39 = vsel %vm702_vm1, %v826_v19, %v828_v43 }
  0xa1   : > { %v4533_v7 = vpack.c.bf16 %v829_v39, %v827_v21 }
  0xa2   : > { %3448 = vmatpush3.bf16.msra.mxu0 %v3579_v54 }
  0xa3   : > { %3449 = vmatprep.subr.bf16.mxu0 %v3580_v9 }
  0xa5   : > { %1858 = vmatmul.mubr.bf16.gmra.mxu0 %v4066_v38 }
  0xa6   : > { %1865 = vmatprep.mubr.bf16.mxu0 %v4318_v32  ;;  %3450 = vmatpush3.bf16.msra.mxu0 %v3580_v9 }
  0xa7   : > { %1761 = vmatmul.mubr.bf16.gmra.mxu1 %v4463_v13  ;;  %3451 = vmatprep.subr.bf16.mxu0 %v3581_v60 }
  0xa8   : > { %1768 = vmatprep.mubr.bf16.mxu1 %v5052_v52 }
  0xaa   : > { %3452 = vmatpush3.bf16.msra.mxu0 %v3581_v60 }
  0xad   : > { %1866 = vmatmul.mubr.bf16.gmra.mxu0 %v5053_v57 }
  0xae   : > { %1873 = vmatprep.mubr.bf16.mxu0 %v4372_v37 }
  0xaf   : > { %1769 = vmatmul.mubr.bf16.gmra.mxu1 %v4310_v5 }
  0xb0   : > { %1776 = vmatprep.mubr.bf16.mxu1 %v5054_v29 }
  0xb5   : > { %1874 = vmatmul.mubr.bf16.gmra.mxu0 %v5055_v25 }
  0xb6   : > { %1881 = vmatprep.mubr.bf16.mxu0 %v4396_v55 }
  0xb7   : > { %1777 = vmatmul.mubr.bf16.gmra.mxu1 %v4320_v46 }
  0xb8   : > { %1784 = vmatprep.mubr.bf16.mxu1 %v5056_v27 }
  0xbd   : > { %1882 = vmatmul.mubr.bf16.gmra.mxu0 %v5057_v30 }
  0xbe   : > { %1889 = vmatprep.mubr.bf16.mxu0 %v4411_v47 }
  0xbf   : > { %1785 = vmatmul.mubr.bf16.gmra.mxu1 %v4335_v59 }
  0xc0   : > { %1792 = vmatprep.mubr.bf16.mxu1 %v4482_v24 }
  0xc5   : > { %1890 = vmatmul.mubr.bf16.gmra.mxu0 %v4256_v20 }
  0xc6   : > { %1897 = vmatprep.mubr.bf16.mxu0 %v4429_v8 }
  0xc7   : > { %1793 = vmatmul.mubr.bf16.gmra.mxu1 %v4356_v48 }
  0xc8   : > { %1994 = vmatprep.mubr.bf16.mxu1 %v3923_v49  ;;  %v5060_v49 = vld [vmem:[#allocation12_spill] sm:$0xff] }
  0xcd   : > { %1898 = vmatmul.mubr.bf16.gmra.mxu0 %v4295_v22 }
  0xce   : > { %1905 = vmatprep.mubr.bf16.mxu0 %v4446_v11 }
  0xcf   : > { %1995 = vmatmul.mubr.bf16.vlgmr.msra.gmra.mxu1 %v5058_v23  ;;  %v5064_v23 = vld [vmem:[#allocation11_spill] sm:$0xff] }
  0xd0   : > { %2002 = vmatprep.mubr.bf16.mxu1 %v3979_v42 }
  0xd5   : > { %1906 = vmatmul.mubr.bf16.gmra.mxu0 %v4346_v58 }
  0xd6   : > { %1913 = vmatprep.mubr.bf16.mxu0 %v4463_v13 }
  0xd7   : > { %2003 = vmatmul.mubr.bf16.gmra.mxu1 %v5059_v33 }
  0xd8   : > { %2010 = vmatprep.mubr.bf16.mxu1 %v4066_v38 }
  0xdd   : > { %1914 = vmatmul.mubr.bf16.gmra.mxu0 %v4370_v31 }
  0xde   : > { %1921 = vmatprep.mubr.bf16.mxu0 %v4310_v5 }
  0xdf   : > { %2011 = vmatmul.mubr.bf16.gmra.mxu1 %v5060_v49 }
  0xe0   : > { %2018 = vmatprep.mubr.bf16.mxu1 %v5053_v57 }
  0xe5   : > { %1922 = vmatmul.mubr.bf16.gmra.mxu0 %v5061_v41 }
  0xe6   : > { %1929 = vmatprep.mubr.bf16.mxu0 %v4320_v46 }
  0xe7   : > { %2019 = vmatmul.mubr.bf16.gmra.mxu1 %v4114_v16 }
  0xe8   : > { %2026 = vmatprep.mubr.bf16.mxu1 %v5055_v25 }
  0xed   : > { %v2981_v42 = vpop.f32.mrf.mxu0  ;;  %1930 = vmatmul.mubr.bf16.gmra.mxu0 %v5062_v10 }
  0xee   : > { %1937 = vmatprep.mubr.bf16.mxu0 %v4335_v59 }
  0xef   : > { %v2982_v35 = vpop.f32.mrf.mxu0  ;;  %v3053_v4 = vpop.f32.mrf.mxu1  ;;  %2027 = vmatmul.mubr.bf16.gmra.mxu1 %v4190_v18 }
  0xf0   : > { %v4508_v36 = vadd.f32 %v2982_v35, %v2981_v42  ;;  %2034 = vmatprep.mubr.bf16.mxu1 %v5057_v30 }
  0xf1   : > { %v2984_v38 = vpop.f32.mrf.mxu0  ;;  %v3054_v61 = vpop.f32.mrf.mxu1 }
  0xf2   : > { %v4516_v16 = vadd.f32 %v3054_v61, %v3053_v4 }
  0xf3   : > { %v2985_v40 = vpop.f32.mrf.mxu0  ;;  %v3056_v26 = vpop.f32.mrf.mxu1 }
  0xf4   : > { %v4513_v2 = vadd.f32 %v2985_v40, %v2984_v38 }
  0xf5   : > { %v3057_v0 = vpop.f32.mrf.mxu1  ;;  %v2987_v54 = vpop.f32.mrf.mxu0  ;;  %1938 = vmatmul.mubr.bf16.gmra.mxu0 %v5063_v1 }
  0xf6   : > { %v4521_v50 = vadd.f32 %v3057_v0, %v3056_v26  ;;  %1945 = vmatprep.mubr.bf16.mxu0 %v4356_v48 }
  0xf7   : > { %v3059_v18 = vpop.f32.mrf.mxu1  ;;  %2035 = vmatmul.mubr.bf16.gmra.mxu1 %v4253_v62  ;;  %v2988_v34 = vpop.f32.mrf.mxu0 }
  0xf8   : > { %v4528_v9 = vadd.f32 %v2988_v34, %v2987_v54  ;;  %2042 = vmatprep.mubr.bf16.mxu1 %v4256_v20 }
  0xf9   : > { %v3060_v6 = vpop.f32.mrf.mxu1  ;;  %v2990_v53 = vpop.f32.mrf.mxu0 }
  0xfa   : > { %v4531_v56 = vadd.f32 %v3060_v6, %v3059_v18 }
  0xfb   : > { %v3062_v60 = vpop.f32.mrf.mxu1  ;;  %v2991_v57 = vpop.f32.mrf.mxu0 }
  0xfc   : > { %v4535_v25 = vadd.f32 %v2991_v57, %v2990_v53 }
  0xfd   : > { %v3063_v62 = vpop.f32.mrf.mxu1  ;;  %v2993_v30 = vpop.f32.mrf.mxu0  ;;  %1946 = vmatmul.mubr.bf16.gmra.mxu0 %v5064_v23 }
  0xfe   : > { %v4538_v33 = vadd.f32 %v3063_v62, %v3062_v60  ;;  %1953 = vmatprep.mubr.bf16.mxu0 %v4533_v7 }
  0xff   : > { %v3065_v49 = vpop.f32.mrf.mxu1  ;;  %2043 = vmatmul.mubr.bf16.gmra.mxu1 %v4293_v14  ;;  %v2994_v20 = vpop.f32.mrf.mxu0 }
 0x100   : > { %v4542_v42 = vadd.f32 %v2994_v20, %v2993_v30  ;;  %2050 = vmatprep.mubr.bf16.mxu1 %v4295_v22 }
 0x101   : > { %v3066_v35 = vpop.f32.mrf.mxu1  ;;  %v2996_v38 = vpop.f32.mrf.mxu0 }
 0x102   : > { %v4545_v4 = vadd.f32 %v3066_v35, %v3065_v49 }
 0x103   : > { %v3068_v40 = vpop.f32.mrf.mxu1  ;;  %v2997_v61 = vpop.f32.mrf.mxu0 }
 0x104   : > { %v4547_v26 = vadd.f32 %v2997_v61, %v2996_v38 }
 0x105   : > { %v3069_v51 = vpop.f32.mrf.mxu1  ;;  %v2999_v19 = vpop.f32.mrf.mxu0  ;;  %1954 = vmatmul.mubr.bf16.gmra.mxu0 %v4404_v3 }
 0x106   : > { %v4550_v43 = vadd.f32 %v3069_v51, %v3068_v40  ;;  %3453 = vmatprep.mubr.bf16.mxu0 %v4203_v44 }
 0x107   : > { %v3071_v14 = vpop.f32.mrf.mxu1  ;;  %2051 = vmatmul.mubr.bf16.gmra.mxu1 %v4341_v28  ;;  %v3000_v22 = vpop.f32.mrf.mxu0 }
 0x108   : > { %v4554_v0 = vadd.f32 %v3000_v22, %v2999_v19  ;;  %2058 = vmatprep.mubr.bf16.mxu1 %v4346_v58 }
 0x109   : > { %v3072_v54 = vpop.f32.mrf.mxu1  ;;  %v3002_v18 = vpop.f32.mrf.mxu0 }
 0x10a   : > { %v4557_v34 = vadd.f32 %v3072_v54, %v3071_v14 }
 0x10b   : > { %v3074_v21 = vpop.f32.mrf.mxu1  ;;  %v3003_v39 = vpop.f32.mrf.mxu0 }
 0x10c   : > { %v4559_v6 = vadd.f32 %v3003_v39, %v3002_v18 }
 0x10d   : > { %v3075_v53 = vpop.f32.mrf.mxu1  ;;  %v3005_v60 = vpop.f32.mrf.mxu0  ;;  %3454 = vmatmul.mubr.bf16.vlgmr.msra.gmra.mxu0 %v4258_v63 }
 0x10e   : > { %v4562_v44 = vadd.f32 %v3075_v53, %v3074_v21  ;;  %3457 = vmatprep.mubr.bf16.mxu0 %v4284_v12 }
 0x10f   : > { %v3093_v28 = vpop.f32.mrf.mxu1  ;;  %2059 = vmatmul.mubr.bf16.gmra.mxu1 %v4368_v45  ;;  %v3006_v58 = vpop.f32.mrf.mxu0 }
 0x110   : > { %v4566_v57 = vadd.f32 %v3006_v58, %v3005_v60  ;;  %2066 = vmatprep.mubr.bf16.mxu1 %v4370_v31 }
 0x111   : > { %v3094_v62 = vpop.f32.mrf.mxu1  ;;  %v3008_v30 = vpop.f32.mrf.mxu0 }
 0x112   : > { %v3095_v49 = vadd.f32 %v3094_v62, %v3093_v28 }
 0x113   : > { %v3096_v20 = vpop.f32.mrf.mxu1  ;;  %v3009_v35 = vpop.f32.mrf.mxu0 }
 0x114   : > { %v4570_v38 = vadd.f32 %v3095_v49, %v4508_v36  ;;  %v4572_v63 = vadd.f32 %v3009_v35, %v3008_v30 }
 0x115   : > { %v3097_v40 = vpop.f32.mrf.mxu1  ;;  %v3011_v12 = vpop.f32.mrf.mxu0  ;;  %3458 = vmatmul.mubr.bf16.gmra.mxu0 %v4318_v32 }
 0x116   : > { %v3098_v45 = vadd.f32 %v3097_v40, %v3096_v20  ;;  %3461 = vmatprep.mubr.bf16.mxu0 %v4372_v37 }
 0x117   : > { %v3099_v61 = vpop.f32.mrf.mxu1  ;;  %2067 = vmatmul.mubr.bf16.gmra.mxu1 %v4393_v15  ;;  %v3012_v31 = vpop.f32.mrf.mxu0 }
 0x118   : > { %v4578_v51 = vadd.f32 %v3098_v45, %v4513_v2  ;;  %v4580_v19 = vadd.f32 %v3012_v31, %v3011_v12  ;;  %2074 = vmatprep.mubr.bf16.mxu1 %v5061_v41 }
 0x119   : > { %v3100_v36 = vpop.f32.mrf.mxu1  ;;  %v3014_v14 = vpop.f32.mrf.mxu0 }
 0x11a   : > { %v3101_v22 = vadd.f32 %v3100_v36, %v3099_v61 }
 0x11b   : > { %v3102_v54 = vpop.f32.mrf.mxu1  ;;  %v3015_v18 = vpop.f32.mrf.mxu0 }
 0x11c   : > { %v4584_v32 = vadd.f32 %v3101_v22, %v4528_v9  ;;  %v4586_v37 = vadd.f32 %v3015_v18, %v3014_v14 }
 0x11d   : > { %v3103_v21 = vpop.f32.mrf.mxu1  ;;  %v3017_v15 = vpop.f32.mrf.mxu0  ;;  %3462 = vmatmul.mubr.bf16.gmra.mxu0 %v4396_v55 }
 0x11e   : > { %v3104_v2 = vadd.f32 %v3103_v21, %v3102_v54  ;;  %3465 = vmatprep.mubr.bf16.mxu0 %v4411_v47 }
 0x11f   : > { %v3105_v39 = vpop.f32.mrf.mxu1  ;;  %2075 = vmatmul.mubr.bf16.gmra.mxu1 %v3805_v17  ;;  %v3018_v41 = vpop.f32.mrf.mxu0 }
 0x120   : > { %v4592_v53 = vadd.f32 %v3104_v2, %v4535_v25  ;;  %v4594_v60 = vadd.f32 %v3018_v41, %v3017_v15  ;;  %2082 = vmatprep.mubr.bf16.mxu1 %v5062_v10  ;;  %v538_v15 = vld [vmem:[#allocation2 + $0x198] sm:$0xff]  ;;  %v540_v2 = vld [vmem:[#allocation2 + $0x1a8] sm:$0x3] }
 0x121   : > { %v3106_v9 = vpop.f32.mrf.mxu1  ;;  %v3020_v28 = vpop.f32.mrf.mxu0 }
 0x122   : > { %v3107_v58 = vadd.f32 %v3106_v9, %v3105_v39 }
 0x123   : > { %v3108_v62 = vpop.f32.mrf.mxu1  ;;  %v3021_v30 = vpop.f32.mrf.mxu0 }
 0x124   : > { %v4598_v55 = vadd.f32 %v3107_v58, %v4542_v42  ;;  %v4600_v47 = vadd.f32 %v3021_v30, %v3020_v28  ;;  %v3584_v28 = vld [vmem:[#allocation2 + $0x8] sm:$0xff] }
 0x125   : > { %v3109_v49 = vpop.f32.mrf.mxu1  ;;  %v3023_v17 = vpop.f32.mrf.mxu0  ;;  %3466 = vmatmul.mubr.bf16.gmra.mxu0 %v4429_v8  ;;  %v836_v58 = vrot.slane %v3584_v28, 1 }
 0x126   : > { %v3110_v25 = vadd.f32 %v3109_v49, %v3108_v62  ;;  %3469 = vmatprep.mubr.bf16.mxu0 %v4446_v11 }
 0x127   : > { %v3111_v20 = vpop.f32.mrf.mxu1  ;;  %2083 = vmatmul.mubr.bf16.gmra.mxu1 %v5052_v52  ;;  %v3024_v10 = vpop.f32.mrf.mxu0 }
 0x128   : > { %v4606_v35 = vadd.f32 %v3110_v25, %v4547_v26  ;;  %v4608_v40 = vadd.f32 %v3024_v10, %v3023_v17  ;;  %2090 = vmatprep.mubr.bf16.mxu1 %v5063_v1 }
 0x129   : > { %v3112_v42 = vpop.f32.mrf.mxu1  ;;  %v3026_v12 = vpop.f32.mrf.mxu0 }
 0x12a   : > { %v3113_v45 = vadd.f32 %v3112_v42, %v3111_v20 }
 0x12b   : > { %v3114_v61 = vpop.f32.mrf.mxu1  ;;  %v3027_v31 = vpop.f32.mrf.mxu0 }
 0x12c   : > { %v4612_v8 = vadd.f32 %v3113_v45, %v4554_v0  ;;  %v4614_v11 = vadd.f32 %v3027_v31, %v3026_v12  ;;  %v845_v12 = vrot.slane %v540_v2, 2  ;;  %v843_v45 = vrot.slane %v3584_v28, 2 }
 0x12d   : > { %v3115_v36 = vpop.f32.mrf.mxu1  ;;  %v3029_v52 = vpop.f32.mrf.mxu0  ;;  %3470 = vmatmul.mubr.bf16.gmra.mxu0 %v4463_v13 }
 0x12e   : > { %v3116_v26 = vadd.f32 %v3115_v36, %v3114_v61  ;;  %3473 = vmatprep.mubr.bf16.mxu0 %v4310_v5 }
 0x12f   : > { %v3117_v14 = vpop.f32.mrf.mxu1  ;;  %2091 = vmatmul.mubr.bf16.gmra.mxu1 %v5054_v29  ;;  %v3030_v1 = vpop.f32.mrf.mxu0 }
 0x130   : > { %v4620_v22 = vadd.f32 %v3116_v26, %v4559_v6  ;;  %v4622_v54 = vadd.f32 %v3030_v1, %v3029_v52  ;;  %2098 = vmatprep.mubr.bf16.mxu1 %v5064_v23  ;;  %v835_v6 = vrot.slane %v538_v15, 1  ;;  %v838_v23 = vrot.slane %v540_v2, 1 }
 0x131   : > { %v3118_v0 = vpop.f32.mrf.mxu1  ;;  %v3032_v18 = vpop.f32.mrf.mxu0  ;;  %v846_v1 = vsel %vm702_vm1, %v843_v45, %v845_v12 }
 0x132   : > { %v3119_v21 = vadd.f32 %v3118_v0, %v3117_v14  ;;  %v837_v20 = vsel %vm589_vm0, %v835_v6, %v836_v58  ;;  %v839_v10 = vsel %vm589_vm0, %v836_v58, %v838_v23 }
 0x133   : > { %v3120_v13 = vpop.f32.mrf.mxu1  ;;  %v3033_v39 = vpop.f32.mrf.mxu0  ;;  %v901_v36 = vpack.c.bf16 %v839_v10, %v837_v20 }
 0x134   : > { %v4626_v5 = vadd.f32 %v3119_v21, %v4566_v57  ;;  %v4628_v41 = vadd.f32 %v3033_v39, %v3032_v18 }
 0x135   : > { %v3121_v29 = vpop.f32.mrf.mxu1  ;;  %v3035_v9 = vpop.f32.mrf.mxu0  ;;  %3474 = vmatmul.mubr.bf16.gmra.mxu0 %v4320_v46 }
 0x136   : > { %v3122_v62 = vadd.f32 %v3121_v29, %v3120_v13  ;;  %3477 = vmatprep.mubr.bf16.mxu0 %v4335_v59  ;;  %v842_v59 = vrot.slane %v538_v15, 2 }
 0x137   : > { %v3123_v30 = vpop.f32.mrf.mxu1  ;;  %2099 = vmatmul.mubr.bf16.gmra.mxu1 %v5056_v27  ;;  %v3036_v49 = vpop.f32.mrf.mxu0 }
 0x138   : > { %v4634_v57 = vadd.f32 %v3122_v62, %v4572_v63  ;;  %v4636_v17 = vadd.f32 %v3036_v49, %v3035_v9  ;;  %2106 = vmatprep.mubr.bf16.mxu1 %v4404_v3  ;;  %v844_v14 = vsel %vm702_vm1, %v842_v59, %v843_v45  ;;  %v900_v9 = vpack.c.bf16 %v3584_v28, %v538_v15 }
 0x139   : > { %v3124_v25 = vpop.f32.mrf.mxu1  ;;  %v3038_v46 = vpop.f32.mrf.mxu0 }
 0x13a   : > { %v3125_v42 = vadd.f32 %v3124_v25, %v3123_v30 }
 0x13b   : > { %v3126_v61 = vpop.f32.mrf.mxu1  ;;  %v3039_v27 = vpop.f32.mrf.mxu0 }
 0x13c   : > { %v4642_v31 = vadd.f32 %v3125_v42, %v4580_v19  ;;  %v4644_v63 = vadd.f32 %v3039_v27, %v3038_v46 }
 0x13d   : > { %v3127_v52 = vpop.f32.mrf.mxu1  ;;  %v3041_v3 = vpop.f32.mrf.mxu0  ;;  %3478 = vmatmul.mubr.bf16.gmra.mxu0 %v4356_v48  ;;  %v902_v48 = vpack.c.bf16 %v846_v1, %v844_v14 }
 0x13e   : > { %v3128_v26 = vadd.f32 %v3127_v52, %v3126_v61  ;;  %3481 = vmatprep.mubr.bf16.mxu0 %v4533_v7 }
 0x13f   : > { %v3129_v0 = vpop.f32.mrf.mxu1  ;;  %2107 = vmatmul.mubr.bf16.gmra.mxu1 %v4482_v24  ;;  %v3042_v18 = vpop.f32.mrf.mxu0 }
 0x140   : > { %v4652_v19 = vadd.f32 %v3128_v26, %v4586_v37  ;;  %v4654_v21 = vadd.f32 %v3042_v18, %v3041_v3  ;;  %2114 = vmatprep.mubr.bf16.mxu1 %v901_v36 }
 0x141   : > { %v3130_v2 = vpop.f32.mrf.mxu1  ;;  %v3044_v13 = vpop.f32.mrf.mxu0 }
 0x142   : > { %v3131_v39 = vadd.f32 %v3130_v2, %v3129_v0 }
 0x143   : > { %v3132_v29 = vpop.f32.mrf.mxu1  ;;  %v3045_v7 = vpop.f32.mrf.mxu0 }
 0x144   : > { %v4657_v6 = vadd.f32 %v3131_v39, %v4594_v60  ;;  %v4659_v58 = vadd.f32 %v3045_v7, %v3044_v13 }
 0x145   : > { %v3133_v24 = vpop.f32.mrf.mxu1  ;;  %v3047_v23 = vpop.f32.mrf.mxu0  ;;  %3482 = vmatmul.mubr.bf16.gmra.mxu0 %v902_v48 }
 0x146   : > { %v3134_v37 = vadd.f32 %v3133_v24, %v3132_v29 }
 0x147   : > { %v3135_v62 = vpop.f32.mrf.mxu1  ;;  %2115 = vmatmul.mubr.bf16.gmra.mxu1 %v900_v9  ;;  %v3048_v30 = vpop.f32.mrf.mxu0 }
 0x148   : > { %v4662_v49 = vadd.f32 %v3134_v37, %v4600_v47  ;;  %v4664_v25 = vadd.f32 %v3048_v30, %v3047_v23 }
 0x149   : > { %v3136_v46 = vpop.f32.mrf.mxu1  ;;  %v3050_v20 = vpop.f32.mrf.mxu0 }
 0x14a   : > { %v3137_v15 = vadd.f32 %v3136_v46, %v3135_v62 }
 0x14b   : > { %v3138_v28 = vpop.f32.mrf.mxu1  ;;  %v3051_v60 = vpop.f32.mrf.mxu0 }
 0x14c   : > { %v4667_v10 = vadd.f32 %v3137_v15, %v4608_v40  ;;  %v4669_v42 = vadd.f32 %v3051_v60, %v3050_v20 }
 0x14d   : > { %v3139_v12 = vpop.f32.mrf.mxu1  ;;  %v3205_v59 = vpop.f32.mrf.mxu0 }
 0x14e   : > { %v3140_v45 = vadd.f32 %v3139_v12, %v3138_v28 }
 0x14f   : > { %v3141_v61 = vpop.f32.mrf.mxu1  ;;  %v3206_v27 = vpop.f32.mrf.mxu0 }
 0x150   : > { %v4672_v47 = vadd.f32 %v3140_v45, %v4614_v11  ;;  %v3207_v36 = vadd.f32 %v3206_v27, %v3205_v59 }
 0x151   : > { %v3142_v52 = vpop.f32.mrf.mxu1  ;;  %v3208_v3 = vpop.f32.mrf.mxu0 }
 0x152   : > { %v3143_v26 = vadd.f32 %v3142_v52, %v3141_v61  ;;  %v4675_v14 = vadd.f32 %v3207_v36, %v4570_v38 }
 0x153   : > { %v3144_v1 = vpop.f32.mrf.mxu1  ;;  %v3209_v40 = vpop.f32.mrf.mxu0 }
 0x154   : > { %v4678_v0 = vadd.f32 %v3143_v26, %v4622_v54  ;;  %v3210_v18 = vadd.f32 %v3209_v40, %v3208_v3 }
 0x155   : > { %v3145_v2 = vpop.f32.mrf.mxu1  ;;  %v3211_v13 = vpop.f32.mrf.mxu0 }
 0x156   : > { %v3146_v48 = vadd.f32 %v3145_v2, %v3144_v1  ;;  %v4681_v39 = vadd.f32 %v3210_v18, %v4578_v51 }
 0x157   : > { %v3147_v11 = vpop.f32.mrf.mxu1  ;;  %v3212_v29 = vpop.f32.mrf.mxu0 }
 0x158   : > { %v4684_v7 = vadd.f32 %v3146_v48, %v4628_v41  ;;  %v3213_v9 = vadd.f32 %v3212_v29, %v3211_v13 }
 0x159   : > { %v3148_v38 = vpop.f32.mrf.mxu1  ;;  %v3214_v24 = vpop.f32.mrf.mxu0 }
 0x15a   : > { %v3149_v23 = vadd.f32 %v3148_v38, %v3147_v11  ;;  %v4687_v37 = vadd.f32 %v3213_v9, %v4584_v32 }
 0x15b   : > { %v3150_v54 = vpop.f32.mrf.mxu1  ;;  %v3215_v62 = vpop.f32.mrf.mxu0 }
 0x15c   : > { %v4690_v30 = vadd.f32 %v3149_v23, %v4636_v17  ;;  %v3216_v46 = vadd.f32 %v3215_v62, %v3214_v24 }
 0x15d   : > { %v3151_v51 = vpop.f32.mrf.mxu1  ;;  %v3217_v20 = vpop.f32.mrf.mxu0 }
 0x15e   : > { %v3152_v15 = vadd.f32 %v3151_v51, %v3150_v54  ;;  %v4693_v28 = vadd.f32 %v3216_v46, %v4592_v53 }
 0x15f   : > { %v3153_v41 = vpop.f32.mrf.mxu1  ;;  %v3218_v60 = vpop.f32.mrf.mxu0 }
 0x160   : > { %v4696_v12 = vadd.f32 %v3152_v15, %v4644_v63  ;;  %v3219_v59 = vadd.f32 %v3218_v60, %v3217_v20 }
 0x161   : > { %v3154_v32 = vpop.f32.mrf.mxu1  ;;  %v3220_v45 = vpop.f32.mrf.mxu0 }
 0x162   : > { %v3155_v61 = vadd.f32 %v3154_v32, %v3153_v41  ;;  %v4699_v27 = vadd.f32 %v3219_v59, %v4598_v55 }
 0x163   : > { %v3156_v17 = vpop.f32.mrf.mxu1  ;;  %v3221_v36 = vpop.f32.mrf.mxu0 }
 0x164   : > { %v4702_v52 = vadd.f32 %v3155_v61, %v4654_v21  ;;  %v3222_v3 = vadd.f32 %v3221_v36, %v3220_v45 }
 0x165   : > { %v3157_v53 = vpop.f32.mrf.mxu1  ;;  %v3223_v26 = vpop.f32.mrf.mxu0 }
 0x166   : > { %v3158_v1 = vadd.f32 %v3157_v53, %v3156_v17  ;;  %v4705_v40 = vadd.f32 %v3222_v3, %v4606_v35 }
 0x167   : > { %v3159_v63 = vpop.f32.mrf.mxu1  ;;  %v3224_v18 = vpop.f32.mrf.mxu0 }
 0x168   : > { %v4708_v2 = vadd.f32 %v3158_v1, %v4659_v58  ;;  %v3225_v13 = vadd.f32 %v3224_v18, %v3223_v26 }
 0x169   : > { %v3160_v55 = vpop.f32.mrf.mxu1  ;;  %v3226_v48 = vpop.f32.mrf.mxu0 }
 0x16a   : > { %v3161_v11 = vadd.f32 %v3160_v55, %v3159_v63  ;;  %v4711_v29 = vadd.f32 %v3225_v13, %v4612_v8 }
 0x16b   : > { %v3162_v21 = vpop.f32.mrf.mxu1  ;;  %v3227_v9 = vpop.f32.mrf.mxu0 }
 0x16c   : > { %v4714_v38 = vadd.f32 %v3161_v11, %v4664_v25  ;;  %v3228_v24 = vadd.f32 %v3227_v9, %v3226_v48 }
 0x16d   : > { %v3163_v35 = vpop.f32.mrf.mxu1  ;;  %v3229_v23 = vpop.f32.mrf.mxu0 }
 0x16e   : > { %v3164_v54 = vadd.f32 %v3163_v35, %v3162_v21  ;;  %v4717_v62 = vadd.f32 %v3228_v24, %v4620_v22 }
 0x16f   : > { %v3165_v58 = vpop.f32.mrf.mxu1  ;;  %v3230_v46 = vpop.f32.mrf.mxu0 }
 0x170   : > { %v4720_v51 = vadd.f32 %v3164_v54, %v4669_v42  ;;  %v3231_v20 = vadd.f32 %v3230_v46, %v3229_v23 }
 0x171   : > { %v3166_v8 = vpop.f32.mrf.mxu1  ;;  %v3232_v15 = vpop.f32.mrf.mxu0 }
 0x172   : > { %v3167_v41 = vadd.f32 %v3166_v8, %v3165_v58  ;;  %v4723_v60 = vadd.f32 %v3231_v20, %v4626_v5 }
 0x173   : > { %v3168_v25 = vpop.f32.mrf.mxu1  ;;  %v3233_v59 = vpop.f32.mrf.mxu0 }
 0x174   : > { %v4726_v32 = vadd.f32 %v3167_v41, %v4516_v16  ;;  %v3234_v45 = vadd.f32 %v3233_v59, %v3232_v15 }
 0x175   : > { %v3169_v22 = vpop.f32.mrf.mxu1  ;;  %v3235_v61 = vpop.f32.mrf.mxu0 }
 0x176   : > { %v3170_v17 = vadd.f32 %v3169_v22, %v3168_v25  ;;  %v4729_v36 = vadd.f32 %v3234_v45, %v4634_v57 }
 0x177   : > { %v3171_v42 = vpop.f32.mrf.mxu1  ;;  %v3236_v3 = vpop.f32.mrf.mxu0 }
 0x178   : > { %v4732_v53 = vadd.f32 %v3170_v17, %v4521_v50  ;;  %v3237_v26 = vadd.f32 %v3236_v3, %v3235_v61 }
 0x179   : > { %v3172_v5 = vpop.f32.mrf.mxu1  ;;  %v3238_v1 = vpop.f32.mrf.mxu0 }
 0x17a   : > { %v3173_v63 = vadd.f32 %v3172_v5, %v3171_v42  ;;  %v4735_v18 = vadd.f32 %v3237_v26, %v4642_v31 }
 0x17b   : > { %v3174_v16 = vpop.f32.mrf.mxu1  ;;  %v3239_v13 = vpop.f32.mrf.mxu0 }
 0x17c   : > { %v4738_v55 = vadd.f32 %v3173_v63, %v4531_v56  ;;  %v3240_v48 = vadd.f32 %v3239_v13, %v3238_v1 }
 0x17d   : > { %v3175_v57 = vpop.f32.mrf.mxu1  ;;  %v3241_v11 = vpop.f32.mrf.mxu0 }
 0x17e   : > { %v3176_v21 = vadd.f32 %v3175_v57, %v3174_v16  ;;  %v4741_v9 = vadd.f32 %v3240_v48, %v4652_v19 }
 0x17f   : > { %v3177_v50 = vpop.f32.mrf.mxu1  ;;  %v3242_v24 = vpop.f32.mrf.mxu0 }
 0x180   : > { %v4744_v35 = vadd.f32 %v3176_v21, %v4538_v33  ;;  %v3243_v23 = vadd.f32 %v3242_v24, %v3241_v11 }
 0x181   : > { %v3178_v31 = vpop.f32.mrf.mxu1  ;;  %v3244_v54 = vpop.f32.mrf.mxu0 }
 0x182   : > { %v3179_v58 = vadd.f32 %v3178_v31, %v3177_v50  ;;  %v4747_v46 = vadd.f32 %v3243_v23, %v4657_v6 }
 0x183   : > { %v3180_v56 = vpop.f32.mrf.mxu1  ;;  %v3245_v20 = vpop.f32.mrf.mxu0 }
 0x184   : > { %v4750_v8 = vadd.f32 %v3179_v58, %v4545_v4  ;;  %v3246_v15 = vadd.f32 %v3245_v20, %v3244_v54 }
 0x185   : > { %v3181_v19 = vpop.f32.mrf.mxu1  ;;  %v3247_v41 = vpop.f32.mrf.mxu0 }
 0x186   : > { %v3182_v25 = vadd.f32 %v3181_v19, %v3180_v56  ;;  %v4753_v59 = vadd.f32 %v3246_v15, %v4662_v49 }
 0x187   : > { %v3183_v33 = vpop.f32.mrf.mxu1  ;;  %v3248_v45 = vpop.f32.mrf.mxu0 }
 0x188   : > { %v4756_v22 = vadd.f32 %v3182_v25, %v4550_v43  ;;  %v3249_v61 = vadd.f32 %v3248_v45, %v3247_v41 }
 0x189   : > { %v3184_v6 = vpop.f32.mrf.mxu1  ;;  %v3250_v17 = vpop.f32.mrf.mxu0 }
 0x18a   : > { %v3185_v42 = vadd.f32 %v3184_v6, %v3183_v33  ;;  %v4759_v3 = vadd.f32 %v3249_v61, %v4667_v10 }
 0x18b   : > { %v3186_v4 = vpop.f32.mrf.mxu1  ;;  %v3251_v26 = vpop.f32.mrf.mxu0 }
 0x18c   : > { %v4762_v5 = vadd.f32 %v3185_v42, %v4557_v34  ;;  %v3252_v1 = vadd.f32 %v3251_v26, %v3250_v17 }
 0x18d   : > { %v3187_v49 = vpop.f32.mrf.mxu1  ;;  %v3253_v63 = vpop.f32.mrf.mxu0 }
 0x18e   : > { %v3188_v16 = vadd.f32 %v3187_v49, %v3186_v4  ;;  %v4765_v13 = vadd.f32 %v3252_v1, %v4672_v47 }
 0x18f   : > { %v3317_v43 = vpop.f32.mrf.mxu1  ;;  %v3254_v48 = vpop.f32.mrf.mxu0 }
 0x190   : > { %v4768_v57 = vadd.f32 %v3188_v16, %v4562_v44  ;;  %v3255_v11 = vadd.f32 %v3254_v48, %v3253_v63 }
 0x191   : > { %v3318_v10 = vpop.f32.mrf.mxu1  ;;  %v3256_v21 = vpop.f32.mrf.mxu0 }
 0x192   : > { %v4771_v50 = vadd.f32 %v3255_v11, %v4678_v0  ;;  %v3319_v34 = vadd.f32 %v3318_v10, %v3317_v43 }
 0x193   : > { %v4773_v24 = vpop.f32.mrf.mxu1  ;;  %v3257_v23 = vpop.f32.mrf.mxu0 }
 0x194   : > { %v3258_v31 = vadd.f32 %v3257_v23, %v3256_v21  ;;  %v4776_v54 = vadd.f32 %v3319_v34, %v4675_v14 }
 0x195   : > { %v4778_v47 = vpop.f32.mrf.mxu1  ;;  %v3259_v58 = vpop.f32.mrf.mxu0 }
 0x196   : > { %v4781_v44 = vadd.f32 %v3258_v31, %v4684_v7 }
 0x197   : > { %v4783_v56 = vpop.f32.mrf.mxu1  ;;  %v3260_v20 = vpop.f32.mrf.mxu0 }
 0x198   : > { %v3261_v15 = vadd.f32 %v3260_v20, %v3259_v58 }
 0x199   : > { %v4785_v0 = vpop.f32.mrf.mxu1  ;;  %v3262_v19 = vpop.f32.mrf.mxu0 }
 0x19a   : > { %v4788_v41 = vadd.f32 %v3261_v15, %v4690_v30 }
 0x19b   : > { %v4790_v25 = vpop.f32.mrf.mxu1  ;;  %v3263_v14 = vpop.f32.mrf.mxu0 }
 0x19c   : > { %v3264_v33 = vadd.f32 %v3263_v14, %v3262_v19 }
 0x19d   : > { %v4792_v45 = vpop.f32.mrf.mxu1  ;;  %v3265_v61 = vpop.f32.mrf.mxu0 }
 0x19e   : > { %v4795_v7 = vadd.f32 %v3264_v33, %v4696_v12 }
 0x19f   : > { %v4797_v6 = vpop.f32.mrf.mxu1  ;;  %v3266_v17 = vpop.f32.mrf.mxu0 }
 0x1a0   : > { %v3267_v42 = vadd.f32 %v3266_v17, %v3265_v61 }
 0x1a1   : > { %v4799_v4 = vpop.f32.mrf.mxu1  ;;  %v3268_v26 = vpop.f32.mrf.mxu0 }
 0x1a2   : > { %v4802_v30 = vadd.f32 %v3267_v42, %v4702_v52 }
 0x1a3   : > { %v4804_v1 = vpop.f32.mrf.mxu1  ;;  %v3269_v49 = vpop.f32.mrf.mxu0 }
 0x1a4   : > { %v3270_v63 = vadd.f32 %v3269_v49, %v3268_v26 }
 0x1a5   : > { %v4806_v16 = vpop.f32.mrf.mxu1  ;;  %v3271_v43 = vpop.f32.mrf.mxu0 }
 0x1a6   : > { %v4809_v12 = vadd.f32 %v3270_v63, %v4708_v2 }
 0x1a7   : > { %v4811_v48 = vpop.f32.mrf.mxu1  ;;  %v3272_v11 = vpop.f32.mrf.mxu0 }
 0x1a8   : > { %5065 = vst [vmem:[#allocation4_spill] sm:$0xff] %v4809_v12  ;;  %v3273_v10 = vadd.f32 %v3272_v11, %v3271_v43 }
 0x1a9   : > { %v4813_v21 = vpop.f32.mrf.mxu1  ;;  %v3274_v34 = vpop.f32.mrf.mxu0 }
 0x1aa   : > { %v4816_v52 = vadd.f32 %v3273_v10, %v4714_v38 }
 0x1ab   : > { %v4818_v23 = vpop.f32.mrf.mxu1  ;;  %v3275_v31 = vpop.f32.mrf.mxu0 }
 0x1ac   : > { %v3276_v58 = vadd.f32 %v3275_v31, %v3274_v34 }
 0x1ad   : > { %v4820_v20 = vpop.f32.mrf.mxu1  ;;  %v3277_v15 = vpop.f32.mrf.mxu0 }
 0x1ae   : > { %v4823_v2 = vadd.f32 %v3276_v58, %v4720_v51 }
 0x1af   : > { %v4825_v19 = vpop.f32.mrf.mxu1  ;;  %v3278_v14 = vpop.f32.mrf.mxu0 }
 0x1b0   : > { %5066 = vst [vmem:[#allocation13_spill] sm:$0xff] %v4823_v2  ;;  %v3279_v33 = vadd.f32 %v3278_v14, %v3277_v15 }
 0x1b1   : > { %v4827_v61 = vpop.f32.mrf.mxu1  ;;  %v3280_v17 = vpop.f32.mrf.mxu0 }
 0x1b2   : > { %v4830_v38 = vadd.f32 %v3279_v33, %v4726_v32 }
 0x1b3   : > { %v4832_v42 = vpop.f32.mrf.mxu1  ;;  %v3281_v26 = vpop.f32.mrf.mxu0 }
 0x1b4   : > { %5067 = vst [vmem:[#allocation7_spill] sm:$0xff] %v4830_v38  ;;  %v3282_v49 = vadd.f32 %v3281_v26, %v3280_v17 }
 0x1b5   : > { %v4834_v63 = vpop.f32.mrf.mxu1  ;;  %v3283_v43 = vpop.f32.mrf.mxu0 }
 0x1b6   : > { %v4837_v51 = vadd.f32 %v3282_v49, %v4732_v53 }
 0x1b7   : > { %v4839_v11 = vpop.f32.mrf.mxu1  ;;  %v3284_v10 = vpop.f32.mrf.mxu0 }
 0x1b8   : > { %5068 = vst [vmem:[#allocation14_spill] sm:$0xff] %v4837_v51  ;;  %v3285_v34 = vadd.f32 %v3284_v10, %v3283_v43 }
 0x1b9   : > { %v4841_v31 = vpop.f32.mrf.mxu1  ;;  %v3286_v58 = vpop.f32.mrf.mxu0 }
 0x1ba   : > { %v4844_v32 = vadd.f32 %v3285_v34, %v4738_v55 }
 0x1bb   : > { %v4846_v15 = vpop.f32.mrf.mxu1  ;;  %v3287_v14 = vpop.f32.mrf.mxu0 }
 0x1bc   : > { %5069 = vst [vmem:[#allocation10_spill] sm:$0xff] %v4844_v32  ;;  %v3288_v33 = vadd.f32 %v3287_v14, %v3286_v58 }
 0x1bd   : > { %v4848_v17 = vpop.f32.mrf.mxu1  ;;  %v3289_v26 = vpop.f32.mrf.mxu0 }
 0x1be   : > { %v4851_v53 = vadd.f32 %v3288_v33, %v4744_v35 }
 0x1bf   : > { %v4853_v49 = vpop.f32.mrf.mxu1  ;;  %v3290_v51 = vpop.f32.mrf.mxu0 }
 0x1c0   : > { %5070 = vst [vmem:[#allocation15_spill] sm:$0xff] %v4851_v53  ;;  %v3291_v43 = vadd.f32 %v3290_v51, %v3289_v26 }
 0x1c1   : > { %v4855_v10 = vpop.f32.mrf.mxu1  ;;  %v3292_v38 = vpop.f32.mrf.mxu0 }
 0x1c2   : > { %v4858_v55 = vadd.f32 %v3291_v43, %v4750_v8 }
 0x1c3   : > { %v4860_v34 = vpop.f32.mrf.mxu1  ;;  %v3293_v32 = vpop.f32.mrf.mxu0 }
 0x1c4   : > { %5071 = vst [vmem:[#allocation6_spill] sm:$0xff] %v4858_v55  ;;  %v3294_v58 = vadd.f32 %v3293_v32, %v3292_v38  ;;  %v3325_v38 = vadd.f32 %v4785_v0, %v4783_v56  ;;  %v3331_v0 = vadd.f32 %v4799_v4, %v4797_v6  ;;  %v3334_v4 = vadd.f32 %v4806_v16, %v4804_v1 }
 0x1c5   : > { %v4862_v14 = vpop.f32.mrf.mxu1  ;;  %v3295_v12 = vpop.f32.mrf.mxu0 }
 0x1c6   : > { %v4865_v35 = vadd.f32 %v3294_v58, %v4756_v22  ;;  %v3328_v22 = vadd.f32 %v4792_v45, %v4790_v25 }
 0x1c7   : > { %v4867_v33 = vpop.f32.mrf.mxu1  ;;  %v3296_v53 = vpop.f32.mrf.mxu0 }
 0x1c8   : > { %5072 = vst [vmem:[#allocation9_spill] sm:$0xff] %v4865_v35  ;;  %v3297_v51 = vadd.f32 %v3296_v53, %v3295_v12  ;;  %v3322_v53 = vadd.f32 %v4778_v47, %v4773_v24  ;;  %v2005_v35 = vadd.f32 %v3325_v38, %v4687_v37  ;;  %v2008_v56 = vadd.f32 %v3328_v22, %v4693_v28 }
 0x1c9   : > { %v4869_v26 = vpop.f32.mrf.mxu1  ;;  %v3298_v2 = vpop.f32.mrf.mxu0  ;;  %v2013_v38 = vadd.f32 %v3331_v0, %v4699_v27  ;;  %v2016_v0 = vadd.f32 %v3334_v4, %v4705_v40 }
 0x1ca   : > { %v4872_v8 = vadd.f32 %v3297_v51, %v4762_v5 }
 0x1cb   : > { %v4874_v43 = vpop.f32.mrf.mxu1  ;;  %v3299_v55 = vpop.f32.mrf.mxu0 }
 0x1cc   : > { %5073 = vst [vmem:[#allocation12_spill] sm:$0xff] %v4872_v8  ;;  %v3300_v32 = vadd.f32 %v3299_v55, %v3298_v2 }
 0x1cd   : > { %v4880_v58 = vpop.f32.mrf.mxu1  ;;  %v3455_v12 = vpop.f32.mrf.mxu0 }
 0x1ce   : > { %v4885_v5 = vadd.f32 %v3300_v32, %v4768_v57  ;;  %v2166_v2 = vadd.f32 %v3455_v12, %v2005_v35  ;;  %v2000_v57 = vadd.f32 %v3322_v53, %v4681_v39  ;;  %v3340_v39 = vadd.f32 %v4820_v20, %v4818_v23 }
 0x1cf   : > { %v4887_v51 = vpop.f32.mrf.mxu1  ;;  %v2157_v8 = vpop.f32.mrf.mxu0 }
 0x1d0   : > { %v2158_v55 = vadd.f32 %v2157_v8, %v4776_v54  ;;  %v3337_v54 = vadd.f32 %v4813_v21, %v4811_v48  ;;  %v2483_v1 = vmul.f32 %v2166_v2, %v2166_v2 }
 0x1d1   : > { %v4893_v25 = vpop.f32.mrf.mxu1  ;;  %v3456_v45 = vpop.f32.mrf.mxu0 }
 0x1d2   : > { %v2169_v24 = vadd.f32 %v3456_v45, %v2008_v56  ;;  %v2481_v22 = vmul.f32 %v2158_v55, %v2158_v55  ;;  %v2021_v23 = vadd.f32 %v3337_v54, %v4711_v29 }
 0x1d3   : > { %v4897_v47 = vpop.f32.mrf.mxu1  ;;  %v2160_v37 = vpop.f32.mrf.mxu0 }
 0x1d4   : > { %v2863_v28 = vpack.c.bf16 %v2169_v24, %v2166_v2  ;;  %v2161_v6 = vadd.f32 %v2160_v37, %v2000_v57  ;;  %v2024_v57 = vadd.f32 %v3340_v39, %v4717_v62  ;;  %v2484_v37 = vmul.f32 %v2169_v24, %v2169_v24 }
 0x1d5   : > { %v4912_v35 = vpop.f32.mrf.mxu1  ;;  %v3459_v8 = vpop.f32.mrf.mxu0 }
 0x1d6   : > { %2950 = vst [vmem:[%s4904_s28 + $0x8] sm:$0xff] %v2863_v28   ;;  %v2858_v32 = vpack.c.bf16 %v2161_v6, %v2158_v55  ;;  %v2444_v12 = vadd.f32 %v2161_v6, %v2158_v55  ;;  %v2482_v53 = vmul.f32 %v2161_v6, %v2161_v6  ;;  %v3343_v55 = vadd.f32 %v4827_v61, %v4825_v19 }
 0x1d7   : > { %v4916_v56 = vpop.f32.mrf.mxu1  ;;  %v2173_v45 = vpop.f32.mrf.mxu0  ;;  %v2182_v29 = vadd.f32 %v3459_v8, %v2021_v23 }
 0x1d8   : > { %2859 = vst [vmem:[%s4904_s28] sm:$0xff] %v2858_v32   ;;  %v2445_v16 = vadd.f32 %v2444_v12, %v2166_v2  ;;  %v2513_v48 = vadd.f32 %v2482_v53, %v2481_v22  ;;  %v2174_v21 = vadd.f32 %v2173_v45, %v2013_v38  ;;  %v3349_v2 = vadd.f32 %v4841_v31, %v4839_v11 }
 0x1d9   : > { %v4920_v20 = vpop.f32.mrf.mxu1  ;;  %v3460_v27 = vpop.f32.mrf.mxu0  ;;  %v3352_v38 = vadd.f32 %v4848_v17, %v4846_v15  ;;  %v3346_v11 = vadd.f32 %v4834_v63, %v4832_v42  ;;  %v2029_v53 = vadd.f32 %v3343_v55, %v4723_v60  ;;  %v2487_v23 = vmul.f32 %v2182_v29, %v2182_v29 }
 0x1da   : > { %v2514_v28 = vadd.f32 %v2513_v48, %v2483_v1  ;;  %v2446_v6 = vadd.f32 %v2445_v16, %v2169_v24  ;;  %v2185_v62 = vadd.f32 %v3460_v27, %v2024_v57  ;;  %v2485_v40 = vmul.f32 %v2174_v21, %v2174_v21 }
 0x1db   : > { %v4930_v54 = vpop.f32.mrf.mxu1  ;;  %v2176_v39 = vpop.f32.mrf.mxu0  ;;  %v2037_v16 = vadd.f32 %v3349_v2, %v4735_v18  ;;  %v2040_v48 = vadd.f32 %v3352_v38, %v4741_v9  ;;  %v3355_v60 = vadd.f32 %v4855_v10, %v4853_v49  ;;  %v3361_v18 = vadd.f32 %v4869_v26, %v4867_v33 }
 0x1dc   : > { %v2447_v22 = vadd.f32 %v2446_v6, %v2174_v21  ;;  %v2515_v4 = vadd.f32 %v2514_v28, %v2484_v37  ;;  %v2177_v19 = vadd.f32 %v2176_v39, %v2016_v0  ;;  %v2873_v61 = vpack.c.bf16 %v2185_v62, %v2182_v29 }
 0x1dd   : > { %v4932_v32 = vpop.f32.mrf.mxu1  ;;  %v3463_v24 = vpop.f32.mrf.mxu0  ;;  %v2032_v28 = vadd.f32 %v3346_v11, %v4729_v36  ;;  %v2488_v55 = vmul.f32 %v2185_v62, %v2185_v62  ;;  %v3364_v38 = vadd.f32 %v4880_v58, %v4874_v43  ;;  %v3358_v10 = vadd.f32 %v4862_v14, %v4860_v34 }
 0x1de   : > { %v2516_v31 = vadd.f32 %v2515_v4, %v2485_v40  ;;  %v2868_v15 = vpack.c.bf16 %v2177_v19, %v2174_v21  ;;  %v2448_v17 = vadd.f32 %v2447_v22, %v2177_v19  ;;  %2952 = vst [vmem:[%s4904_s28 + $0x18] sm:$0xff] %v2873_v61   ;;  %v2486_v8 = vmul.f32 %v2177_v19, %v2177_v19 }
 0x1df   : > { %v4937_v12 = vpop.f32.mrf.mxu1  ;;  %v2189_v45 = vpop.f32.mrf.mxu0  ;;  %v2198_v21 = vadd.f32 %v3463_v24, %v2037_v16  ;;  %v2045_v43 = vadd.f32 %v3355_v60, %v4747_v46  ;;  %v2053_v11 = vadd.f32 %v3361_v18, %v4759_v3  ;;  %v2048_v16 = vadd.f32 %v3358_v10, %v4753_v59 }
 0x1e0   : > { %2951 = vst [vmem:[%s4904_s28 + $0x10] sm:$0xff] %v2868_v15   ;;  %v2449_v1 = vadd.f32 %v2448_v17, %v2182_v29  ;;  %v2517_v57 = vadd.f32 %v2516_v31, %v2486_v8  ;;  %v2190_v42 = vadd.f32 %v2189_v45, %v2029_v53  ;;  %v2056_v31 = vadd.f32 %v3364_v38, %v4765_v13 }
 0x1e1   : > { %v4943_v27 = vpop.f32.mrf.mxu1  ;;  %v3464_v63 = vpop.f32.mrf.mxu0  ;;  %v2491_v15 = vmul.f32 %v2198_v21, %v2198_v21  ;;  %v3367_v46 = vadd.f32 %v4893_v25, %v4887_v51  ;;  %v3370_v51 = vadd.f32 %v4912_v35, %v4897_v47 }
 0x1e2   : > { %v2450_v0 = vadd.f32 %v2449_v1, %v2185_v62  ;;  %v2201_v37 = vadd.f32 %v3464_v63, %v2040_v48  ;;  %v2518_v9 = vadd.f32 %v2517_v57, %v2487_v23  ;;  %v2489_v36 = vmul.f32 %v2190_v42, %v2190_v42 }
 0x1e3   : > { %v4950_v6 = vpop.f32.mrf.mxu1  ;;  %v2192_v2 = vpop.f32.mrf.mxu0  ;;  %v3373_v48 = vadd.f32 %v4920_v20, %v4916_v56  ;;  %v2064_v10 = vadd.f32 %v3370_v51, %v4781_v44 }
 0x1e4   : > { %v2451_v29 = vadd.f32 %v2450_v0, %v2190_v42  ;;  %v2883_v39 = vpack.c.bf16 %v2201_v37, %v2198_v21  ;;  %v2193_v22 = vadd.f32 %v2192_v2, %v2032_v28  ;;  %v2519_v40 = vadd.f32 %v2518_v9, %v2488_v55 }
 0x1e5   : > { %v4954_v4 = vpop.f32.mrf.mxu1  ;;  %v3467_v49 = vpop.f32.mrf.mxu0  ;;  %v2492_v3 = vmul.f32 %v2201_v37, %v2201_v37  ;;  %v2061_v9 = vadd.f32 %v3367_v46, %v4771_v50  ;;  %v2069_v2 = vadd.f32 %v3373_v48, %v4788_v41  ;;  %v3379_v50 = vadd.f32 %v4943_v27, %v4937_v12 }
 0x1e6   : > { %2954 = vst [vmem:[%s4904_s28 + $0x28] sm:$0xff] %v2883_v39   ;;  %v2878_v33 = vpack.c.bf16 %v2193_v22, %v2190_v42  ;;  %v2452_v26 = vadd.f32 %v2451_v29, %v2193_v22  ;;  %v2490_v62 = vmul.f32 %v2193_v22, %v2193_v22  ;;  %v2520_v19 = vadd.f32 %v2519_v40, %v2489_v36 }
 0x1e7   : > { %v3383_v61 = vpop.f32.mrf.mxu1  ;;  %v2205_v58 = vpop.f32.mrf.mxu0  ;;  %v2214_v14 = vadd.f32 %v3467_v49, %v2053_v11  ;;  %v3376_v42 = vadd.f32 %v4932_v32, %v4930_v54  ;;  %v3382_v44 = vadd.f32 %v4954_v4, %v4950_v6 }
 0x1e8   : > { %2953 = vst [vmem:[%s4904_s28 + $0x20] sm:$0xff] %v2878_v33   ;;  %v2453_v24 = vadd.f32 %v2452_v26, %v2198_v21  ;;  %v2521_v17 = vadd.f32 %v2520_v19, %v2490_v62  ;;  %v2206_v53 = vadd.f32 %v2205_v58, %v2045_v43 }
 0x1e9   : > { %v3384_v8 = vpop.f32.mrf.mxu1  ;;  %v3468_v34 = vpop.f32.mrf.mxu0  ;;  %v2072_v38 = vadd.f32 %v3376_v42, %v4795_v7  ;;  %v2495_v29 = vmul.f32 %v2214_v14, %v2214_v14 }
 0x1ea   : > { %v2454_v45 = vadd.f32 %v2453_v24, %v2201_v37  ;;  %v2217_v1 = vadd.f32 %v3468_v34, %v2056_v31  ;;  %v2522_v23 = vadd.f32 %v2521_v17, %v2491_v15  ;;  %v2493_v28 = vmul.f32 %v2206_v53, %v2206_v53 }
 0x1eb   : > { %v3386_v13 = vpop.f32.mrf.mxu1  ;;  %v2208_v57 = vpop.f32.mrf.mxu0  ;;  %v3385_v33 = vadd.f32 %v3384_v8, %v3383_v61  ;;  %v2077_v34 = vadd.f32 %v3379_v50, %v4802_v30 }
 0x1ec   : > { %v2455_v63 = vadd.f32 %v2454_v45, %v2206_v53  ;;  %v2893_v21 = vpack.c.bf16 %v2217_v1, %v2214_v14  ;;  %v2209_v0 = vadd.f32 %v2208_v57, %v2048_v16  ;;  %v2523_v59 = vadd.f32 %v2522_v23, %v2492_v3  ;;  %v5074_v16 = vld [vmem:[#allocation13_spill] sm:$0xff] }
 0x1ed   : > { %v3387_v60 = vpop.f32.mrf.mxu1  ;;  %v3471_v18 = vpop.f32.mrf.mxu0  ;;  %v2496_v26 = vmul.f32 %v2217_v1, %v2217_v1 }
 0x1ee   : > { %2956 = vst [vmem:[%s4904_s28 + $0x38] sm:$0xff] %v2893_v21   ;;  %v2888_v25 = vpack.c.bf16 %v2209_v0, %v2206_v53  ;;  %v2456_v56 = vadd.f32 %v2455_v63, %v2209_v0  ;;  %v2494_v20 = vmul.f32 %v2209_v0, %v2209_v0  ;;  %v2524_v37 = vadd.f32 %v2523_v59, %v2493_v28  ;;  %v5075_v63 = vld [vmem:[#allocation4_spill] sm:$0xff] }
 0x1ef   : > { %v3389_v55 = vpop.f32.mrf.mxu1  ;;  %v2221_v54 = vpop.f32.mrf.mxu0  ;;  %v2230_v35 = vadd.f32 %v3471_v18, %v2069_v2  ;;  %v3388_v7 = vadd.f32 %v3387_v60, %v3386_v13  ;;  %v2080_v21 = vadd.f32 %v3382_v44, %v5075_v63 }
 0x1f0   : > { %2955 = vst [vmem:[%s4904_s28 + $0x30] sm:$0xff] %v2888_v25   ;;  %v2457_v32 = vadd.f32 %v2456_v56, %v2214_v14  ;;  %v2525_v39 = vadd.f32 %v2524_v37, %v2494_v20  ;;  %v2222_v36 = vadd.f32 %v2221_v54, %v2061_v9 }
 0x1f1   : > { %v3390_v22 = vpop.f32.mrf.mxu1  ;;  %v3472_v47 = vpop.f32.mrf.mxu0  ;;  %v2088_v46 = vadd.f32 %v3388_v7, %v5074_v16  ;;  %v2499_v48 = vmul.f32 %v2230_v35, %v2230_v35 }
 0x1f2   : > { %v2458_v40 = vadd.f32 %v2457_v32, %v2217_v1  ;;  %v2233_v49 = vadd.f32 %v3472_v47, %v2072_v38  ;;  %v2526_v62 = vadd.f32 %v2525_v39, %v2495_v29  ;;  %v2497_v11 = vmul.f32 %v2222_v36, %v2222_v36 }
 0x1f3   : > { %v3392_v41 = vpop.f32.mrf.mxu1  ;;  %v2224_v19 = vpop.f32.mrf.mxu0  ;;  %v2085_v1 = vadd.f32 %v3385_v33, %v4816_v52  ;;  %v3391_v0 = vadd.f32 %v3390_v22, %v3389_v55  ;;  %v5076_v22 = vld [vmem:[#allocation7_spill] sm:$0xff] }
 0x1f4   : > { %v2459_v43 = vadd.f32 %v2458_v40, %v2222_v36  ;;  %v2903_v58 = vpack.c.bf16 %v2233_v49, %v2230_v35  ;;  %v2225_v24 = vadd.f32 %v2224_v19, %v2064_v10  ;;  %v2527_v31 = vadd.f32 %v2526_v62, %v2496_v26  ;;  %v5077_v40 = vld [vmem:[#allocation10_spill] sm:$0xff]  ;;  %v5078_v10 = vld [vmem:[#allocation15_spill] sm:$0xff] }
 0x1f5   : > { %v3393_v15 = vpop.f32.mrf.mxu1  ;;  %v3475_v17 = vpop.f32.mrf.mxu0  ;;  %v2500_v30 = vmul.f32 %v2233_v49, %v2233_v49 }
 0x1f6   : > { %2958 = vst [vmem:[%s4904_s28 + $0x48] sm:$0xff] %v2903_v58   ;;  %v2898_v53 = vpack.c.bf16 %v2225_v24, %v2222_v36  ;;  %v2460_v12 = vadd.f32 %v2459_v43, %v2225_v24  ;;  %v2498_v27 = vmul.f32 %v2225_v24, %v2225_v24  ;;  %v2528_v61 = vadd.f32 %v2527_v31, %v2497_v11  ;;  %v5079_v24 = vld [vmem:[#allocation14_spill] sm:$0xff] }
 0x1f7   : > { %v3395_v8 = vpop.f32.mrf.mxu1  ;;  %v2237_v14 = vpop.f32.mrf.mxu0  ;;  %v2246_v4 = vadd.f32 %v3475_v17, %v2085_v1  ;;  %v3394_v56 = vadd.f32 %v3393_v15, %v3392_v41  ;;  %v2093_v36 = vadd.f32 %v3391_v0, %v5076_v22 }
 0x1f8   : > { %2957 = vst [vmem:[%s4904_s28 + $0x40] sm:$0xff] %v2898_v53   ;;  %v2461_v45 = vadd.f32 %v2460_v12, %v2230_v35  ;;  %v2529_v3 = vadd.f32 %v2528_v61, %v2498_v27  ;;  %v2238_v13 = vadd.f32 %v2237_v14, %v2077_v34 }
 0x1f9   : > { %v3396_v23 = vpop.f32.mrf.mxu1  ;;  %v3476_v6 = vpop.f32.mrf.mxu0  ;;  %v2503_v33 = vmul.f32 %v2246_v4, %v2246_v4  ;;  %v2096_v11 = vadd.f32 %v3394_v56, %v5079_v24 }
 0x1fa   : > { %v2462_v57 = vadd.f32 %v2461_v45, %v2233_v49  ;;  %v2249_v42 = vadd.f32 %v3476_v6, %v2088_v46  ;;  %v2530_v28 = vadd.f32 %v2529_v3, %v2499_v48  ;;  %v3397_v18 = vadd.f32 %v3396_v23, %v3395_v8 }
 0x1fb   : > { %v3398_v59 = vpop.f32.mrf.mxu1  ;;  %v2240_v60 = vpop.f32.mrf.mxu0  ;;  %v2501_v20 = vmul.f32 %v2238_v13, %v2238_v13 }
 0x1fc   : > { %v2463_v52 = vadd.f32 %v2462_v57, %v2238_v13  ;;  %v2913_v51 = vpack.c.bf16 %v2249_v42, %v2246_v4  ;;  %v2241_v25 = vadd.f32 %v2240_v60, %v2080_v21  ;;  %v2531_v37 = vadd.f32 %v2530_v28, %v2500_v30  ;;  %v5081_v60 = vld [vmem:[#allocation9_spill] sm:$0xff] }
 0x1fd   : > { %v3399_v9 = vpop.f32.mrf.mxu1  ;;  %v3479_v54 = vpop.f32.mrf.mxu0  ;;  %v2101_v49 = vadd.f32 %v3397_v18, %v5077_v40  ;;  %v2504_v31 = vmul.f32 %v2249_v42, %v2249_v42 }
 0x1fe   : > { %2960 = vst [vmem:[%s4904_s28 + $0x58] sm:$0xff] %v2913_v51   ;;  %v3400_v32 = vadd.f32 %v3399_v9, %v3398_v59  ;;  %v2908_v2 = vpack.c.bf16 %v2241_v25, %v2238_v13  ;;  %v2464_v38 = vadd.f32 %v2463_v52, %v2241_v25  ;;  %v2502_v29 = vmul.f32 %v2241_v25, %v2241_v25  ;;  %v5080_v13 = vld [vmem:[#allocation6_spill] sm:$0xff] }
 0x1ff   : > { %v2532_v55 = vadd.f32 %v2531_v37, %v2501_v20  ;;  %v3401_v39 = vpop.f32.mrf.mxu1  ;;  %v2253_v47 = vpop.f32.mrf.mxu0  ;;  %v2262_v7 = vadd.f32 %v3479_v54, %v2101_v49  ;;  %v5082_v20 = vld [vmem:[#allocation12_spill] sm:$0xff] }
 0x200   : > { %2959 = vst [vmem:[%s4904_s28 + $0x50] sm:$0xff] %v2908_v2   ;;  %v2465_v35 = vadd.f32 %v2464_v38, %v2246_v4  ;;  %v2104_v50 = vadd.f32 %v3400_v32, %v5078_v10  ;;  %v2254_v41 = vadd.f32 %v2253_v47, %v2093_v36 }
 0x201   : > { %v2533_v26 = vadd.f32 %v2532_v55, %v2502_v29  ;;  %v3402_v62 = vpop.f32.mrf.mxu1  ;;  %v3480_v19 = vpop.f32.mrf.mxu0 }
 0x202   : > { %v2466_v43 = vadd.f32 %v2465_v35, %v2249_v42  ;;  %v2265_v58 = vadd.f32 %v3480_v19, %v2104_v50  ;;  %v3403_v17 = vadd.f32 %v3402_v62, %v3401_v39  ;;  %v2505_v8 = vmul.f32 %v2254_v41, %v2254_v41 }
 0x203   : > { %v2534_v15 = vadd.f32 %v2533_v26, %v2503_v33  ;;  %v3404_v44 = vpop.f32.mrf.mxu1  ;;  %v2256_v53 = vpop.f32.mrf.mxu0  ;;  %v2507_v42 = vmul.f32 %v2262_v7, %v2262_v7 }
 0x204   : > { %v2467_v12 = vadd.f32 %v2466_v43, %v2254_v41  ;;  %v2923_v27 = vpack.c.bf16 %v2265_v58, %v2262_v7  ;;  %v2257_v61 = vadd.f32 %v2256_v53, %v2096_v11  ;;  %v2109_v6 = vadd.f32 %v3403_v17, %v5080_v13 }
 0x205   : > { %v2535_v34 = vadd.f32 %v2534_v15, %v2504_v31  ;;  %v3405_v14 = vpop.f32.mrf.mxu1  ;;  %v3483_v45 = vpop.f32.mrf.mxu0  ;;  %v2508_v52 = vmul.f32 %v2265_v58, %v2265_v58 }
 0x206   : > { %2962 = vst [vmem:[%s4904_s28 + $0x68] sm:$0xff] %v2923_v27   ;;  %v3406_v1 = vadd.f32 %v3405_v14, %v3404_v44  ;;  %v2918_v16 = vpack.c.bf16 %v2257_v61, %v2254_v41  ;;  %v2468_v46 = vadd.f32 %v2467_v12, %v2257_v61  ;;  %v2506_v48 = vmul.f32 %v2257_v61, %v2257_v61 }
 0x207   : > { %v2536_v3 = vadd.f32 %v2535_v34, %v2505_v8  ;;  %v3407_v23 = vpop.f32.mrf.mxu1  ;;  %v2269_v4 = vpop.f32.mrf.mxu0 }
 0x208   : > { %2961 = vst [vmem:[%s4904_s28 + $0x60] sm:$0xff] %v2918_v16   ;;  %v2469_v57 = vadd.f32 %v2468_v46, %v2262_v7  ;;  %v2270_v0 = vadd.f32 %v2269_v4, %v2109_v6  ;;  %v2112_v18 = vadd.f32 %v3406_v1, %v5081_v60 }
 0x209   : > { %v2537_v63 = vadd.f32 %v2536_v3, %v2506_v48  ;;  %v3408_v21 = vpop.f32.mrf.mxu1  ;;  %v3484_v30 = vpop.f32.mrf.mxu0 }
 0x20a   : > { %v3409_v28 = vadd.f32 %v3408_v21, %v3407_v23  ;;  %v2470_v59 = vadd.f32 %v2469_v57, %v2265_v58  ;;  %v2509_v32 = vmul.f32 %v2270_v0, %v2270_v0 }
 0x20b   : > { %v2538_v51 = vadd.f32 %v2537_v63, %v2507_v42  ;;  %v3410_v25 = vpop.f32.mrf.mxu1  ;;  %v2272_v56 = vpop.f32.mrf.mxu0 }
 0x20c   : > { %v2117_v37 = vadd.f32 %v3409_v28, %v5082_v20  ;;  %v2471_v9 = vadd.f32 %v2470_v59, %v2270_v0  ;;  %v2273_v54 = vadd.f32 %v2272_v56, %v2112_v18 }
 0x20d   : > { %v2539_v2 = vadd.f32 %v2538_v51, %v2508_v52  ;;  %v3411_v38 = vpop.f32.mrf.mxu1 }
 0x20e   : > { %v2278_v29 = vadd.f32 %v3483_v45, %v2117_v37  ;;  %v3412_v55 = vadd.f32 %v3411_v38, %v3410_v25  ;;  %v2928_v39 = vpack.c.bf16 %v2273_v54, %v2270_v0  ;;  %v2472_v22 = vadd.f32 %v2471_v9, %v2273_v54 }
 0x20f   : > { %v2540_v36 = vadd.f32 %v2539_v2, %v2509_v32  ;;  %v2510_v47 = vmul.f32 %v2273_v54, %v2273_v54 }
 0x210   : > { %v2120_v35 = vadd.f32 %v3412_v55, %v4885_v5  ;;  %2963 = vst [vmem:[%s4904_s28 + $0x70] sm:$0xff] %v2928_v39   ;;  %v2473_v40 = vadd.f32 %v2472_v22, %v2278_v29  ;;  %v2511_v49 = vmul.f32 %v2278_v29, %v2278_v29 }
 0x211   : > { %v2541_v10 = vadd.f32 %v2540_v36, %v2510_v47 }
 0x212   : > { %v2281_v50 = vadd.f32 %v3484_v30, %v2120_v35 }
 0x213   : > { %v2542_v33 = vadd.f32 %v2541_v10, %v2511_v49 }
 0x214   : > { %v2933_v26 = vpack.c.bf16 %v2281_v50, %v2278_v29  ;;  %v2512_v62 = vmul.f32 %v2281_v50, %v2281_v50  ;;  %v2474_v41 = vadd.f32 %v2473_v40, %v2281_v50 }
 0x216   : > { %2964 = vst [vmem:[%s4904_s28 + $0x78] sm:$0xff] %v2933_v26   ;;  %v2475_v19 = vrot.slane %v2474_v41, 4  ;;  %v2543_v7 = vadd.f32 %v2542_v33, %v2512_v62 }
 0x218   : > { %v2476_v43 = vadd.f32 %v2475_v19, %v2474_v41  ;;  %v2544_v58 = vrot.slane %v2543_v7, 4 }
 0x21a   : > { %v2477_v24 = vrot.slane %v2476_v43, 2  ;;  %v2545_v11 = vadd.f32 %v2544_v58, %v2543_v7 }
 0x21c   : > { %v2478_v31 = vadd.f32 %v2477_v24, %v2476_v43  ;;  %v2546_v15 = vrot.slane %v2545_v11, 2 }
 0x21e   : > { %v2479_v5 = vrot.slane %v2478_v31, 1  ;;  %v2547_v17 = vadd.f32 %v2546_v15, %v2545_v11 }
 0x220   : > { %v2548_v44 = vrot.slane %v2547_v17, 1  ;;  %v2480_v53 = vadd.f32 %v2479_v5, %v2478_v31 }
 0x222   : > { %v2549_v12 = vadd.f32 %v2548_v44, %v2547_v17 }
 0x224   : > { %v2551_v27 = vsel %vm2550_vm2, %v2480_v53, %v2549_v12 }
 0x225   : > { %2552 = vst [vmem:[%s235_s6] sm:$0x3] %v2551_v27 }
 0x226 PF: > { %s16_s18 = sadd.s32 1, %s3591_s18  }
 0x227   : > { %p13_p4 = scmp.ge.s32.totalorder %s16_s18, 4  }
 0x229   :  { %15 = sbr.rel (!%p13_p4) target bundleno = 1 (0x1), region = 80 }

</bundles_post_ra>
